<compile_context>
chip_gen: v7x
topology: tpu7x:2x2x1
jax: 0.10.0
libtpu: 0.0.40
codegen_flags: <defaults>
</compile_context>

<pallas_src>
import functools

import jax
import jax.numpy as jnp
from jax import lax
from jax.experimental import pallas as pl
from jax.experimental.pallas import tpu as pltpu

NEG_SLOPE = 0.2
BN_EPS = 1e-5
LANE = 128                          # pad K and C_out to multiples of the lane width
TM_MAX = 512                        # M-tile (sublane) size when M is large
VMEM_LIMIT = 32 * 1024 * 1024       # inside v5e/v6e/v7x scoped VMEM
FUSED_VMEM_BUDGET = 12 * 1024 * 1024  # take the fully fused Conv+BN path below this

_CP_PAR = pltpu.CompilerParams(
    dimension_semantics=("parallel",),
    vmem_limit_bytes=VMEM_LIMIT,
)
_CP_ARB = pltpu.CompilerParams(
    dimension_semantics=("arbitrary",),
    vmem_limit_bytes=VMEM_LIMIT,
)


def _round_up(x, m):
    return (x + m - 1) // m * m


def _m_tiling(m):
    """Pick an M tile. Large M: TM_MAX tiles (M padded up). Small M: one full block."""
    if m >= TM_MAX:
        tm = TM_MAX
        mp = _round_up(m, tm)
    else:
        tm = m            # block dim == full array dim is always allowed
        mp = m
    return tm, mp, mp // tm


# ----------------------------- Pallas kernels ------------------------------ #

def _conv_bias_lrelu_kernel(x_ref, w_ref, b_ref, o_ref):
    # conv-as-matmul (bf16 in, f32 acc) + bias + LeakyReLU(0.2)
    y = jnp.dot(x_ref[...], w_ref[...], preferred_element_type=jnp.float32)
    y = y + b_ref[...]
    o_ref[...] = jnp.where(y >= 0.0, y, NEG_SLOPE * y).astype(o_ref.dtype)


def _conv_bias_sigmoid_kernel(x_ref, w_ref, b_ref, o_ref):
    # final conv-as-matmul + bias + numerically stable sigmoid
    y = jnp.dot(x_ref[...], w_ref[...], preferred_element_type=jnp.float32)
    y = y + b_ref[...]
    e = jnp.exp(-jnp.abs(y))
    inv = 1.0 / (1.0 + e)
    o_ref[...] = jnp.where(y >= 0.0, inv, e * inv).astype(o_ref.dtype)


def _conv_bn_lrelu_fused_kernel(x_ref, w_ref, g_ref, bta_ref, o_ref, *, inv_m):
    # Fully fused Conv + BatchNorm (training-mode batch stats) + LeakyReLU.
    # Valid when the whole (M, C_out) activation is a single VMEM block, so
    # the channel statistics are exact without any cross-tile reduction.
    y = jnp.dot(x_ref[...], w_ref[...], preferred_element_type=jnp.float32)
    mean = jnp.sum(y, axis=0, keepdims=True) * inv_m
    var = jnp.maximum(jnp.sum(y * y, axis=0, keepdims=True) * inv_m - mean * mean, 0.0)
    scale = g_ref[...] * lax.rsqrt(var + BN_EPS)
    shift = bta_ref[...] - mean * scale
    z = y * scale + shift
    o_ref[...] = jnp.where(z >= 0.0, z, NEG_SLOPE * z).astype(o_ref.dtype)


def _conv_stats_kernel(x_ref, w_ref, y_ref, sum_ref, sq_ref):
    # Fallback pass 1 (large M): conv-as-matmul; also emit per-tile per-channel
    # sum and sum-of-squares so BN statistics are finished without re-reading y.
    y = jnp.dot(x_ref[...], w_ref[...], preferred_element_type=jnp.float32)
    y_ref[...] = y
    s = jnp.sum(y, axis=0, keepdims=True)        # (1, Cpad)
    s2 = jnp.sum(y * y, axis=0, keepdims=True)   # (1, Cpad)
    c = s.shape[1]
    sum_ref[...] = jnp.broadcast_to(s, (8, c))
    sq_ref[...] = jnp.broadcast_to(s2, (8, c))


def _bn_lrelu_kernel(y_ref, scale_ref, shift_ref, o_ref):
    # Fallback pass 2: y * scale + shift (folds mean/var/gamma/beta) + LeakyReLU
    z = y_ref[...] * scale_ref[...] + shift_ref[...]
    o_ref[...] = jnp.where(z >= 0.0, z, NEG_SLOPE * z).astype(o_ref.dtype)


# --------------------------- pallas_call wrappers --------------------------- #

def _pallas_conv_act(kernel, x_mat, w_mat, b_row, tm, nm, kpad, cpad, out_dtype):
    mp = x_mat.shape[0]
    return pl.pallas_call(
        kernel,
        out_shape=jax.ShapeDtypeStruct((mp, cpad), out_dtype),
        grid=(nm,),
        in_specs=[
            pl.BlockSpec((tm, kpad), lambda mi: (mi, 0)),
            pl.BlockSpec((kpad, cpad), lambda mi: (0, 0)),
            pl.BlockSpec((1, cpad), lambda mi: (0, 0)),
        ],
        out_specs=pl.BlockSpec((tm, cpad), lambda mi: (mi, 0)),
        compiler_params=_CP_PAR,
    )(x_mat, w_mat, b_row)


def _pallas_conv_bn_lrelu_fused(x_mat, w_mat, g_row, b_row, m, kpad, cpad):
    kern = functools.partial(_conv_bn_lrelu_fused_kernel, inv_m=1.0 / float(m))
    return pl.pallas_call(
        kern,
        out_shape=jax.ShapeDtypeStruct((m, cpad), jnp.bfloat16),
        grid=(1,),
        in_specs=[
            pl.BlockSpec((m, kpad), lambda mi: (0, 0)),
            pl.BlockSpec((kpad, cpad), lambda mi: (0, 0)),
            pl.BlockSpec((1, cpad), lambda mi: (0, 0)),
            pl.BlockSpec((1, cpad), lambda mi: (0, 0)),
        ],
        out_specs=pl.BlockSpec((m, cpad), lambda mi: (0, 0)),
        compiler_params=_CP_ARB,
    )(x_mat, w_mat, g_row, b_row)


def _pallas_conv_bn_stats(x_mat, w_mat, tm, nm, kpad, cpad):
    mp = x_mat.shape[0]
    return pl.pallas_call(
        _conv_stats_kernel,
        out_shape=(
            jax.ShapeDtypeStruct((mp, cpad), jnp.float32),
            jax.ShapeDtypeStruct((nm * 8, cpad), jnp.float32),
            jax.ShapeDtypeStruct((nm * 8, cpad), jnp.float32),
        ),
        grid=(nm,),
        in_specs=[
            pl.BlockSpec((tm, kpad), lambda mi: (mi, 0)),
            pl.BlockSpec((kpad, cpad), lambda mi: (0, 0)),
        ],
        out_specs=(
            pl.BlockSpec((tm, cpad), lambda mi: (mi, 0)),
            pl.BlockSpec((8, cpad), lambda mi: (mi, 0)),
            pl.BlockSpec((8, cpad), lambda mi: (mi, 0)),
        ),
        compiler_params=_CP_PAR,
    )(x_mat, w_mat)


def _pallas_bn_lrelu(y, scale_row, shift_row, tm, nm, cpad):
    mp = y.shape[0]
    return pl.pallas_call(
        _bn_lrelu_kernel,
        out_shape=jax.ShapeDtypeStruct((mp, cpad), jnp.bfloat16),
        grid=(nm,),
        in_specs=[
            pl.BlockSpec((tm, cpad), lambda mi: (mi, 0)),
            pl.BlockSpec((1, cpad), lambda mi: (0, 0)),
            pl.BlockSpec((1, cpad), lambda mi: (0, 0)),
        ],
        out_specs=pl.BlockSpec((tm, cpad), lambda mi: (mi, 0)),
        compiler_params=_CP_PAR,
    )(y, scale_row, shift_row)


# ------------------------------ host-side glue ------------------------------ #

def _im2col(x_nhwc, k, s, p):
    """NHWC -> (N*HO*WO, k*k*C) patches, feature order (kh, kw, cin)."""
    n, h, w, c = x_nhwc.shape
    if p > 0:
        x_nhwc = jnp.pad(x_nhwc, ((0, 0), (p, p), (p, p), (0, 0)))
    hp, wp = h + 2 * p, w + 2 * p
    ho = (hp - k) // s + 1
    wo = (wp - k) // s + 1
    cols = []
    for kh in range(k):
        for kw in range(k):
            cols.append(x_nhwc[:, kh:kh + s * (ho - 1) + 1:s,
                               kw:kw + s * (wo - 1) + 1:s, :])
    patches = jnp.stack(cols, axis=3)            # (N, HO, WO, k*k, C)
    return patches.reshape(n * ho * wo, k * k * c), n, ho, wo


def init_discriminator_params(key, in_chans, hidden_chans):
    # (cin, cout, kernel, stride, pad, has_batchnorm)
    specs = [
        (in_chans,         hidden_chans,     4, 2, 1, False),  # Conv + LeakyReLU
        (hidden_chans,     hidden_chans * 2, 4, 2, 1, True),   # DisConv
        (hidden_chans * 2, hidden_chans * 4, 4, 2, 1, True),   # DisConv
        (hidden_chans * 4, hidden_chans * 8, 4, 2, 1, True),   # DisConv
        (hidden_chans * 8, 1,                4, 2, 0, False),  # Conv + Sigmoid
    ]
    params = []
    for (cin, cout, k, s, p, bn) in specs:
        key, kw_, kb_ = jax.random.split(key, 3)
        fan_in = cin * k * k
        bound = 1.0 / float(fan_in) ** 0.5
        w = jax.random.uniform(kw_, (cout, cin, k, k), jnp.float32, -bound, bound)
        b = jax.random.uniform(kb_, (cout,), jnp.float32, -bound, bound)
        layer = {"w": w, "b": b, "k": k, "s": s, "p": p, "bn": bn}
        if bn:
            layer["gamma"] = jnp.ones((cout,), jnp.float32)   # PyTorch BN defaults
            layer["beta"] = jnp.zeros((cout,), jnp.float32)
        params.append(layer)
    return params


def discriminator_forward(params, x_nchw):
    x = jnp.transpose(x_nchw, (0, 2, 3, 1)).astype(jnp.float32)  # NCHW -> NHWC
    n_layers = len(params)
    for i, layer in enumerate(params):
        k, s, p = layer["k"], layer["s"], layer["p"]
        cout = layer["w"].shape[0]

        # TODO(synk): fuse im2col into the conv kernel (grid over (kh,kw) taps
        # with strided in-kernel slices) to avoid materializing the patch
        # matrix in HBM between layers; kept host-side here for robustness.
        x_mat, n, ho, wo = _im2col(x, k, s, p)
        m, kdim = x_mat.shape
        kpad = _round_up(kdim, LANE)
        cpad = _round_up(cout, LANE)

        # bf16 matmul weight, zero-padded to lane-dense K / C_out.
        w_mat = jnp.transpose(layer["w"], (2, 3, 1, 0)).reshape(kdim, cout)
        w_mat = jnp.pad(w_mat, ((0, kpad - kdim), (0, cpad - cout))).astype(jnp.bfloat16)

        if layer["bn"]:
            # Conv bias omitted: BatchNorm mean subtraction cancels it exactly.
            gamma = jnp.pad(layer["gamma"], (0, cpad - cout)).reshape(1, cpad)
            beta = jnp.pad(layer["beta"], (0, cpad - cout)).reshape(1, cpad)
            fused_bytes = 2 * m * kpad + 2 * kpad * cpad + 10 * m * cpad
            if fused_bytes <= FUSED_VMEM_BUDGET:
                # Single fully-fused kernel: no HBM round-trip of pre-BN y.
                x_pad = jnp.pad(x_mat, ((0, 0), (0, kpad - kdim))).astype(jnp.bfloat16)
                y = _pallas_conv_bn_lrelu_fused(
                    x_pad, w_mat,
                    gamma.astype(jnp.float32), beta.astype(jnp.float32),
                    m, kpad, cpad)
            else:
                # Two-pass tiled fallback for large M.
                tm, mp, nm = _m_tiling(m)
                x_pad = jnp.pad(x_mat, ((0, mp - m), (0, kpad - kdim))).astype(jnp.bfloat16)
                y, psum, psq = _pallas_conv_bn_stats(x_pad, w_mat, tm, nm, kpad, cpad)
                tot = psum.reshape(nm, 8, cpad)[:, 0, :].sum(axis=0)
                tot2 = psq.reshape(nm, 8, cpad)[:, 0, :].sum(axis=0)
                mean = tot / m                                   # padded rows are zero
                var = jnp.maximum(tot2 / m - mean * mean, 0.0)   # biased var (PyTorch norm)
                scale = gamma[0] * lax.rsqrt(var + BN_EPS)
                shift = beta[0] - mean * scale
                y = _pallas_bn_lrelu(
                    y,
                    scale.reshape(1, cpad).astype(jnp.float32),
                    shift.reshape(1, cpad).astype(jnp.float32),
                    tm, nm, cpad)
        else:
            tm, mp, nm = _m_tiling(m)
            x_pad = jnp.pad(x_mat, ((0, mp - m), (0, kpad - kdim))).astype(jnp.bfloat16)
            b_row = jnp.pad(layer["b"], (0, cpad - cout)).reshape(1, cpad).astype(jnp.float32)
            is_last = (i == n_layers - 1)
            kern = _conv_bias_sigmoid_kernel if is_last else _conv_bias_lrelu_kernel
            out_dtype = jnp.float32 if is_last else jnp.bfloat16
            y = _pallas_conv_act(kern, x_pad, w_mat, b_row, tm, nm, kpad, cpad, out_dtype)

        x = y[:m, :cout].reshape(n, ho, wo, cout)

    return jnp.transpose(x, (0, 3, 1, 2)).astype(jnp.float32)  # NHWC -> NCHW


# ----------------------------------- main ----------------------------------- #

if __name__ == "__main__":
    key = jax.random.PRNGKey(0)
    in_chans, hidden_chans = 3, 8
    batch, spatial = 2, 64  # 64x64 -> 32 -> 16 -> 8 -> 4 -> 1 (DCGAN geometry)

    k_params, k_x = jax.random.split(key)
    params = init_discriminator_params(k_params, in_chans, hidden_chans)
    x = jax.random.normal(k_x, (batch, in_chans, spatial, spatial), jnp.float32)

    fwd = jax.jit(lambda inp: discriminator_forward(params, inp))
    out = jax.block_until_ready(fwd(x))

    assert out.shape == (batch, 1, 1, 1), out.shape
    assert bool(jnp.all(jnp.isfinite(out)))
    assert bool(jnp.all((out >= 0.0) & (out <= 1.0)))
    print("KERNEL_OK")
</pallas_src>

<mosaic_0001>
module attributes {stable_mosaic.version = 11 : i64} {
  func.func @_conv_bias_lrelu_kernel(%arg0: i32, %arg1: memref<512x128xbf16, #tpu.memory_space<vmem>>, %arg2: memref<128x128xbf16, #tpu.memory_space<vmem>>, %arg3: memref<1x128xf32, #tpu.memory_space<vmem>>, %arg4: memref<512x128xbf16, #tpu.memory_space<vmem>>) attributes {dimension_semantics = [#tpu.dimension_semantics<parallel>], iteration_bounds = array<i64: 4>, scalar_prefetch = 0 : i64, scratch_operands = 0 : i64, tpu.core_type = #tpu.core_type<tc>, window_params = [{transform_indices = @transform_0, window_bounds = array<i64: 512, 128>}, {pipeline_mode = #tpu.pipeline_mode<synchronous>, transform_indices = @transform_1, window_bounds = array<i64: 128, 128>}, {pipeline_mode = #tpu.pipeline_mode<synchronous>, transform_indices = @transform_2, window_bounds = array<i64: 1, 128>}, {transform_indices = @transform_3, window_bounds = array<i64: 512, 128>}]} {
    %c0 = arith.constant 0 : index
    %c0_0 = arith.constant 0 : index
    %0 = vector.load %arg1[%c0, %c0_0] : memref<512x128xbf16, #tpu.memory_space<vmem>>, vector<512x128xbf16>
    %c0_1 = arith.constant 0 : index
    %c0_2 = arith.constant 0 : index
    %1 = vector.load %arg2[%c0_1, %c0_2] : memref<128x128xbf16, #tpu.memory_space<vmem>>, vector<128x128xbf16>
    %cst = arith.constant dense<0.000000e+00> : vector<512x128xf32>
    %2 = tpu.matmul %0, %1, %cst {dimension_numbers = #tpu.dot_dimension_numbers<[1], [0], [0], [1], [0, 0, 1, 1], [], []>} : vector<512x128xbf16>, vector<128x128xbf16>, vector<512x128xf32> -> vector<512x128xf32>
    %c0_3 = arith.constant 0 : index
    %c0_4 = arith.constant 0 : index
    %3 = vector.load %arg3[%c0_3, %c0_4] : memref<1x128xf32, #tpu.memory_space<vmem>>, vector<1x128xf32>
    %4 = vector.broadcast %3 : vector<1x128xf32> to vector<512x128xf32>
    %5 = arith.addf %2, %4 : vector<512x128xf32>
    %cst_5 = arith.constant 0.000000e+00 : f32
    %6 = vector.broadcast %cst_5 : f32 to vector<512x128xf32>
    %7 = arith.cmpf oge, %5, %6 : vector<512x128xf32>
    %cst_6 = arith.constant 2.000000e-01 : f32
    %8 = vector.broadcast %cst_6 : f32 to vector<512x128xf32>
    %9 = arith.mulf %8, %5 : vector<512x128xf32>
    %10 = arith.select %7, %5, %9 : vector<512x128xi1>, vector<512x128xf32>
    %11 = arith.truncf %10 : vector<512x128xf32> to vector<512x128xbf16>
    %c0_7 = arith.constant 0 : index
    %c0_8 = arith.constant 0 : index
    %12 = vector.load %arg4[%c0_7, %c0_8] : memref<512x128xbf16, #tpu.memory_space<vmem>>, vector<512x128xbf16>
    tpu.vector_store %arg4[%c0_7, %c0_8], %11 {strides = array<i32>} : memref<512x128xbf16, #tpu.memory_space<vmem>>, vector<512x128xbf16>,
    return
  }
  func.func @transform_0(%arg0: i32) -> (i32, i32) {
    %c0_i32 = arith.constant 0 : i32
    %c0_i32_0 = arith.constant 0 : i32
    return %arg0, %c0_i32 : i32, i32
  }
  func.func @transform_1(%arg0: i32) -> (i32, i32) {
    %c0_i32 = arith.constant 0 : i32
    %c0_i32_0 = arith.constant 0 : i32
    %c0_i32_1 = arith.constant 0 : i32
    return %c0_i32, %c0_i32_0 : i32, i32
  }
  func.func @transform_2(%arg0: i32) -> (i32, i32) {
    %c0_i32 = arith.constant 0 : i32
    %c0_i32_0 = arith.constant 0 : i32
    %c0_i32_1 = arith.constant 0 : i32
    return %c0_i32, %c0_i32_0 : i32, i32
  }
  func.func @transform_3(%arg0: i32) -> (i32, i32) {
    %c0_i32 = arith.constant 0 : i32
    %c0_i32_0 = arith.constant 0 : i32
    return %arg0, %c0_i32 : i32, i32
  }
}

module attributes {stable_mosaic.version = 11 : i64} {
  func.func @_conv_bn_lrelu_fused_kernel(%arg0: i32, %arg1: memref<512x128xbf16, #tpu.memory_space<vmem>>, %arg2: memref<128x128xbf16, #tpu.memory_space<vmem>>, %arg3: memref<1x128xf32, #tpu.memory_space<vmem>>, %arg4: memref<1x128xf32, #tpu.memory_space<vmem>>, %arg5: memref<512x128xbf16, #tpu.memory_space<vmem>>) attributes {dimension_semantics = [#tpu.dimension_semantics<arbitrary>], iteration_bounds = array<i64: 1>, scalar_prefetch = 0 : i64, scratch_operands = 0 : i64, tpu.core_type = #tpu.core_type<tc>, window_params = [{pipeline_mode = #tpu.pipeline_mode<synchronous>, transform_indices = @transform_0, window_bounds = array<i64: 512, 128>}, {pipeline_mode = #tpu.pipeline_mode<synchronous>, transform_indices = @transform_1, window_bounds = array<i64: 128, 128>}, {pipeline_mode = #tpu.pipeline_mode<synchronous>, transform_indices = @transform_2, window_bounds = array<i64: 1, 128>}, {pipeline_mode = #tpu.pipeline_mode<synchronous>, transform_indices = @transform_3, window_bounds = array<i64: 1, 128>}, {pipeline_mode = #tpu.pipeline_mode<synchronous>, transform_indices = @transform_4, window_bounds = array<i64: 512, 128>}]} {
    %c0 = arith.constant 0 : index
    %c0_0 = arith.constant 0 : index
    %0 = vector.load %arg1[%c0, %c0_0] : memref<512x128xbf16, #tpu.memory_space<vmem>>, vector<512x128xbf16>
    %c0_1 = arith.constant 0 : index
    %c0_2 = arith.constant 0 : index
    %1 = vector.load %arg2[%c0_1, %c0_2] : memref<128x128xbf16, #tpu.memory_space<vmem>>, vector<128x128xbf16>
    %cst = arith.constant dense<0.000000e+00> : vector<512x128xf32>
    %2 = tpu.matmul %0, %1, %cst {dimension_numbers = #tpu.dot_dimension_numbers<[1], [0], [0], [1], [0, 0, 1, 1], [], []>} : vector<512x128xbf16>, vector<128x128xbf16>, vector<512x128xf32> -> vector<512x128xf32>
    %cst_3 = arith.constant dense<0.000000e+00> : vector<128xf32>
    %3 = vector.multi_reduction <add>, %2, %cst_3 [0] : vector<512x128xf32> to vector<128xf32>
    %4 = vector.shape_cast %3 : vector<128xf32> to vector<1x128xf32>
    %cst_4 = arith.constant 0.001953125 : f32
    %5 = vector.broadcast %cst_4 : f32 to vector<1x128xf32>
    %6 = arith.mulf %4, %5 : vector<1x128xf32>
    %7 = arith.mulf %2, %2 : vector<512x128xf32>
    %cst_5 = arith.constant dense<0.000000e+00> : vector<128xf32>
    %8 = vector.multi_reduction <add>, %7, %cst_5 [0] : vector<512x128xf32> to vector<128xf32>
    %9 = vector.shape_cast %8 : vector<128xf32> to vector<1x128xf32>
    %cst_6 = arith.constant 0.001953125 : f32
    %10 = vector.broadcast %cst_6 : f32 to vector<1x128xf32>
    %11 = arith.mulf %9, %10 : vector<1x128xf32>
    %12 = arith.mulf %6, %6 : vector<1x128xf32>
    %13 = arith.subf %11, %12 : vector<1x128xf32>
    %cst_7 = arith.constant 0.000000e+00 : f32
    %14 = vector.broadcast %cst_7 : f32 to vector<1x128xf32>
    %15 = arith.maximumf %13, %14 : vector<1x128xf32>
    %c0_8 = arith.constant 0 : index
    %c0_9 = arith.constant 0 : index
    %16 = vector.load %arg3[%c0_8, %c0_9] : memref<1x128xf32, #tpu.memory_space<vmem>>, vector<1x128xf32>
    %cst_10 = arith.constant 9.99999974E-6 : f32
    %17 = vector.broadcast %cst_10 : f32 to vector<1x128xf32>
    %18 = arith.addf %15, %17 : vector<1x128xf32>
    %19 = math.rsqrt %18 : vector<1x128xf32>
    %20 = arith.mulf %16, %19 : vector<1x128xf32>
    %c0_11 = arith.constant 0 : index
    %c0_12 = arith.constant 0 : index
    %21 = vector.load %arg4[%c0_11, %c0_12] : memref<1x128xf32, #tpu.memory_space<vmem>>, vector<1x128xf32>
    %22 = arith.mulf %6, %20 : vector<1x128xf32>
    %23 = arith.subf %21, %22 : vector<1x128xf32>
    %24 = vector.broadcast %20 : vector<1x128xf32> to vector<512x128xf32>
    %25 = arith.mulf %2, %24 : vector<512x128xf32>
    %26 = vector.broadcast %23 : vector<1x128xf32> to vector<512x128xf32>
    %27 = arith.addf %25, %26 : vector<512x128xf32>
    %cst_13 = arith.constant 0.000000e+00 : f32
    %28 = vector.broadcast %cst_13 : f32 to vector<512x128xf32>
    %29 = arith.cmpf oge, %27, %28 : vector<512x128xf32>
    %cst_14 = arith.constant 2.000000e-01 : f32
    %30 = vector.broadcast %cst_14 : f32 to vector<512x128xf32>
    %31 = arith.mulf %30, %27 : vector<512x128xf32>
    %32 = arith.select %29, %27, %31 : vector<512x128xi1>, vector<512x128xf32>
    %33 = arith.truncf %32 : vector<512x128xf32> to vector<512x128xbf16>
    %c0_15 = arith.constant 0 : index
    %c0_16 = arith.constant 0 : index
    %34 = vector.load %arg5[%c0_15, %c0_16] : memref<512x128xbf16, #tpu.memory_space<vmem>>, vector<512x128xbf16>
    tpu.vector_store %arg5[%c0_15, %c0_16], %33 {strides = array<i32>} : memref<512x128xbf16, #tpu.memory_space<vmem>>, vector<512x128xbf16>,
    return
  }
  func.func @transform_0(%arg0: i32) -> (i32, i32) {
    %c0_i32 = arith.constant 0 : i32
    %c0_i32_0 = arith.constant 0 : i32
    %c0_i32_1 = arith.constant 0 : i32
    return %c0_i32, %c0_i32_0 : i32, i32
  }
  func.func @transform_1(%arg0: i32) -> (i32, i32) {
    %c0_i32 = arith.constant 0 : i32
    %c0_i32_0 = arith.constant 0 : i32
    %c0_i32_1 = arith.constant 0 : i32
    return %c0_i32, %c0_i32_0 : i32, i32
  }
  func.func @transform_2(%arg0: i32) -> (i32, i32) {
    %c0_i32 = arith.constant 0 : i32
    %c0_i32_0 = arith.constant 0 : i32
    %c0_i32_1 = arith.constant 0 : i32
    return %c0_i32, %c0_i32_0 : i32, i32
  }
  func.func @transform_3(%arg0: i32) -> (i32, i32) {
    %c0_i32 = arith.constant 0 : i32
    %c0_i32_0 = arith.constant 0 : i32
    %c0_i32_1 = arith.constant 0 : i32
    return %c0_i32, %c0_i32_0 : i32, i32
  }
  func.func @transform_4(%arg0: i32) -> (i32, i32) {
    %c0_i32 = arith.constant 0 : i32
    %c0_i32_0 = arith.constant 0 : i32
    %c0_i32_1 = arith.constant 0 : i32
    return %c0_i32, %c0_i32_0 : i32, i32
  }
}

module attributes {stable_mosaic.version = 11 : i64} {
  func.func @_conv_bn_lrelu_fused_kernel(%arg0: i32, %arg1: memref<128x256xbf16, #tpu.memory_space<vmem>>, %arg2: memref<256x128xbf16, #tpu.memory_space<vmem>>, %arg3: memref<1x128xf32, #tpu.memory_space<vmem>>, %arg4: memref<1x128xf32, #tpu.memory_space<vmem>>, %arg5: memref<128x128xbf16, #tpu.memory_space<vmem>>) attributes {dimension_semantics = [#tpu.dimension_semantics<arbitrary>], iteration_bounds = array<i64: 1>, scalar_prefetch = 0 : i64, scratch_operands = 0 : i64, tpu.core_type = #tpu.core_type<tc>, window_params = [{pipeline_mode = #tpu.pipeline_mode<synchronous>, transform_indices = @transform_0, window_bounds = array<i64: 128, 256>}, {pipeline_mode = #tpu.pipeline_mode<synchronous>, transform_indices = @transform_1, window_bounds = array<i64: 256, 128>}, {pipeline_mode = #tpu.pipeline_mode<synchronous>, transform_indices = @transform_2, window_bounds = array<i64: 1, 128>}, {pipeline_mode = #tpu.pipeline_mode<synchronous>, transform_indices = @transform_3, window_bounds = array<i64: 1, 128>}, {pipeline_mode = #tpu.pipeline_mode<synchronous>, transform_indices = @transform_4, window_bounds = array<i64: 128, 128>}]} {
    %c0 = arith.constant 0 : index
    %c0_0 = arith.constant 0 : index
    %0 = vector.load %arg1[%c0, %c0_0] : memref<128x256xbf16, #tpu.memory_space<vmem>>, vector<128x256xbf16>
    %c0_1 = arith.constant 0 : index
    %c0_2 = arith.constant 0 : index
    %1 = vector.load %arg2[%c0_1, %c0_2] : memref<256x128xbf16, #tpu.memory_space<vmem>>, vector<256x128xbf16>
    %cst = arith.constant dense<0.000000e+00> : vector<128x128xf32>
    %2 = tpu.matmul %0, %1, %cst {dimension_numbers = #tpu.dot_dimension_numbers<[1], [0], [0], [1], [0, 0, 1, 1], [], []>} : vector<128x256xbf16>, vector<256x128xbf16>, vector<128x128xf32> -> vector<128x128xf32>
    %cst_3 = arith.constant dense<0.000000e+00> : vector<128xf32>
    %3 = vector.multi_reduction <add>, %2, %cst_3 [0] : vector<128x128xf32> to vector<128xf32>
    %4 = vector.shape_cast %3 : vector<128xf32> to vector<1x128xf32>
    %cst_4 = arith.constant 7.812500e-03 : f32
    %5 = vector.broadcast %cst_4 : f32 to vector<1x128xf32>
    %6 = arith.mulf %4, %5 : vector<1x128xf32>
    %7 = arith.mulf %2, %2 : vector<128x128xf32>
    %cst_5 = arith.constant dense<0.000000e+00> : vector<128xf32>
    %8 = vector.multi_reduction <add>, %7, %cst_5 [0] : vector<128x128xf32> to vector<128xf32>
    %9 = vector.shape_cast %8 : vector<128xf32> to vector<1x128xf32>
    %cst_6 = arith.constant 7.812500e-03 : f32
    %10 = vector.broadcast %cst_6 : f32 to vector<1x128xf32>
    %11 = arith.mulf %9, %10 : vector<1x128xf32>
    %12 = arith.mulf %6, %6 : vector<1x128xf32>
    %13 = arith.subf %11, %12 : vector<1x128xf32>
    %cst_7 = arith.constant 0.000000e+00 : f32
    %14 = vector.broadcast %cst_7 : f32 to vector<1x128xf32>
    %15 = arith.maximumf %13, %14 : vector<1x128xf32>
    %c0_8 = arith.constant 0 : index
    %c0_9 = arith.constant 0 : index
    %16 = vector.load %arg3[%c0_8, %c0_9] : memref<1x128xf32, #tpu.memory_space<vmem>>, vector<1x128xf32>
    %cst_10 = arith.constant 9.99999974E-6 : f32
    %17 = vector.broadcast %cst_10 : f32 to vector<1x128xf32>
    %18 = arith.addf %15, %17 : vector<1x128xf32>
    %19 = math.rsqrt %18 : vector<1x128xf32>
    %20 = arith.mulf %16, %19 : vector<1x128xf32>
    %c0_11 = arith.constant 0 : index
    %c0_12 = arith.constant 0 : index
    %21 = vector.load %arg4[%c0_11, %c0_12] : memref<1x128xf32, #tpu.memory_space<vmem>>, vector<1x128xf32>
    %22 = arith.mulf %6, %20 : vector<1x128xf32>
    %23 = arith.subf %21, %22 : vector<1x128xf32>
    %24 = vector.broadcast %20 : vector<1x128xf32> to vector<128x128xf32>
    %25 = arith.mulf %2, %24 : vector<128x128xf32>
    %26 = vector.broadcast %23 : vector<1x128xf32> to vector<128x128xf32>
    %27 = arith.addf %25, %26 : vector<128x128xf32>
    %cst_13 = arith.constant 0.000000e+00 : f32
    %28 = vector.broadcast %cst_13 : f32 to vector<128x128xf32>
    %29 = arith.cmpf oge, %27, %28 : vector<128x128xf32>
    %cst_14 = arith.constant 2.000000e-01 : f32
    %30 = vector.broadcast %cst_14 : f32 to vector<128x128xf32>
    %31 = arith.mulf %30, %27 : vector<128x128xf32>
    %32 = arith.select %29, %27, %31 : vector<128x128xi1>, vector<128x128xf32>
    %33 = arith.truncf %32 : vector<128x128xf32> to vector<128x128xbf16>
    %c0_15 = arith.constant 0 : index
    %c0_16 = arith.constant 0 : index
    %34 = vector.load %arg5[%c0_15, %c0_16] : memref<128x128xbf16, #tpu.memory_space<vmem>>, vector<128x128xbf16>
    tpu.vector_store %arg5[%c0_15, %c0_16], %33 {strides = array<i32>} : memref<128x128xbf16, #tpu.memory_space<vmem>>, vector<128x128xbf16>,
    return
  }
  func.func @transform_0(%arg0: i32) -> (i32, i32) {
    %c0_i32 = arith.constant 0 : i32
    %c0_i32_0 = arith.constant 0 : i32
    %c0_i32_1 = arith.constant 0 : i32
    return %c0_i32, %c0_i32_0 : i32, i32
  }
  func.func @transform_1(%arg0: i32) -> (i32, i32) {
    %c0_i32 = arith.constant 0 : i32
    %c0_i32_0 = arith.constant 0 : i32
    %c0_i32_1 = arith.constant 0 : i32
    return %c0_i32, %c0_i32_0 : i32, i32
  }
  func.func @transform_2(%arg0: i32) -> (i32, i32) {
    %c0_i32 = arith.constant 0 : i32
    %c0_i32_0 = arith.constant 0 : i32
    %c0_i32_1 = arith.constant 0 : i32
    return %c0_i32, %c0_i32_0 : i32, i32
  }
  func.func @transform_3(%arg0: i32) -> (i32, i32) {
    %c0_i32 = arith.constant 0 : i32
    %c0_i32_0 = arith.constant 0 : i32
    %c0_i32_1 = arith.constant 0 : i32
    return %c0_i32, %c0_i32_0 : i32, i32
  }
  func.func @transform_4(%arg0: i32) -> (i32, i32) {
    %c0_i32 = arith.constant 0 : i32
    %c0_i32_0 = arith.constant 0 : i32
    %c0_i32_1 = arith.constant 0 : i32
    return %c0_i32, %c0_i32_0 : i32, i32
  }
}

module attributes {stable_mosaic.version = 11 : i64} {
  func.func @_conv_bn_lrelu_fused_kernel(%arg0: i32, %arg1: memref<32x512xbf16, #tpu.memory_space<vmem>>, %arg2: memref<512x128xbf16, #tpu.memory_space<vmem>>, %arg3: memref<1x128xf32, #tpu.memory_space<vmem>>, %arg4: memref<1x128xf32, #tpu.memory_space<vmem>>, %arg5: memref<32x128xbf16, #tpu.memory_space<vmem>>) attributes {dimension_semantics = [#tpu.dimension_semantics<arbitrary>], iteration_bounds = array<i64: 1>, scalar_prefetch = 0 : i64, scratch_operands = 0 : i64, tpu.core_type = #tpu.core_type<tc>, window_params = [{pipeline_mode = #tpu.pipeline_mode<synchronous>, transform_indices = @transform_0, window_bounds = array<i64: 32, 512>}, {pipeline_mode = #tpu.pipeline_mode<synchronous>, transform_indices = @transform_1, window_bounds = array<i64: 512, 128>}, {pipeline_mode = #tpu.pipeline_mode<synchronous>, transform_indices = @transform_2, window_bounds = array<i64: 1, 128>}, {pipeline_mode = #tpu.pipeline_mode<synchronous>, transform_indices = @transform_3, window_bounds = array<i64: 1, 128>}, {pipeline_mode = #tpu.pipeline_mode<synchronous>, transform_indices = @transform_4, window_bounds = array<i64: 32, 128>}]} {
    %c0 = arith.constant 0 : index
    %c0_0 = arith.constant 0 : index
    %0 = vector.load %arg1[%c0, %c0_0] : memref<32x512xbf16, #tpu.memory_space<vmem>>, vector<32x512xbf16>
    %c0_1 = arith.constant 0 : index
    %c0_2 = arith.constant 0 : index
    %1 = vector.load %arg2[%c0_1, %c0_2] : memref<512x128xbf16, #tpu.memory_space<vmem>>, vector<512x128xbf16>
    %cst = arith.constant dense<0.000000e+00> : vector<32x128xf32>
    %2 = tpu.matmul %0, %1, %cst {dimension_numbers = #tpu.dot_dimension_numbers<[1], [0], [0], [1], [0, 0, 1, 1], [], []>} : vector<32x512xbf16>, vector<512x128xbf16>, vector<32x128xf32> -> vector<32x128xf32>
    %cst_3 = arith.constant dense<0.000000e+00> : vector<128xf32>
    %3 = vector.multi_reduction <add>, %2, %cst_3 [0] : vector<32x128xf32> to vector<128xf32>
    %4 = vector.shape_cast %3 : vector<128xf32> to vector<1x128xf32>
    %cst_4 = arith.constant 3.125000e-02 : f32
    %5 = vector.broadcast %cst_4 : f32 to vector<1x128xf32>
    %6 = arith.mulf %4, %5 : vector<1x128xf32>
    %7 = arith.mulf %2, %2 : vector<32x128xf32>
    %cst_5 = arith.constant dense<0.000000e+00> : vector<128xf32>
    %8 = vector.multi_reduction <add>, %7, %cst_5 [0] : vector<32x128xf32> to vector<128xf32>
    %9 = vector.shape_cast %8 : vector<128xf32> to vector<1x128xf32>
    %cst_6 = arith.constant 3.125000e-02 : f32
    %10 = vector.broadcast %cst_6 : f32 to vector<1x128xf32>
    %11 = arith.mulf %9, %10 : vector<1x128xf32>
    %12 = arith.mulf %6, %6 : vector<1x128xf32>
    %13 = arith.subf %11, %12 : vector<1x128xf32>
    %cst_7 = arith.constant 0.000000e+00 : f32
    %14 = vector.broadcast %cst_7 : f32 to vector<1x128xf32>
    %15 = arith.maximumf %13, %14 : vector<1x128xf32>
    %c0_8 = arith.constant 0 : index
    %c0_9 = arith.constant 0 : index
    %16 = vector.load %arg3[%c0_8, %c0_9] : memref<1x128xf32, #tpu.memory_space<vmem>>, vector<1x128xf32>
    %cst_10 = arith.constant 9.99999974E-6 : f32
    %17 = vector.broadcast %cst_10 : f32 to vector<1x128xf32>
    %18 = arith.addf %15, %17 : vector<1x128xf32>
    %19 = math.rsqrt %18 : vector<1x128xf32>
    %20 = arith.mulf %16, %19 : vector<1x128xf32>
    %c0_11 = arith.constant 0 : index
    %c0_12 = arith.constant 0 : index
    %21 = vector.load %arg4[%c0_11, %c0_12] : memref<1x128xf32, #tpu.memory_space<vmem>>, vector<1x128xf32>
    %22 = arith.mulf %6, %20 : vector<1x128xf32>
    %23 = arith.subf %21, %22 : vector<1x128xf32>
    %24 = vector.broadcast %20 : vector<1x128xf32> to vector<32x128xf32>
    %25 = arith.mulf %2, %24 : vector<32x128xf32>
    %26 = vector.broadcast %23 : vector<1x128xf32> to vector<32x128xf32>
    %27 = arith.addf %25, %26 : vector<32x128xf32>
    %cst_13 = arith.constant 0.000000e+00 : f32
    %28 = vector.broadcast %cst_13 : f32 to vector<32x128xf32>
    %29 = arith.cmpf oge, %27, %28 : vector<32x128xf32>
    %cst_14 = arith.constant 2.000000e-01 : f32
    %30 = vector.broadcast %cst_14 : f32 to vector<32x128xf32>
    %31 = arith.mulf %30, %27 : vector<32x128xf32>
    %32 = arith.select %29, %27, %31 : vector<32x128xi1>, vector<32x128xf32>
    %33 = arith.truncf %32 : vector<32x128xf32> to vector<32x128xbf16>
    %c0_15 = arith.constant 0 : index
    %c0_16 = arith.constant 0 : index
    %34 = vector.load %arg5[%c0_15, %c0_16] : memref<32x128xbf16, #tpu.memory_space<vmem>>, vector<32x128xbf16>
    tpu.vector_store %arg5[%c0_15, %c0_16], %33 {strides = array<i32>} : memref<32x128xbf16, #tpu.memory_space<vmem>>, vector<32x128xbf16>,
    return
  }
  func.func @transform_0(%arg0: i32) -> (i32, i32) {
    %c0_i32 = arith.constant 0 : i32
    %c0_i32_0 = arith.constant 0 : i32
    %c0_i32_1 = arith.constant 0 : i32
    return %c0_i32, %c0_i32_0 : i32, i32
  }
  func.func @transform_1(%arg0: i32) -> (i32, i32) {
    %c0_i32 = arith.constant 0 : i32
    %c0_i32_0 = arith.constant 0 : i32
    %c0_i32_1 = arith.constant 0 : i32
    return %c0_i32, %c0_i32_0 : i32, i32
  }
  func.func @transform_2(%arg0: i32) -> (i32, i32) {
    %c0_i32 = arith.constant 0 : i32
    %c0_i32_0 = arith.constant 0 : i32
    %c0_i32_1 = arith.constant 0 : i32
    return %c0_i32, %c0_i32_0 : i32, i32
  }
  func.func @transform_3(%arg0: i32) -> (i32, i32) {
    %c0_i32 = arith.constant 0 : i32
    %c0_i32_0 = arith.constant 0 : i32
    %c0_i32_1 = arith.constant 0 : i32
    return %c0_i32, %c0_i32_0 : i32, i32
  }
  func.func @transform_4(%arg0: i32) -> (i32, i32) {
    %c0_i32 = arith.constant 0 : i32
    %c0_i32_0 = arith.constant 0 : i32
    %c0_i32_1 = arith.constant 0 : i32
    return %c0_i32, %c0_i32_0 : i32, i32
  }
}

module attributes {stable_mosaic.version = 11 : i64} {
  func.func @_conv_bias_sigmoid_kernel(%arg0: i32, %arg1: memref<2x1024xbf16, #tpu.memory_space<vmem>>, %arg2: memref<1024x128xbf16, #tpu.memory_space<vmem>>, %arg3: memref<1x128xf32, #tpu.memory_space<vmem>>, %arg4: memref<2x128xf32, #tpu.memory_space<vmem>>) attributes {dimension_semantics = [#tpu.dimension_semantics<parallel>], iteration_bounds = array<i64: 1>, scalar_prefetch = 0 : i64, scratch_operands = 0 : i64, tpu.core_type = #tpu.core_type<tc>, window_params = [{transform_indices = @transform_0, window_bounds = array<i64: 2, 1024>}, {pipeline_mode = #tpu.pipeline_mode<synchronous>, transform_indices = @transform_1, window_bounds = array<i64: 1024, 128>}, {pipeline_mode = #tpu.pipeline_mode<synchronous>, transform_indices = @transform_2, window_bounds = array<i64: 1, 128>}, {transform_indices = @transform_3, window_bounds = array<i64: 2, 128>}]} {
    %c0 = arith.constant 0 : index
    %c0_0 = arith.constant 0 : index
    %0 = vector.load %arg1[%c0, %c0_0] : memref<2x1024xbf16, #tpu.memory_space<vmem>>, vector<2x1024xbf16>
    %c0_1 = arith.constant 0 : index
    %c0_2 = arith.constant 0 : index
    %1 = vector.load %arg2[%c0_1, %c0_2] : memref<1024x128xbf16, #tpu.memory_space<vmem>>, vector<1024x128xbf16>
    %cst = arith.constant dense<0.000000e+00> : vector<2x128xf32>
    %2 = tpu.matmul %0, %1, %cst {dimension_numbers = #tpu.dot_dimension_numbers<[1], [0], [0], [1], [0, 0, 1, 1], [], []>} : vector<2x1024xbf16>, vector<1024x128xbf16>, vector<2x128xf32> -> vector<2x128xf32>
    %c0_3 = arith.constant 0 : index
    %c0_4 = arith.constant 0 : index
    %3 = vector.load %arg3[%c0_3, %c0_4] : memref<1x128xf32, #tpu.memory_space<vmem>>, vector<1x128xf32>
    %4 = vector.broadcast %3 : vector<1x128xf32> to vector<2x128xf32>
    %5 = arith.addf %2, %4 : vector<2x128xf32>
    %6 = math.absf %5 : vector<2x128xf32>
    %cst_5 = arith.constant 0.000000e+00 : f32
    %7 = vector.broadcast %cst_5 : f32 to vector<2x128xf32>
    %8 = arith.subf %7, %6 : vector<2x128xf32>
    %9 = math.exp %8 : vector<2x128xf32>
    %cst_6 = arith.constant 1.000000e+00 : f32
    %10 = vector.broadcast %cst_6 : f32 to vector<2x128xf32>
    %11 = arith.addf %10, %9 : vector<2x128xf32>
    %cst_7 = arith.constant 1.000000e+00 : f32
    %12 = vector.broadcast %cst_7 : f32 to vector<2x128xf32>
    %13 = arith.divf %12, %11 : vector<2x128xf32>
    %cst_8 = arith.constant 0.000000e+00 : f32
    %14 = vector.broadcast %cst_8 : f32 to vector<2x128xf32>
    %15 = arith.cmpf oge, %5, %14 : vector<2x128xf32>
    %16 = arith.mulf %9, %13 : vector<2x128xf32>
    %17 = arith.select %15, %13, %16 : vector<2x128xi1>, vector<2x128xf32>
    %c0_9 = arith.constant 0 : index
    %c0_10 = arith.constant 0 : index
    %18 = vector.load %arg4[%c0_9, %c0_10] : memref<2x128xf32, #tpu.memory_space<vmem>>, vector<2x128xf32>
    tpu.vector_store %arg4[%c0_9, %c0_10], %17 {strides = array<i32>} : memref<2x128xf32, #tpu.memory_space<vmem>>, vector<2x128xf32>,
    return
  }
  func.func @transform_0(%arg0: i32) -> (i32, i32) {
    %c0_i32 = arith.constant 0 : i32
    %c0_i32_0 = arith.constant 0 : i32
    return %arg0, %c0_i32 : i32, i32
  }
  func.func @transform_1(%arg0: i32) -> (i32, i32) {
    %c0_i32 = arith.constant 0 : i32
    %c0_i32_0 = arith.constant 0 : i32
    %c0_i32_1 = arith.constant 0 : i32
    return %c0_i32, %c0_i32_0 : i32, i32
  }
  func.func @transform_2(%arg0: i32) -> (i32, i32) {
    %c0_i32 = arith.constant 0 : i32
    %c0_i32_0 = arith.constant 0 : i32
    %c0_i32_1 = arith.constant 0 : i32
    return %c0_i32, %c0_i32_0 : i32, i32
  }
  func.func @transform_3(%arg0: i32) -> (i32, i32) {
    %c0_i32 = arith.constant 0 : i32
    %c0_i32_0 = arith.constant 0 : i32
    return %arg0, %c0_i32 : i32, i32
  }
}

</mosaic_0001>

<bundles_post_ra>
// kernel: _lambda_.5
= control target key start
LH: loop header
LB: loop body
LE: loop exit
PB: predicated region body
PF: predicated region fallthrough
CT: control target
= control target key end

     0   :  { %s1942_s12 = smov 0   ;;  %s2136_s0 = inlined_call_operand.vmem [shape: bf16[2048,128], index: 0, kind: input, shape index: {}]   ;;  %s2137_s1 = inlined_call_operand.vmem [shape: bf16[128,128], index: 1, kind: input, shape index: {}]   ;;  %s2138_s2 = inlined_call_operand.vmem [shape: f32[1,128], index: 2, kind: input, shape index: {}]   ;;  %s2139_s3 = inlined_call_operand.vmem [shape: bf16[2048,128], index: 3, kind: output, shape index: {}]  }
   0x1 LB: > { %s1359_s13 = sadd.s32 4294967295, %s1920_s12   ;;  %p1363_p0 = scmp.ge.s32.totalorder %s1920_s12, 1  ;;  %s1920_s12 = sphi %s1942_s12, %s13_s12  }
   0x2   : > { %p138_p1 = scmp.lt.s32.totalorder %s1920_s12, 5 }
   0x4   : > { %p139_p2 = pnand %p1363_p0, %p138_p1 }
   0x5   : > { %v1874_v0 = vld [vmem:[%s2137_s1] sm:$0xff] (!%p139_p2)   ;;  %s1364_s16 = sshll.u32 (!%p139_p2), %s1359_s13, 6  ;;  %v1875_v1 = vld [vmem:[%s2137_s1 + $0x8] sm:$0xff] (!%p139_p2)   ;;  %v1876_v2 = vld [vmem:[%s2137_s1 + $0x10] sm:$0xff] (!%p139_p2)  }
   0x6   : > { %142 = sbr.rel (%p139_p2) target bundleno = 327 (0x147), region = 32  ;;  %p163_p3 = scmp.lt.s32.totalorder (!%p139_p2), %s1364_s16, 255  ;;  %1770 = vmatprep.subr.bf16.mxu0 (!%p139_p2), %v1874_v0  ;;  %1850 = vmatprep.subr.bf16.mxu1 (!%p139_p2), %v1874_v0  ;;  %v1877_v3 = vld [vmem:[%s2137_s1 + $0x18] sm:$0xff] (!%p139_p2)   ;;  %v1878_v6 = vld [vmem:[%s2137_s1 + $0x20] sm:$0xff] (!%p139_p2)   ;;  %v1879_v7 = vld [vmem:[%s2137_s1 + $0x28] sm:$0xff] (!%p139_p2)  }
   0x7   : > { %1771 = vmatpush3.bf16.msra.mxu0 (!%p139_p2), %v1874_v0  ;;  %1858 = vmatpush3.bf16.msra.mxu1 (!%p139_p2), %v1874_v0  ;;  %v1880_v8 = vld [vmem:[%s2137_s1 + $0x30] sm:$0xff] (!%p139_p2)   ;;  %v1881_v9 = vld [vmem:[%s2137_s1 + $0x38] sm:$0xff] (!%p139_p2)   ;;  %v2019_v40 = vld [vmem:[%s2138_s2] ss:$0 sm:$0xff] (!%p139_p2) }
   0x8   : > { %1772 = vmatprep.subr.bf16.mxu0 (!%p139_p2), %v1875_v1  ;;  %1851 = vmatprep.subr.bf16.mxu1 (!%p139_p2), %v1875_v1 }
   0xb   : > { %1773 = vmatpush3.bf16.msra.mxu0 (!%p139_p2), %v1875_v1  ;;  %1859 = vmatpush3.bf16.msra.mxu1 (!%p139_p2), %v1875_v1 }
   0xc   : > { %1774 = vmatprep.subr.bf16.mxu0 (!%p139_p2), %v1876_v2  ;;  %1852 = vmatprep.subr.bf16.mxu1 (!%p139_p2), %v1876_v2 }
   0xd   : > { %s2141_s16 = smov (!%p163_p3, %s1364_s16), 255 }
   0xe   : > { %s1365_s21 = sshll.u32 %s2141_s16, 2 }
   0xf   : > { %s1967_s24 = scalar_lea.vmem %s2136_s0, %s1365_s21  ;;  %1775 = vmatpush3.bf16.msra.mxu0 %v1876_v2  ;;  %1860 = vmatpush3.bf16.msra.mxu1 %v1876_v2  ;;  %s2036_s13 = scalar_lea.vmem %s2139_s3, %s1365_s21 }
  0x10   : > { %v1882_v4 = vld [vmem:[%s1967_s24] sm:$0xff]   ;;  %1776 = vmatprep.subr.bf16.mxu0 %v1877_v3  ;;  %1853 = vmatprep.subr.bf16.mxu1 %v1877_v3  ;;  %v1884_v10 = vld [vmem:[%s1967_s24 + $0x8] sm:$0xff]   ;;  %v1886_v12 = vld [vmem:[%s1967_s24 + $0x10] sm:$0xff]  }
  0x11   : > { %v1883_v5 = vld [vmem:[%s1967_s24 + $0x80] sm:$0xff]   ;;  %1786 = vmatprep.mubr.bf16.mxu0 %v1882_v4  ;;  %v1885_v11 = vld [vmem:[%s1967_s24 + $0x88] sm:$0xff]   ;;  %v1887_v13 = vld [vmem:[%s1967_s24 + $0x90] sm:$0xff]  }
  0x12   : > { %1818 = vmatprep.mubr.bf16.mxu1 %v1883_v5  ;;  %v1888_v14 = vld [vmem:[%s1967_s24 + $0x18] sm:$0xff]   ;;  %v1890_v16 = vld [vmem:[%s1967_s24 + $0x20] sm:$0xff]   ;;  %v1892_v18 = vld [vmem:[%s1967_s24 + $0x28] sm:$0xff]  }
  0x13   : > { %1777 = vmatpush3.bf16.msra.mxu0 %v1877_v3  ;;  %1861 = vmatpush3.bf16.msra.mxu1 %v1877_v3  ;;  %v1889_v15 = vld [vmem:[%s1967_s24 + $0x98] sm:$0xff]   ;;  %v1891_v17 = vld [vmem:[%s1967_s24 + $0xa0] sm:$0xff]   ;;  %v1893_v19 = vld [vmem:[%s1967_s24 + $0xa8] sm:$0xff]  }
  0x14   : > { %1778 = vmatprep.subr.bf16.mxu0 %v1878_v6  ;;  %1854 = vmatprep.subr.bf16.mxu1 %v1878_v6  ;;  %v1894_v20 = vld [vmem:[%s1967_s24 + $0x30] sm:$0xff]   ;;  %v1896_v22 = vld [vmem:[%s1967_s24 + $0x38] sm:$0xff]   ;;  %v1898_v24 = vld [vmem:[%s1967_s24 + $0x40] sm:$0xff]  }
  0x15   : > { %v1895_v21 = vld [vmem:[%s1967_s24 + $0xb0] sm:$0xff]   ;;  %v1897_v23 = vld [vmem:[%s1967_s24 + $0xb8] sm:$0xff]   ;;  %v1899_v25 = vld [vmem:[%s1967_s24 + $0xc0] sm:$0xff]  }
  0x16   : > { %v1900_v26 = vld [vmem:[%s1967_s24 + $0x48] sm:$0xff]   ;;  %v1902_v28 = vld [vmem:[%s1967_s24 + $0x50] sm:$0xff]   ;;  %v1904_v30 = vld [vmem:[%s1967_s24 + $0x58] sm:$0xff]  }
  0x17   : > { %1779 = vmatpush3.bf16.msra.mxu0 %v1878_v6  ;;  %1862 = vmatpush3.bf16.msra.mxu1 %v1878_v6  ;;  %v1901_v27 = vld [vmem:[%s1967_s24 + $0xc8] sm:$0xff]   ;;  %v1903_v29 = vld [vmem:[%s1967_s24 + $0xd0] sm:$0xff]   ;;  %v1905_v31 = vld [vmem:[%s1967_s24 + $0xd8] sm:$0xff]  }
  0x18   : > { %1780 = vmatprep.subr.bf16.mxu0 %v1879_v7  ;;  %1855 = vmatprep.subr.bf16.mxu1 %v1879_v7  ;;  %v1906_v32 = vld [vmem:[%s1967_s24 + $0x60] sm:$0xff]   ;;  %v1908_v34 = vld [vmem:[%s1967_s24 + $0x68] sm:$0xff]   ;;  %v1910_v36 = vld [vmem:[%s1967_s24 + $0x70] sm:$0xff]  }
  0x19   : > { %v1907_v33 = vld [vmem:[%s1967_s24 + $0xe0] sm:$0xff]   ;;  %v1909_v35 = vld [vmem:[%s1967_s24 + $0xe8] sm:$0xff]   ;;  %v1911_v37 = vld [vmem:[%s1967_s24 + $0xf0] sm:$0xff]  }
  0x1a   : > { %v1912_v38 = vld [vmem:[%s1967_s24 + $0x78] sm:$0xff]  }
  0x1b   : > { %1781 = vmatpush3.bf16.msra.mxu0 %v1879_v7  ;;  %1863 = vmatpush3.bf16.msra.mxu1 %v1879_v7  ;;  %v1913_v39 = vld [vmem:[%s1967_s24 + $0xf8] sm:$0xff]  }
  0x1c   : > { %1782 = vmatprep.subr.bf16.mxu0 %v1880_v8  ;;  %1856 = vmatprep.subr.bf16.mxu1 %v1880_v8 }
  0x1f   : > { %1783 = vmatpush3.bf16.msra.mxu0 %v1880_v8  ;;  %1864 = vmatpush3.bf16.msra.mxu1 %v1880_v8 }
  0x20   : > { %1784 = vmatprep.subr.bf16.mxu0 %v1881_v9  ;;  %1857 = vmatprep.subr.bf16.mxu1 %v1881_v9 }
  0x23   : > { %1785 = vmatpush3.bf16.msra.mxu0 %v1881_v9  ;;  %1865 = vmatpush3.bf16.msra.mxu1 %v1881_v9 }
  0x26   : > { %1787 = vmatmul.mubr.bf16.vlgmr.msra.gmra.mrb[0].mxu0 %v1884_v10  ;;  %1819 = vmatmul.mubr.bf16.vlgmr.msra.gmra.mrb[0].mxu1 %v1885_v11 }
  0x27   : > { %1790 = vmatprep.mubr.bf16.mxu0 %v1886_v12  ;;  %1822 = vmatprep.mubr.bf16.mxu1 %v1887_v13 }
  0x2e   : > { %1791 = vmatmul.mubr.bf16.gmra.mrb[4].mxu0 %v1888_v14  ;;  %1823 = vmatmul.mubr.bf16.gmra.mrb[4].mxu1 %v1889_v15 }
  0x2f   : > { %1794 = vmatprep.mubr.bf16.mxu0 %v1890_v16  ;;  %1826 = vmatprep.mubr.bf16.mxu1 %v1891_v17 }
  0x36   : > { %1795 = vmatmul.mubr.bf16.gmra.mrb[8].mxu0 %v1892_v18  ;;  %1827 = vmatmul.mubr.bf16.gmra.mrb[8].mxu1 %v1893_v19 }
  0x37   : > { %1798 = vmatprep.mubr.bf16.mxu0 %v1894_v20  ;;  %1830 = vmatprep.mubr.bf16.mxu1 %v1895_v21 }
  0x3e   : > { %1799 = vmatmul.mubr.bf16.gmra.mrb[12].mxu0 %v1896_v22  ;;  %1831 = vmatmul.mubr.bf16.gmra.mrb[12].mxu1 %v1897_v23 }
  0x3f   : > { %1802 = vmatprep.mubr.bf16.mxu0 %v1898_v24  ;;  %1834 = vmatprep.mubr.bf16.mxu1 %v1899_v25 }
  0x46   : > { %1803 = vmatmul.mubr.bf16.gmra.mrb[16].mxu0 %v1900_v26  ;;  %1835 = vmatmul.mubr.bf16.gmra.mrb[16].mxu1 %v1901_v27 }
  0x47   : > { %1806 = vmatprep.mubr.bf16.mxu0 %v1902_v28  ;;  %1838 = vmatprep.mubr.bf16.mxu1 %v1903_v29 }
  0x4e   : > { %1807 = vmatmul.mubr.bf16.gmra.mrb[20].mxu0 %v1904_v30  ;;  %1839 = vmatmul.mubr.bf16.gmra.mrb[20].mxu1 %v1905_v31 }
  0x4f   : > { %1810 = vmatprep.mubr.bf16.mxu0 %v1906_v32  ;;  %1842 = vmatprep.mubr.bf16.mxu1 %v1907_v33 }
  0x56   : > { %1811 = vmatmul.mubr.bf16.gmra.mrb[24].mxu0 %v1908_v34  ;;  %1843 = vmatmul.mubr.bf16.gmra.mrb[24].mxu1 %v1909_v35 }
  0x57   : > { %1814 = vmatprep.mubr.bf16.mxu0 %v1910_v36  ;;  %1846 = vmatprep.mubr.bf16.mxu1 %v1911_v37 }
  0x5e   : > { %1815 = vmatmul.mubr.bf16.gmra.mrb[28].mxu0 %v1912_v38  ;;  %1847 = vmatmul.mubr.bf16.gmra.mrb[28].mxu1 %v1913_v39 }
  0xf9   : > { %v1788_v41 = vpop.f32.mrb[0].mxu0  ;;  %v1820_v42 = vpop.f32.mrb[0].mxu1 }
  0xfa   : > { %v545_v43 = vadd.f32 %v1788_v41, %v2019_v40  ;;  %v673_v44 = vadd.f32 %v1820_v42, %v2019_v40  ;;  %v536_v45 = vpop.f32.mrb[1].mxu0  ;;  %v664_v46 = vpop.f32.mrb[1].mxu1 }
  0xfb   : > { %v537_v47 = vadd.f32 %v2019_v40, %v536_v45  ;;  %v665_v48 = vadd.f32 %v2019_v40, %v664_v46  ;;  %v1789_v49 = vpop.f32.mrb[2].mxu0  ;;  %v1821_v50 = vpop.f32.mrb[2].mxu1 }
  0xfc   : > { %vm793_vm0 = vcmp.ge.f32.partialorder %v545_v43, 0.0  ;;  %v857_v51 = vmul.f32 0.2, %v545_v43  ;;  %vm825_vm1 = vcmp.ge.f32.partialorder %v673_v44, 0.0  ;;  %v889_v52 = vmul.f32 0.2, %v673_v44 }
  0xfd   : > { %vm791_vm2 = vcmp.ge.f32.partialorder %v537_v47, 0.0  ;;  %v855_v53 = vmul.f32 0.2, %v537_v47  ;;  %vm823_vm3 = vcmp.ge.f32.partialorder %v665_v48, 0.0  ;;  %v887_v54 = vmul.f32 0.2, %v665_v48 }
  0xfe   : > { %v548_v55 = vadd.f32 %v1789_v49, %v2019_v40  ;;  %v676_v56 = vadd.f32 %v1821_v50, %v2019_v40  ;;  %v539_v57 = vpop.f32.mrb[3].mxu0  ;;  %v667_v58 = vpop.f32.mrb[3].mxu1  ;;  %v921_v59 = vsel %vm793_vm0, %v545_v43, %v857_v51  ;;  %v953_v60 = vsel %vm825_vm1, %v673_v44, %v889_v52 }
  0xff   : > { %v540_v61 = vadd.f32 %v2019_v40, %v539_v57  ;;  %v668_v62 = vadd.f32 %v2019_v40, %v667_v58  ;;  %v919_v3 = vsel %vm791_vm2, %v537_v47, %v855_v53  ;;  %v951_v4 = vsel %vm823_vm3, %v665_v48, %v887_v54 }
 0x100   : > { %vm794_vm4 = vcmp.ge.f32.partialorder %v548_v55, 0.0  ;;  %v858_v63 = vmul.f32 0.2, %v548_v55  ;;  %vm826_vm5 = vcmp.ge.f32.partialorder %v676_v56, 0.0  ;;  %v890_v0 = vmul.f32 0.2, %v676_v56 }
 0x101   : > { %vm792_vm6 = vcmp.ge.f32.partialorder %v540_v61, 0.0  ;;  %v856_v1 = vmul.f32 0.2, %v540_v61  ;;  %vm824_vm7 = vcmp.ge.f32.partialorder %v668_v62, 0.0  ;;  %v888_v2 = vmul.f32 0.2, %v668_v62 }
 0x102   : > { %v922_v5 = vsel %vm794_vm4, %v548_v55, %v858_v63  ;;  %v954_v6 = vsel %vm826_vm5, %v676_v56, %v890_v0  ;;  %v1792_v7 = vpop.f32.mrb[4].mxu0  ;;  %v1824_v8 = vpop.f32.mrb[4].mxu1 }
 0x103   : > { %v1547_v9 = vpack.c.bf16 %v922_v5, %v921_v59  ;;  %v1627_v10 = vpack.c.bf16 %v954_v6, %v953_v60  ;;  %v920_v11 = vsel %vm792_vm6, %v540_v61, %v856_v1  ;;  %v952_v12 = vsel %vm824_vm7, %v668_v62, %v888_v2  ;;  %v552_v13 = vpop.f32.mrb[5].mxu0  ;;  %v680_v14 = vpop.f32.mrb[5].mxu1 }
 0x104   : > { %v1542_v15 = vpack.c.bf16 %v920_v11, %v919_v3  ;;  %v1622_v16 = vpack.c.bf16 %v952_v12, %v951_v4  ;;  %v561_v17 = vadd.f32 %v1792_v7, %v2019_v40  ;;  %v689_v18 = vadd.f32 %v1824_v8, %v2019_v40  ;;  %v1793_v19 = vpop.f32.mrb[6].mxu0  ;;  %v1825_v20 = vpop.f32.mrb[6].mxu1 }
 0x105   : > { %1699 = vst [vmem:[%s2036_s13 + $0x8] sm:$0xff] %v1547_v9   ;;  %1715 = vst [vmem:[%s2036_s13 + $0x88] sm:$0xff] %v1627_v10   ;;  %v553_v21 = vadd.f32 %v2019_v40, %v552_v13  ;;  %v681_v22 = vadd.f32 %v2019_v40, %v680_v14  ;;  %v564_v23 = vadd.f32 %v1793_v19, %v2019_v40  ;;  %v555_v25 = vpop.f32.mrb[7].mxu0  ;;  %v683_v26 = vpop.f32.mrb[7].mxu1 }
 0x106   : > { %v692_v24 = vadd.f32 %v1825_v20, %v2019_v40  ;;  %1543 = vst [vmem:[%s2036_s13] sm:$0xff] %v1542_v15   ;;  %1714 = vst [vmem:[%s2036_s13 + $0x80] sm:$0xff] %v1622_v16   ;;  %vm797_vm8 = vcmp.ge.f32.partialorder %v561_v17, 0.0  ;;  %v861_v27 = vmul.f32 0.2, %v561_v17  ;;  %vm829_vm9 = vcmp.ge.f32.partialorder %v689_v18, 0.0 }
 0x107   : > { %v893_v28 = vmul.f32 0.2, %v689_v18  ;;  %vm795_vm10 = vcmp.ge.f32.partialorder %v553_v21, 0.0  ;;  %v859_v29 = vmul.f32 0.2, %v553_v21  ;;  %vm827_vm11 = vcmp.ge.f32.partialorder %v681_v22, 0.0 }
 0x108   : > { %v891_v30 = vmul.f32 0.2, %v681_v22  ;;  %v925_v31 = vsel %vm797_vm8, %v561_v17, %v861_v27  ;;  %vm798_vm12 = vcmp.ge.f32.partialorder %v564_v23, 0.0  ;;  %v862_v33 = vmul.f32 0.2, %v564_v23 }
 0x109   : > { %v957_v32 = vsel %vm829_vm9, %v689_v18, %v893_v28  ;;  %v923_v34 = vsel %vm795_vm10, %v553_v21, %v859_v29  ;;  %vm830_vm13 = vcmp.ge.f32.partialorder %v692_v24, 0.0  ;;  %v894_v36 = vmul.f32 0.2, %v692_v24  ;;  %v1796_v37 = vpop.f32.mrb[8].mxu0  ;;  %v1828_v38 = vpop.f32.mrb[8].mxu1 }
 0x10a   : > { %v955_v35 = vsel %vm827_vm11, %v681_v22, %v891_v30  ;;  %v926_v39 = vsel %vm798_vm12, %v564_v23, %v862_v33  ;;  %v556_v41 = vadd.f32 %v2019_v40, %v555_v25  ;;  %v684_v42 = vadd.f32 %v2019_v40, %v683_v26  ;;  %v568_v44 = vpop.f32.mrb[9].mxu0  ;;  %v696_v45 = vpop.f32.mrb[9].mxu1 }
 0x10b   : > { %v577_v43 = vadd.f32 %v1796_v37, %v2019_v40  ;;  %v1557_v46 = vpack.c.bf16 %v926_v39, %v925_v31  ;;  %v958_v47 = vsel %vm830_vm13, %v692_v24, %v894_v36  ;;  %v705_v48 = vadd.f32 %v1828_v38, %v2019_v40  ;;  %v1797_v50 = vpop.f32.mrb[10].mxu0  ;;  %v1829_v51 = vpop.f32.mrb[10].mxu1 }
 0x10c   : > { %v569_v49 = vadd.f32 %v2019_v40, %v568_v44  ;;  %v1637_v52 = vpack.c.bf16 %v958_v47, %v957_v32  ;;  %vm796_vm14 = vcmp.ge.f32.partialorder %v556_v41, 0.0  ;;  %v860_v53 = vmul.f32 0.2, %v556_v41  ;;  %v571_v54 = vpop.f32.mrb[11].mxu0  ;;  %v699_v55 = vpop.f32.mrb[11].mxu1 }
 0x10d   : > { %vm828_vm15 = vcmp.ge.f32.partialorder %v684_v42, 0.0  ;;  %1701 = vst [vmem:[%s2036_s13 + $0x18] sm:$0xff] %v1557_v46   ;;  %v892_v56 = vmul.f32 0.2, %v684_v42  ;;  %vm801_vm0 = vcmp.ge.f32.partialorder %v577_v43, 0.0  ;;  %vm833_vm1 = vcmp.ge.f32.partialorder %v705_v48, 0.0 }
 0x10e   : > { %v865_v57 = vmul.f32 0.2, %v577_v43  ;;  %1717 = vst [vmem:[%s2036_s13 + $0x98] sm:$0xff] %v1637_v52   ;;  %v924_v58 = vsel %vm796_vm14, %v556_v41, %v860_v53  ;;  %v897_v59 = vmul.f32 0.2, %v705_v48  ;;  %vm799_vm2 = vcmp.ge.f32.partialorder %v569_v49, 0.0 }
 0x10f   : > { %v863_v60 = vmul.f32 0.2, %v569_v49  ;;  %v1552_v61 = vpack.c.bf16 %v924_v58, %v923_v34  ;;  %v956_v62 = vsel %vm828_vm15, %v684_v42, %v892_v56  ;;  %v697_v0 = vadd.f32 %v2019_v40, %v696_v45 }
 0x110   : > { %v929_v63 = vsel %vm801_vm0, %v577_v43, %v865_v57  ;;  %v1632_v1 = vpack.c.bf16 %v956_v62, %v955_v35  ;;  %v961_v2 = vsel %vm833_vm1, %v705_v48, %v897_v59  ;;  %v580_v4 = vadd.f32 %v1797_v50, %v2019_v40 }
 0x111   : > { %v927_v3 = vsel %vm799_vm2, %v569_v49, %v863_v60  ;;  %1700 = vst [vmem:[%s2036_s13 + $0x10] sm:$0xff] %v1552_v61   ;;  %vm831_vm3 = vcmp.ge.f32.partialorder %v697_v0, 0.0  ;;  %v895_v5 = vmul.f32 0.2, %v697_v0  ;;  %v708_v6 = vadd.f32 %v1829_v51, %v2019_v40  ;;  %v1800_v8 = vpop.f32.mrb[12].mxu0  ;;  %v1832_v9 = vpop.f32.mrb[12].mxu1 }
 0x112   : > { %v572_v7 = vadd.f32 %v2019_v40, %v571_v54  ;;  %1716 = vst [vmem:[%s2036_s13 + $0x90] sm:$0xff] %v1632_v1   ;;  %vm802_vm4 = vcmp.ge.f32.partialorder %v580_v4, 0.0  ;;  %v866_v10 = vmul.f32 0.2, %v580_v4  ;;  %v700_v11 = vadd.f32 %v2019_v40, %v699_v55  ;;  %v584_v13 = vpop.f32.mrb[13].mxu0  ;;  %v712_v14 = vpop.f32.mrb[13].mxu1 }
 0x113   : > { %v593_v12 = vadd.f32 %v1800_v8, %v2019_v40  ;;  %v959_v15 = vsel %vm831_vm3, %v697_v0, %v895_v5  ;;  %vm834_vm5 = vcmp.ge.f32.partialorder %v708_v6, 0.0  ;;  %v898_v16 = vmul.f32 0.2, %v708_v6  ;;  %v1801_v17 = vpop.f32.mrb[14].mxu0  ;;  %v1833_v18 = vpop.f32.mrb[14].mxu1 }
 0x114   : > { %vm800_vm6 = vcmp.ge.f32.partialorder %v572_v7, 0.0  ;;  %v930_v19 = vsel %vm802_vm4, %v580_v4, %v866_v10  ;;  %v864_v20 = vmul.f32 0.2, %v572_v7  ;;  %vm832_vm7 = vcmp.ge.f32.partialorder %v700_v11, 0.0  ;;  %v587_v22 = vpop.f32.mrb[15].mxu0  ;;  %v715_v26 = vpop.f32.mrb[15].mxu1 }
 0x115   : > { %v896_v21 = vmul.f32 0.2, %v700_v11  ;;  %v1567_v23 = vpack.c.bf16 %v930_v19, %v929_v63  ;;  %v962_v24 = vsel %vm834_vm5, %v708_v6, %v898_v16  ;;  %vm805_vm8 = vcmp.ge.f32.partialorder %v593_v12, 0.0 }
 0x116   : > { %v869_v25 = vmul.f32 0.2, %v593_v12  ;;  %v1647_v27 = vpack.c.bf16 %v962_v24, %v961_v2  ;;  %v928_v28 = vsel %vm800_vm6, %v572_v7, %v864_v20  ;;  %v721_v30 = vadd.f32 %v1832_v9, %v2019_v40 }
 0x117   : > { %v960_v29 = vsel %vm832_vm7, %v700_v11, %v896_v21  ;;  %1703 = vst [vmem:[%s2036_s13 + $0x28] sm:$0xff] %v1567_v23   ;;  %v1562_v31 = vpack.c.bf16 %v928_v28, %v927_v3  ;;  %v585_v34 = vadd.f32 %v2019_v40, %v584_v13  ;;  %v713_v36 = vadd.f32 %v2019_v40, %v712_v14 }
 0x118   : > { %v1642_v32 = vpack.c.bf16 %v960_v29, %v959_v15  ;;  %v933_v33 = vsel %vm805_vm8, %v593_v12, %v869_v25  ;;  %1719 = vst [vmem:[%s2036_s13 + $0xa8] sm:$0xff] %v1647_v27   ;;  %vm837_vm9 = vcmp.ge.f32.partialorder %v721_v30, 0.0  ;;  %v901_v35 = vmul.f32 0.2, %v721_v30 }
 0x119   : > { %v596_v37 = vadd.f32 %v1801_v17, %v2019_v40  ;;  %1702 = vst [vmem:[%s2036_s13 + $0x20] sm:$0xff] %v1562_v31   ;;  %vm803_vm10 = vcmp.ge.f32.partialorder %v585_v34, 0.0  ;;  %v867_v38 = vmul.f32 0.2, %v585_v34  ;;  %v724_v39 = vadd.f32 %v1833_v18, %v2019_v40  ;;  %v1804_v42 = vpop.f32.mrb[16].mxu0  ;;  %v1836_v43 = vpop.f32.mrb[16].mxu1 }
 0x11a   : > { %1718 = vst [vmem:[%s2036_s13 + $0xa0] sm:$0xff] %v1642_v32   ;;  %v588_v41 = vadd.f32 %v2019_v40, %v587_v22  ;;  %v965_v44 = vsel %vm837_vm9, %v721_v30, %v901_v35  ;;  %vm835_vm11 = vcmp.ge.f32.partialorder %v713_v36, 0.0  ;;  %v899_v45 = vmul.f32 0.2, %v713_v36  ;;  %v600_v46 = vpop.f32.mrb[17].mxu0  ;;  %v728_v47 = vpop.f32.mrb[17].mxu1 }
 0x11b   : > { %vm806_vm12 = vcmp.ge.f32.partialorder %v596_v37, 0.0  ;;  %v931_v48 = vsel %vm803_vm10, %v585_v34, %v867_v38  ;;  %v870_v49 = vmul.f32 0.2, %v596_v37  ;;  %vm838_vm13 = vcmp.ge.f32.partialorder %v724_v39, 0.0  ;;  %v1805_v51 = vpop.f32.mrb[18].mxu0  ;;  %v1837_v55 = vpop.f32.mrb[18].mxu1 }
 0x11c   : > { %v902_v50 = vmul.f32 0.2, %v724_v39  ;;  %v963_v52 = vsel %vm835_vm11, %v713_v36, %v899_v45  ;;  %vm804_vm14 = vcmp.ge.f32.partialorder %v588_v41, 0.0  ;;  %v868_v53 = vmul.f32 0.2, %v588_v41  ;;  %v603_v56 = vpop.f32.mrb[19].mxu0 }
 0x11d   : > { %v716_v54 = vadd.f32 %v2019_v40, %v715_v26  ;;  %v934_v57 = vsel %vm806_vm12, %v596_v37, %v870_v49  ;;  %v609_v59 = vadd.f32 %v1804_v42, %v2019_v40  ;;  %v737_v60 = vadd.f32 %v1836_v43, %v2019_v40  ;;  %v731_v61 = vpop.f32.mrb[19].mxu1 }
 0x11e   : > { %v966_v58 = vsel %vm838_vm13, %v724_v39, %v902_v50  ;;  %v1577_v62 = vpack.c.bf16 %v934_v57, %v933_v33  ;;  %v932_v0 = vsel %vm804_vm14, %v588_v41, %v868_v53  ;;  %v601_v5 = vadd.f32 %v2019_v40, %v600_v46 }
 0x11f   : > { %v1657_v63 = vpack.c.bf16 %v966_v58, %v965_v44  ;;  %vm836_vm15 = vcmp.ge.f32.partialorder %v716_v54, 0.0  ;;  %v1572_v1 = vpack.c.bf16 %v932_v0, %v931_v48  ;;  %v900_v2 = vmul.f32 0.2, %v716_v54 }
 0x120   : > { %vm809_vm0 = vcmp.ge.f32.partialorder %v609_v59, 0.0  ;;  %v873_v3 = vmul.f32 0.2, %v609_v59  ;;  %1705 = vst [vmem:[%s2036_s13 + $0x38] sm:$0xff] %v1577_v62   ;;  %vm841_vm1 = vcmp.ge.f32.partialorder %v737_v60, 0.0  ;;  %v729_v6 = vadd.f32 %v2019_v40, %v728_v47 }
 0x121   : > { %1721 = vst [vmem:[%s2036_s13 + $0xb8] sm:$0xff] %v1657_v63   ;;  %v905_v4 = vmul.f32 0.2, %v737_v60  ;;  %1704 = vst [vmem:[%s2036_s13 + $0x30] sm:$0xff] %v1572_v1   ;;  %v964_v7 = vsel %vm836_vm15, %v716_v54, %v900_v2  ;;  %v612_v9 = vadd.f32 %v1805_v51, %v2019_v40  ;;  %v740_v10 = vadd.f32 %v1837_v55, %v2019_v40  ;;  %v1808_v11 = vpop.f32.mrb[20].mxu0  ;;  %v1840_v12 = vpop.f32.mrb[20].mxu1 }
 0x122   : > { %v937_v8 = vsel %vm809_vm0, %v609_v59, %v873_v3  ;;  %v1652_v13 = vpack.c.bf16 %v964_v7, %v963_v52  ;;  %vm807_vm2 = vcmp.ge.f32.partialorder %v601_v5, 0.0  ;;  %v871_v15 = vmul.f32 0.2, %v601_v5  ;;  %v616_v16 = vpop.f32.mrb[21].mxu0  ;;  %v744_v17 = vpop.f32.mrb[21].mxu1 }
 0x123   : > { %v969_v14 = vsel %vm841_vm1, %v737_v60, %v905_v4  ;;  %vm839_vm3 = vcmp.ge.f32.partialorder %v729_v6, 0.0  ;;  %v903_v18 = vmul.f32 0.2, %v729_v6  ;;  %vm810_vm4 = vcmp.ge.f32.partialorder %v612_v9, 0.0  ;;  %v1809_v23 = vpop.f32.mrb[22].mxu0  ;;  %v1841_v24 = vpop.f32.mrb[22].mxu1 }
 0x124   : > { %v874_v19 = vmul.f32 0.2, %v612_v9  ;;  %1720 = vst [vmem:[%s2036_s13 + $0xb0] sm:$0xff] %v1652_v13   ;;  %v935_v20 = vsel %vm807_vm2, %v601_v5, %v871_v15  ;;  %vm842_vm5 = vcmp.ge.f32.partialorder %v740_v10, 0.0  ;;  %v906_v21 = vmul.f32 0.2, %v740_v10 }
 0x125   : > { %v604_v22 = vadd.f32 %v2019_v40, %v603_v56  ;;  %v967_v25 = vsel %vm839_vm3, %v729_v6, %v903_v18  ;;  %v732_v27 = vadd.f32 %v2019_v40, %v731_v61  ;;  %v625_v28 = vadd.f32 %v1808_v11, %v2019_v40  ;;  %v619_v29 = vpop.f32.mrb[23].mxu0  ;;  %v747_v30 = vpop.f32.mrb[23].mxu1 }
 0x126   : > { %v938_v26 = vsel %vm810_vm4, %v612_v9, %v874_v19  ;;  %v970_v32 = vsel %vm842_vm5, %v740_v10, %v906_v21  ;;  %v753_v38 = vadd.f32 %v1840_v12, %v2019_v40  ;;  %v617_v39 = vadd.f32 %v2019_v40, %v616_v16 }
 0x127   : > { %v1587_v31 = vpack.c.bf16 %v938_v26, %v937_v8  ;;  %vm808_vm6 = vcmp.ge.f32.partialorder %v604_v22, 0.0  ;;  %v872_v33 = vmul.f32 0.2, %v604_v22  ;;  %v1667_v34 = vpack.c.bf16 %v970_v32, %v969_v14 }
 0x128   : > { %vm840_vm7 = vcmp.ge.f32.partialorder %v732_v27, 0.0  ;;  %v904_v35 = vmul.f32 0.2, %v732_v27  ;;  %vm813_vm8 = vcmp.ge.f32.partialorder %v625_v28, 0.0  ;;  %v877_v37 = vmul.f32 0.2, %v625_v28 }
 0x129   : > { %1707 = vst [vmem:[%s2036_s13 + $0x48] sm:$0xff] %v1587_v31   ;;  %v936_v36 = vsel %vm808_vm6, %v604_v22, %v872_v33  ;;  %1723 = vst [vmem:[%s2036_s13 + $0xc8] sm:$0xff] %v1667_v34   ;;  %v745_v43 = vadd.f32 %v2019_v40, %v744_v17  ;;  %v628_v44 = vadd.f32 %v1809_v23, %v2019_v40  ;;  %v1812_v45 = vpop.f32.mrb[24].mxu0  ;;  %v1844_v46 = vpop.f32.mrb[24].mxu1  ;;  %vm845_vm9 = vcmp.ge.f32.partialorder %v753_v38, 0.0 }
 0x12a   : > { %v1582_v41 = vpack.c.bf16 %v936_v36, %v935_v20  ;;  %v968_v42 = vsel %vm840_vm7, %v732_v27, %v904_v35  ;;  %v909_v48 = vmul.f32 0.2, %v753_v38  ;;  %v632_v49 = vpop.f32.mrb[25].mxu0  ;;  %v760_v50 = vpop.f32.mrb[25].mxu1  ;;  %v941_v51 = vsel %vm813_vm8, %v625_v28, %v877_v37 }
 0x12b   : > { %v1662_v47 = vpack.c.bf16 %v968_v42, %v967_v25  ;;  %vm811_vm10 = vcmp.ge.f32.partialorder %v617_v39, 0.0  ;;  %v875_v52 = vmul.f32 0.2, %v617_v39  ;;  %v907_v53 = vmul.f32 0.2, %v745_v43  ;;  %v1813_v56 = vpop.f32.mrb[26].mxu0 }
 0x12c   : > { %1706 = vst [vmem:[%s2036_s13 + $0x40] sm:$0xff] %v1582_v41   ;;  %vm843_vm11 = vcmp.ge.f32.partialorder %v745_v43, 0.0  ;;  %vm814_vm12 = vcmp.ge.f32.partialorder %v628_v44, 0.0  ;;  %v878_v54 = vmul.f32 0.2, %v628_v44  ;;  %v756_v55 = vadd.f32 %v1841_v24, %v2019_v40  ;;  %v1845_v57 = vpop.f32.mrb[26].mxu1 }
 0x12d   : > { %1722 = vst [vmem:[%s2036_s13 + $0xc0] sm:$0xff] %v1662_v47   ;;  %v973_v58 = vsel %vm845_vm9, %v753_v38, %v909_v48  ;;  %v939_v59 = vsel %vm811_vm10, %v617_v39, %v875_v52  ;;  %v620_v60 = vadd.f32 %v2019_v40, %v619_v29  ;;  %v748_v61 = vadd.f32 %v2019_v40, %v747_v30  ;;  %v635_v62 = vpop.f32.mrb[27].mxu0  ;;  %v763_v63 = vpop.f32.mrb[27].mxu1 }
 0x12e   : > { %v942_v0 = vsel %vm814_vm12, %v628_v44, %v878_v54  ;;  %vm846_vm13 = vcmp.ge.f32.partialorder %v756_v55, 0.0  ;;  %v910_v1 = vmul.f32 0.2, %v756_v55  ;;  %v641_v2 = vadd.f32 %v1812_v45, %v2019_v40 }
 0x12f   : > { %v1597_v3 = vpack.c.bf16 %v942_v0, %v941_v51  ;;  %vm812_vm14 = vcmp.ge.f32.partialorder %v620_v60, 0.0  ;;  %v876_v4 = vmul.f32 0.2, %v620_v60  ;;  %vm844_vm15 = vcmp.ge.f32.partialorder %v748_v61, 0.0 }
 0x130   : > { %v974_v5 = vsel %vm846_vm13, %v756_v55, %v910_v1  ;;  %v908_v6 = vmul.f32 0.2, %v748_v61  ;;  %vm817_vm0 = vcmp.ge.f32.partialorder %v641_v2, 0.0  ;;  %v881_v7 = vmul.f32 0.2, %v641_v2 }
 0x131   : > { %1709 = vst [vmem:[%s2036_s13 + $0x58] sm:$0xff] %v1597_v3   ;;  %v1677_v8 = vpack.c.bf16 %v974_v5, %v973_v58  ;;  %v940_v9 = vsel %vm812_vm14, %v620_v60, %v876_v4  ;;  %v769_v10 = vadd.f32 %v1844_v46, %v2019_v40  ;;  %v633_v11 = vadd.f32 %v2019_v40, %v632_v49  ;;  %v1816_v12 = vpop.f32.mrb[28].mxu0  ;;  %v1848_v13 = vpop.f32.mrb[28].mxu1 }
 0x132   : > { %v971_v14 = vsel %vm843_vm11, %v745_v43, %v907_v53  ;;  %v1592_v15 = vpack.c.bf16 %v940_v9, %v939_v59  ;;  %v972_v16 = vsel %vm844_vm15, %v748_v61, %v908_v6  ;;  %v761_v17 = vadd.f32 %v2019_v40, %v760_v50  ;;  %v648_v18 = vpop.f32.mrb[29].mxu0  ;;  %v776_v19 = vpop.f32.mrb[29].mxu1 }
 0x133   : > { %1725 = vst [vmem:[%s2036_s13 + $0xd8] sm:$0xff] %v1677_v8   ;;  %v1672_v20 = vpack.c.bf16 %v972_v16, %v971_v14  ;;  %vm849_vm1 = vcmp.ge.f32.partialorder %v769_v10, 0.0  ;;  %v913_v21 = vmul.f32 0.2, %v769_v10  ;;  %vm815_vm2 = vcmp.ge.f32.partialorder %v633_v11, 0.0  ;;  %v1817_v22 = vpop.f32.mrb[30].mxu0 }
 0x134   : > { %v1849_v23 = vpop.f32.mrb[30].mxu1  ;;  %1708 = vst [vmem:[%s2036_s13 + $0x50] sm:$0xff] %v1592_v15   ;;  %v945_v24 = vsel %vm817_vm0, %v641_v2, %v881_v7  ;;  %v879_v25 = vmul.f32 0.2, %v633_v11  ;;  %vm847_vm3 = vcmp.ge.f32.partialorder %v761_v17, 0.0  ;;  %v644_v26 = vadd.f32 %v1813_v56, %v2019_v40  ;;  %v651_v27 = vpop.f32.mrb[31].mxu0 }
 0x135   : > { %1724 = vst [vmem:[%s2036_s13 + $0xd0] sm:$0xff] %v1672_v20   ;;  %v911_v28 = vmul.f32 0.2, %v761_v17  ;;  %v772_v29 = vadd.f32 %v1845_v57, %v2019_v40  ;;  %v636_v30 = vadd.f32 %v2019_v40, %v635_v62  ;;  %v764_v31 = vadd.f32 %v2019_v40, %v763_v63  ;;  %v779_v32 = vpop.f32.mrb[31].mxu1 }
 0x136   : > { %v977_v33 = vsel %vm849_vm1, %v769_v10, %v913_v21  ;;  %v943_v34 = vsel %vm815_vm2, %v633_v11, %v879_v25  ;;  %vm818_vm4 = vcmp.ge.f32.partialorder %v644_v26, 0.0  ;;  %v882_v35 = vmul.f32 0.2, %v644_v26 }
 0x137   : > { %vm850_vm5 = vcmp.ge.f32.partialorder %v772_v29, 0.0  ;;  %v914_v36 = vmul.f32 0.2, %v772_v29  ;;  %vm816_vm6 = vcmp.ge.f32.partialorder %v636_v30, 0.0  ;;  %v880_v37 = vmul.f32 0.2, %v636_v30 }
 0x138   : > { %v946_v38 = vsel %vm818_vm4, %v644_v26, %v882_v35  ;;  %vm848_vm7 = vcmp.ge.f32.partialorder %v764_v31, 0.0  ;;  %v912_v39 = vmul.f32 0.2, %v764_v31  ;;  %v657_v41 = vadd.f32 %v1816_v12, %v2019_v40 }
 0x139   : > { %v1607_v42 = vpack.c.bf16 %v946_v38, %v945_v24  ;;  %v978_v43 = vsel %vm850_vm5, %v772_v29, %v914_v36  ;;  %v944_v44 = vsel %vm816_vm6, %v636_v30, %v880_v37  ;;  %v785_v45 = vadd.f32 %v1848_v13, %v2019_v40 }
 0x13a   : > { %v975_v46 = vsel %vm847_vm3, %v761_v17, %v911_v28  ;;  %v1687_v47 = vpack.c.bf16 %v978_v43, %v977_v33  ;;  %v1602_v48 = vpack.c.bf16 %v944_v44, %v943_v34  ;;  %v976_v49 = vsel %vm848_vm7, %v764_v31, %v912_v39 }
 0x13b   : > { %1711 = vst [vmem:[%s2036_s13 + $0x68] sm:$0xff] %v1607_v42   ;;  %v1682_v50 = vpack.c.bf16 %v976_v49, %v975_v46  ;;  %vm821_vm8 = vcmp.ge.f32.partialorder %v657_v41, 0.0  ;;  %v885_v51 = vmul.f32 0.2, %v657_v41  ;;  %v917_v52 = vmul.f32 0.2, %v785_v45 }
 0x13c   : > { %1727 = vst [vmem:[%s2036_s13 + $0xe8] sm:$0xff] %v1687_v47   ;;  %1710 = vst [vmem:[%s2036_s13 + $0x60] sm:$0xff] %v1602_v48   ;;  %v649_v53 = vadd.f32 %v2019_v40, %v648_v18  ;;  %v777_v54 = vadd.f32 %v2019_v40, %v776_v19  ;;  %v660_v55 = vadd.f32 %v1817_v22, %v2019_v40  ;;  %vm853_vm9 = vcmp.ge.f32.partialorder %v785_v45, 0.0 }
 0x13d   : > { %v788_v56 = vadd.f32 %v1849_v23, %v2019_v40  ;;  %1726 = vst [vmem:[%s2036_s13 + $0xe0] sm:$0xff] %v1682_v50   ;;  %v652_v57 = vadd.f32 %v2019_v40, %v651_v27  ;;  %v780_v58 = vadd.f32 %v2019_v40, %v779_v32  ;;  %v949_v59 = vsel %vm821_vm8, %v657_v41, %v885_v51 }
 0x13e   : > { %vm819_vm10 = vcmp.ge.f32.partialorder %v649_v53, 0.0  ;;  %v883_v60 = vmul.f32 0.2, %v649_v53  ;;  %v915_v61 = vmul.f32 0.2, %v777_v54  ;;  %vm822_vm11 = vcmp.ge.f32.partialorder %v660_v55, 0.0 }
 0x13f   : > { %v886_v62 = vmul.f32 0.2, %v660_v55  ;;  %vm854_vm12 = vcmp.ge.f32.partialorder %v788_v56, 0.0  ;;  %v918_v63 = vmul.f32 0.2, %v788_v56  ;;  %v981_v0 = vsel %vm853_vm9, %v785_v45, %v917_v52 }
 0x140   : > { %vm851_vm13 = vcmp.ge.f32.partialorder %v777_v54, 0.0  ;;  %vm820_vm14 = vcmp.ge.f32.partialorder %v652_v57, 0.0  ;;  %v884_v1 = vmul.f32 0.2, %v652_v57  ;;  %vm852_vm15 = vcmp.ge.f32.partialorder %v780_v58, 0.0 }
 0x141   : > { %v950_v2 = vsel %vm822_vm11, %v660_v55, %v886_v62  ;;  %v982_v3 = vsel %vm854_vm12, %v788_v56, %v918_v63  ;;  %v916_v40 = vmul.f32 0.2, %v780_v58  ;;  %v947_v4 = vsel %vm819_vm10, %v649_v53, %v883_v60 }
 0x142   : > { %v1617_v5 = vpack.c.bf16 %v950_v2, %v949_v59  ;;  %v1697_v6 = vpack.c.bf16 %v982_v3, %v981_v0  ;;  %v948_v7 = vsel %vm820_vm14, %v652_v57, %v884_v1  ;;  %v979_v8 = vsel %vm851_vm13, %v777_v54, %v915_v61 }
 0x143   : > { %v1612_v9 = vpack.c.bf16 %v948_v7, %v947_v4  ;;  %v980_v10 = vsel %vm852_vm15, %v780_v58, %v916_v40 }
 0x144   : > { %1713 = vst [vmem:[%s2036_s13 + $0x78] sm:$0xff] %v1617_v5   ;;  %1729 = vst [vmem:[%s2036_s13 + $0xf8] sm:$0xff] %v1697_v6   ;;  %v1692_v11 = vpack.c.bf16 %v980_v10, %v979_v8 }
 0x145   : > { %1712 = vst [vmem:[%s2036_s13 + $0x70] sm:$0xff] %v1612_v9  }
 0x146   : > { %1728 = vst [vmem:[%s2036_s13 + $0xf0] sm:$0xff] %v1692_v11  }
 0x147 PF: > { %s13_s12 = sadd.s32 1, %s1920_s12  }
 0x148   : > { %p10_p4 = scmp.ge.s32.totalorder %s13_s12, 6  }
 0x14a   :  { %12 = sbr.rel (!%p10_p4) target bundleno = 1 (0x1), region = 62 }

// kernel: _lambda_.6
= control target key start
LH: loop header
LB: loop body
LE: loop exit
PB: predicated region body
PF: predicated region fallthrough
CT: control target
= control target key end

     0   :  { %s3774_s1 = inlined_call_operand.vmem [shape: bf16[128,128], index: 1, kind: input, shape index: {}]   ;;  %s3775_s0 = inlined_call_operand.vmem [shape: bf16[512,128], index: 0, kind: input, shape index: {}]   ;;  %s3776_s2 = inlined_call_operand.vmem [shape: f32[1,128], index: 2, kind: input, shape index: {}]   ;;  %s3777_s3 = inlined_call_operand.vmem [shape: f32[1,128], index: 3, kind: input, shape index: {}]   ;;  %s3778_s4 = inlined_call_operand.vmem [shape: bf16[512,128], index: 4, kind: output, shape index: {}]  }
   0x1   :  { %v1992_v0 = vld [vmem:[%s3774_s1] sm:$0xff]   ;;  %v1993_v1 = vld [vmem:[%s3774_s1 + $0x8] sm:$0xff]   ;;  %v1994_v2 = vld [vmem:[%s3774_s1 + $0x10] sm:$0xff]  }
   0x2   :  { %1896 = vmatprep.subr.bf16.mxu0 %v1992_v0  ;;  %1976 = vmatprep.subr.bf16.mxu1 %v1992_v0  ;;  %v1995_v3 = vld [vmem:[%s3774_s1 + $0x18] sm:$0xff]   ;;  %v2000_v4 = vld [vmem:[%s3775_s0] sm:$0xff]   ;;  %v1997_v6 = vld [vmem:[%s3774_s1 + $0x28] sm:$0xff]  }
   0x3   :  { %1897 = vmatpush3.bf16.msra.mxu0 %v1992_v0  ;;  %1984 = vmatpush3.bf16.msra.mxu1 %v1992_v0  ;;  %v1996_v5 = vld [vmem:[%s3774_s1 + $0x20] sm:$0xff]   ;;  %v1998_v7 = vld [vmem:[%s3774_s1 + $0x30] sm:$0xff]   ;;  %v1999_v8 = vld [vmem:[%s3774_s1 + $0x38] sm:$0xff]  }
   0x4   :  { %1898 = vmatprep.subr.bf16.mxu0 %v1993_v1  ;;  %1977 = vmatprep.subr.bf16.mxu1 %v1993_v1  ;;  %v2016_v9 = vld [vmem:[%s3775_s0 + $0x80] sm:$0xff]   ;;  %v2001_v10 = vld [vmem:[%s3775_s0 + $0x8] sm:$0xff]   ;;  %v2002_v11 = vld [vmem:[%s3775_s0 + $0x10] sm:$0xff]  }
   0x5   :  { %1912 = vmatprep.mubr.bf16.mxu0 %v2000_v4  ;;  %1944 = vmatprep.mubr.bf16.mxu1 %v2016_v9  ;;  %v2017_v12 = vld [vmem:[%s3775_s0 + $0x88] sm:$0xff]   ;;  %v2018_v13 = vld [vmem:[%s3775_s0 + $0x90] sm:$0xff]   ;;  %v2003_v14 = vld [vmem:[%s3775_s0 + $0x18] sm:$0xff]  }
   0x6   :  { %v2004_v15 = vld [vmem:[%s3775_s0 + $0x20] sm:$0xff]   ;;  %v2019_v16 = vld [vmem:[%s3775_s0 + $0x98] sm:$0xff]   ;;  %v2005_v18 = vld [vmem:[%s3775_s0 + $0x28] sm:$0xff]  }
   0x7   :  { %1899 = vmatpush3.bf16.msra.mxu0 %v1993_v1  ;;  %1985 = vmatpush3.bf16.msra.mxu1 %v1993_v1  ;;  %v2020_v17 = vld [vmem:[%s3775_s0 + $0xa0] sm:$0xff]   ;;  %v2021_v19 = vld [vmem:[%s3775_s0 + $0xa8] sm:$0xff]   ;;  %v2006_v20 = vld [vmem:[%s3775_s0 + $0x30] sm:$0xff]  }
   0x8   :  { %1900 = vmatprep.subr.bf16.mxu0 %v1994_v2  ;;  %1978 = vmatprep.subr.bf16.mxu1 %v1994_v2  ;;  %v2022_v21 = vld [vmem:[%s3775_s0 + $0xb0] sm:$0xff]   ;;  %v2007_v22 = vld [vmem:[%s3775_s0 + $0x38] sm:$0xff]   ;;  %v2008_v24 = vld [vmem:[%s3775_s0 + $0x40] sm:$0xff]  }
   0x9   :  { %v2023_v23 = vld [vmem:[%s3775_s0 + $0xb8] sm:$0xff]   ;;  %v2024_v25 = vld [vmem:[%s3775_s0 + $0xc0] sm:$0xff]   ;;  %v2009_v26 = vld [vmem:[%s3775_s0 + $0x48] sm:$0xff]  }
   0xa   :  { %v2025_v27 = vld [vmem:[%s3775_s0 + $0xc8] sm:$0xff]   ;;  %v2010_v28 = vld [vmem:[%s3775_s0 + $0x50] sm:$0xff]   ;;  %v2011_v30 = vld [vmem:[%s3775_s0 + $0x58] sm:$0xff]  }
   0xb   :  { %1901 = vmatpush3.bf16.msra.mxu0 %v1994_v2  ;;  %1986 = vmatpush3.bf16.msra.mxu1 %v1994_v2  ;;  %v2026_v29 = vld [vmem:[%s3775_s0 + $0xd0] sm:$0xff]   ;;  %v2027_v31 = vld [vmem:[%s3775_s0 + $0xd8] sm:$0xff]   ;;  %v2012_v32 = vld [vmem:[%s3775_s0 + $0x60] sm:$0xff]  }
   0xc   :  { %1902 = vmatprep.subr.bf16.mxu0 %v1995_v3  ;;  %1979 = vmatprep.subr.bf16.mxu1 %v1995_v3  ;;  %v2028_v33 = vld [vmem:[%s3775_s0 + $0xe0] sm:$0xff]   ;;  %v2013_v34 = vld [vmem:[%s3775_s0 + $0x68] sm:$0xff]   ;;  %v2014_v36 = vld [vmem:[%s3775_s0 + $0x70] sm:$0xff]  }
   0xd   :  { %v2029_v35 = vld [vmem:[%s3775_s0 + $0xe8] sm:$0xff]   ;;  %v2030_v37 = vld [vmem:[%s3775_s0 + $0xf0] sm:$0xff]   ;;  %v2015_v38 = vld [vmem:[%s3775_s0 + $0x78] sm:$0xff]  }
   0xe   :  { %v2031_v39 = vld [vmem:[%s3775_s0 + $0xf8] sm:$0xff]  }
   0xf   :  { %1903 = vmatpush3.bf16.msra.mxu0 %v1995_v3  ;;  %1987 = vmatpush3.bf16.msra.mxu1 %v1995_v3 }
  0x10   :  { %1904 = vmatprep.subr.bf16.mxu0 %v1996_v5  ;;  %1980 = vmatprep.subr.bf16.mxu1 %v1996_v5 }
  0x13   :  { %1905 = vmatpush3.bf16.msra.mxu0 %v1996_v5  ;;  %1988 = vmatpush3.bf16.msra.mxu1 %v1996_v5 }
  0x14   :  { %1906 = vmatprep.subr.bf16.mxu0 %v1997_v6  ;;  %1981 = vmatprep.subr.bf16.mxu1 %v1997_v6 }
  0x17   :  { %1907 = vmatpush3.bf16.msra.mxu0 %v1997_v6  ;;  %1989 = vmatpush3.bf16.msra.mxu1 %v1997_v6 }
  0x18   :  { %1908 = vmatprep.subr.bf16.mxu0 %v1998_v7  ;;  %1982 = vmatprep.subr.bf16.mxu1 %v1998_v7 }
  0x1b   :  { %1909 = vmatpush3.bf16.msra.mxu0 %v1998_v7  ;;  %1990 = vmatpush3.bf16.msra.mxu1 %v1998_v7 }
  0x1c   :  { %1910 = vmatprep.subr.bf16.mxu0 %v1999_v8  ;;  %1983 = vmatprep.subr.bf16.mxu1 %v1999_v8 }
  0x1f   :  { %1911 = vmatpush3.bf16.msra.mxu0 %v1999_v8  ;;  %1991 = vmatpush3.bf16.msra.mxu1 %v1999_v8 }
  0x22   :  { %1913 = vmatmul.mubr.bf16.vlgmr.msra.gmra.mrb[0].mxu0 %v2001_v10  ;;  %1945 = vmatmul.mubr.bf16.vlgmr.msra.gmra.mrb[0].mxu1 %v2017_v12 }
  0x23   :  { %1916 = vmatprep.mubr.bf16.mxu0 %v2002_v11  ;;  %1948 = vmatprep.mubr.bf16.mxu1 %v2018_v13 }
  0x2a   :  { %1917 = vmatmul.mubr.bf16.gmra.mrb[4].mxu0 %v2003_v14  ;;  %1949 = vmatmul.mubr.bf16.gmra.mrb[4].mxu1 %v2019_v16 }
  0x2b   :  { %1920 = vmatprep.mubr.bf16.mxu0 %v2004_v15  ;;  %1952 = vmatprep.mubr.bf16.mxu1 %v2020_v17 }
  0x32   :  { %1921 = vmatmul.mubr.bf16.gmra.mrb[8].mxu0 %v2005_v18  ;;  %1953 = vmatmul.mubr.bf16.gmra.mrb[8].mxu1 %v2021_v19 }
  0x33   :  { %1924 = vmatprep.mubr.bf16.mxu0 %v2006_v20  ;;  %1956 = vmatprep.mubr.bf16.mxu1 %v2022_v21 }
  0x3a   :  { %1925 = vmatmul.mubr.bf16.gmra.mrb[12].mxu0 %v2007_v22  ;;  %1957 = vmatmul.mubr.bf16.gmra.mrb[12].mxu1 %v2023_v23 }
  0x3b   :  { %1928 = vmatprep.mubr.bf16.mxu0 %v2008_v24  ;;  %1960 = vmatprep.mubr.bf16.mxu1 %v2024_v25 }
  0x42   :  { %1929 = vmatmul.mubr.bf16.gmra.mrb[16].mxu0 %v2009_v26  ;;  %1961 = vmatmul.mubr.bf16.gmra.mrb[16].mxu1 %v2025_v27 }
  0x43   :  { %1932 = vmatprep.mubr.bf16.mxu0 %v2010_v28  ;;  %1964 = vmatprep.mubr.bf16.mxu1 %v2026_v29 }
  0x4a   :  { %1933 = vmatmul.mubr.bf16.gmra.mrb[20].mxu0 %v2011_v30  ;;  %1965 = vmatmul.mubr.bf16.gmra.mrb[20].mxu1 %v2027_v31 }
  0x4b   :  { %1936 = vmatprep.mubr.bf16.mxu0 %v2012_v32  ;;  %1968 = vmatprep.mubr.bf16.mxu1 %v2028_v33 }
  0x52   :  { %1937 = vmatmul.mubr.bf16.gmra.mrb[24].mxu0 %v2013_v34  ;;  %1969 = vmatmul.mubr.bf16.gmra.mrb[24].mxu1 %v2029_v35 }
  0x53   :  { %1940 = vmatprep.mubr.bf16.mxu0 %v2014_v36  ;;  %1972 = vmatprep.mubr.bf16.mxu1 %v2030_v37 }
  0x5a   :  { %1941 = vmatmul.mubr.bf16.gmra.mrb[28].mxu0 %v2015_v38  ;;  %1973 = vmatmul.mubr.bf16.gmra.mrb[28].mxu1 %v2031_v39 }
  0xf5   :  { %v2179_v40 = vpop.f32.mrb[0].mxu0  ;;  %v2181_v41 = vpop.f32.mrb[0].mxu1 }
  0xf6   :  { %v2183_v42 = vpop.f32.mrb[1].mxu0  ;;  %v2185_v43 = vpop.f32.mrb[1].mxu1  ;;  %v699_v51 = vmul.f32 %v2179_v40, %v2179_v40 }
  0xf7   :  { %v2187_v44 = vpop.f32.mrb[2].mxu0  ;;  %v2189_v45 = vpop.f32.mrb[2].mxu1  ;;  %v697_v48 = vmul.f32 %v2183_v42, %v2183_v42 }
  0xf8   :  { %v2191_v46 = vpop.f32.mrb[3].mxu0  ;;  %v2193_v47 = vpop.f32.mrb[3].mxu1  ;;  %v700_v54 = vmul.f32 %v2187_v44, %v2187_v44 }
  0xf9   :  { %v627_v49 = vadd.f32 %v2191_v46, %v2183_v42  ;;  %v698_v50 = vmul.f32 %v2191_v46, %v2191_v46 }
  0xfb   :  { %v628_v52 = vadd.f32 %v2179_v40, %v627_v49  ;;  %v761_v53 = vadd.f32 %v698_v50, %v697_v48 }
  0xfd   :  { %v762_v55 = vadd.f32 %v761_v53, %v699_v51  ;;  %v2206_v56 = vpop.f32.mrb[4].mxu0  ;;  %v629_v57 = vadd.f32 %v2187_v44, %v628_v52  ;;  %v2209_v58 = vpop.f32.mrb[4].mxu1 }
  0xfe   :  { %v2211_v59 = vpop.f32.mrb[5].mxu0  ;;  %v2213_v60 = vpop.f32.mrb[5].mxu1  ;;  %v703_v7 = vmul.f32 %v2206_v56, %v2206_v56 }
  0xff   :  { %v630_v61 = vadd.f32 %v629_v57, %v2211_v59  ;;  %v701_v62 = vmul.f32 %v2211_v59, %v2211_v59  ;;  %v763_v63 = vadd.f32 %v762_v55, %v700_v54  ;;  %v2218_v0 = vpop.f32.mrb[6].mxu0  ;;  %v2220_v1 = vpop.f32.mrb[6].mxu1 }
 0x100   :  { %v2222_v2 = vpop.f32.mrb[7].mxu0  ;;  %v2224_v3 = vpop.f32.mrb[7].mxu1  ;;  %v704_v10 = vmul.f32 %v2218_v0, %v2218_v0 }
 0x101   :  { %v764_v4 = vadd.f32 %v763_v63, %v701_v62  ;;  %v631_v5 = vadd.f32 %v630_v61, %v2222_v2  ;;  %v702_v6 = vmul.f32 %v2222_v2, %v2222_v2 }
 0x103   :  { %v632_v8 = vadd.f32 %v2206_v56, %v631_v5  ;;  %v765_v9 = vadd.f32 %v764_v4, %v702_v6 }
 0x105   :  { %v766_v11 = vadd.f32 %v765_v9, %v703_v7  ;;  %v2234_v12 = vpop.f32.mrb[8].mxu0  ;;  %v633_v13 = vadd.f32 %v2218_v0, %v632_v8  ;;  %v2237_v14 = vpop.f32.mrb[8].mxu1 }
 0x106   :  { %v2239_v15 = vpop.f32.mrb[9].mxu0  ;;  %v2241_v16 = vpop.f32.mrb[9].mxu1  ;;  %v707_v27 = vmul.f32 %v2234_v12, %v2234_v12 }
 0x107   :  { %v634_v17 = vadd.f32 %v633_v13, %v2239_v15  ;;  %v705_v18 = vmul.f32 %v2239_v15, %v2239_v15  ;;  %v767_v19 = vadd.f32 %v766_v11, %v704_v10  ;;  %v2246_v20 = vpop.f32.mrb[10].mxu0  ;;  %v2248_v21 = vpop.f32.mrb[10].mxu1 }
 0x108   :  { %v2250_v22 = vpop.f32.mrb[11].mxu0  ;;  %v2252_v23 = vpop.f32.mrb[11].mxu1  ;;  %v708_v30 = vmul.f32 %v2246_v20, %v2246_v20 }
 0x109   :  { %v768_v24 = vadd.f32 %v767_v19, %v705_v18  ;;  %v635_v25 = vadd.f32 %v634_v17, %v2250_v22  ;;  %v706_v26 = vmul.f32 %v2250_v22, %v2250_v22 }
 0x10b   :  { %v636_v28 = vadd.f32 %v2234_v12, %v635_v25  ;;  %v769_v29 = vadd.f32 %v768_v24, %v706_v26 }
 0x10d   :  { %v770_v31 = vadd.f32 %v769_v29, %v707_v27  ;;  %v2262_v32 = vpop.f32.mrb[12].mxu0  ;;  %v637_v33 = vadd.f32 %v2246_v20, %v636_v28  ;;  %v2265_v34 = vpop.f32.mrb[12].mxu1 }
 0x10e   :  { %v2267_v35 = vpop.f32.mrb[13].mxu0  ;;  %v2269_v36 = vpop.f32.mrb[13].mxu1  ;;  %v711_v55 = vmul.f32 %v2262_v32, %v2262_v32 }
 0x10f   :  { %v638_v37 = vadd.f32 %v637_v33, %v2267_v35  ;;  %v709_v38 = vmul.f32 %v2267_v35, %v2267_v35  ;;  %v771_v39 = vadd.f32 %v770_v31, %v708_v30  ;;  %v2274_v48 = vpop.f32.mrb[14].mxu0  ;;  %v2276_v49 = vpop.f32.mrb[14].mxu1 }
 0x110   :  { %3834 = vst [vmem:[#allocation2_spill] sm:$0xff] %v2274_v48  ;;  %v2278_v50 = vpop.f32.mrb[15].mxu0  ;;  %v2280_v51 = vpop.f32.mrb[15].mxu1  ;;  %v712_v62 = vmul.f32 %v2274_v48, %v2274_v48 }
 0x111   :  { %v772_v52 = vadd.f32 %v771_v39, %v709_v38  ;;  %v639_v53 = vadd.f32 %v638_v37, %v2278_v50  ;;  %v710_v54 = vmul.f32 %v2278_v50, %v2278_v50 }
 0x113   :  { %v640_v57 = vadd.f32 %v2262_v32, %v639_v53  ;;  %v773_v61 = vadd.f32 %v772_v52, %v710_v54 }
 0x115   :  { %v774_v63 = vadd.f32 %v773_v61, %v711_v55  ;;  %v2290_v4 = vpop.f32.mrb[16].mxu0  ;;  %v641_v5 = vadd.f32 %v2274_v48, %v640_v57  ;;  %v2293_v6 = vpop.f32.mrb[16].mxu1  ;;  %v730_v48 = vmul.f32 %v2193_v47, %v2193_v47 }
 0x116   :  { %3835 = vst [vmem:[#allocation3_spill] sm:$0xff] %v2290_v4  ;;  %v2295_v7 = vpop.f32.mrb[17].mxu0  ;;  %v2297_v8 = vpop.f32.mrb[17].mxu1  ;;  %v715_v27 = vmul.f32 %v2290_v4, %v2290_v4 }
 0x117   :  { %3836 = vst [vmem:[#allocation4_spill] sm:$0xff] %v2295_v7  ;;  %v642_v9 = vadd.f32 %v641_v5, %v2295_v7  ;;  %v713_v10 = vmul.f32 %v2295_v7, %v2295_v7  ;;  %v775_v11 = vadd.f32 %v774_v63, %v712_v62  ;;  %v2302_v13 = vpop.f32.mrb[18].mxu0  ;;  %v2304_v17 = vpop.f32.mrb[18].mxu1 }
 0x118   :  { %3837 = vst [vmem:[#allocation5_spill] sm:$0xff] %v2302_v13  ;;  %v2306_v18 = vpop.f32.mrb[19].mxu0  ;;  %v2308_v19 = vpop.f32.mrb[19].mxu1  ;;  %v716_v30 = vmul.f32 %v2302_v13, %v2302_v13 }
 0x119   :  { %3838 = vst [vmem:[#allocation6_spill] sm:$0xff] %v2306_v18  ;;  %v776_v24 = vadd.f32 %v775_v11, %v713_v10  ;;  %v643_v25 = vadd.f32 %v642_v9, %v2306_v18  ;;  %v714_v26 = vmul.f32 %v2306_v18, %v2306_v18 }
 0x11b   :  { %v644_v28 = vadd.f32 %v2290_v4, %v643_v25  ;;  %v777_v29 = vadd.f32 %v776_v24, %v714_v26 }
 0x11d   :  { %v778_v31 = vadd.f32 %v777_v29, %v715_v27  ;;  %v2318_v33 = vpop.f32.mrb[20].mxu0  ;;  %v645_v37 = vadd.f32 %v2302_v13, %v644_v28  ;;  %v2321_v38 = vpop.f32.mrb[20].mxu1 }
 0x11e   :  { %3839 = vst [vmem:[#allocation7_spill] sm:$0xff] %v2318_v33  ;;  %3840 = vst [vmem:[#allocation8_spill] sm:$0xff] %v2321_v38  ;;  %v2323_v39 = vpop.f32.mrb[21].mxu0  ;;  %v2325_v52 = vpop.f32.mrb[21].mxu1  ;;  %v719_v11 = vmul.f32 %v2318_v33, %v2318_v33 }
 0x11f   :  { %3841 = vst [vmem:[#allocation9_spill] sm:$0xff] %v2323_v39  ;;  %v646_v53 = vadd.f32 %v645_v37, %v2323_v39  ;;  %v717_v54 = vmul.f32 %v2323_v39, %v2323_v39  ;;  %v779_v55 = vadd.f32 %v778_v31, %v716_v30  ;;  %v2330_v57 = vpop.f32.mrb[22].mxu0  ;;  %v2332_v61 = vpop.f32.mrb[22].mxu1 }
 0x120   :  { %3842 = vst [vmem:[#allocation10_spill] sm:$0xff] %v2330_v57  ;;  %3843 = vst [vmem:[#allocation11_spill] sm:$0xff] %v2332_v61  ;;  %v2334_v62 = vpop.f32.mrb[23].mxu0  ;;  %v2336_v63 = vpop.f32.mrb[23].mxu1  ;;  %v720_v26 = vmul.f32 %v2330_v57, %v2330_v57 }
 0x121   :  { %3844 = vst [vmem:[#allocation12_spill] sm:$0xff] %v2334_v62  ;;  %v780_v5 = vadd.f32 %v779_v55, %v717_v54  ;;  %v647_v9 = vadd.f32 %v646_v53, %v2334_v62  ;;  %v718_v10 = vmul.f32 %v2334_v62, %v2334_v62 }
 0x123   :  { %v648_v24 = vadd.f32 %v2318_v33, %v647_v9  ;;  %v781_v25 = vadd.f32 %v780_v5, %v718_v10 }
 0x125   :  { %v782_v27 = vadd.f32 %v781_v25, %v719_v11  ;;  %v2346_v28 = vpop.f32.mrb[24].mxu0  ;;  %v649_v29 = vadd.f32 %v2330_v57, %v648_v24  ;;  %v2349_v30 = vpop.f32.mrb[24].mxu1 }
 0x126   :  { %3845 = vst [vmem:[#allocation13_spill] sm:$0xff] %v2346_v28  ;;  %3846 = vst [vmem:[#allocation14_spill] sm:$0xff] %v2349_v30  ;;  %v2351_v31 = vpop.f32.mrb[25].mxu0  ;;  %v2353_v37 = vpop.f32.mrb[25].mxu1 }
 0x127   :  { %3847 = vst [vmem:[#allocation15_spill] sm:$0xff] %v2351_v31  ;;  %3848 = vst [vmem:[#allocation16_spill] sm:$0xff] %v2353_v37  ;;  %v650_v53 = vadd.f32 %v649_v29, %v2351_v31  ;;  %v721_v54 = vmul.f32 %v2351_v31, %v2351_v31  ;;  %v783_v55 = vadd.f32 %v782_v27, %v720_v26  ;;  %v2358_v5 = vpop.f32.mrb[26].mxu0  ;;  %v2360_v9 = vpop.f32.mrb[26].mxu1 }
 0x128   :  { %3849 = vst [vmem:[#allocation17_spill] sm:$0xff] %v2358_v5  ;;  %3850 = vst [vmem:[#allocation18_spill] sm:$0xff] %v2360_v9  ;;  %v2362_v10 = vpop.f32.mrb[27].mxu0  ;;  %v2364_v11 = vpop.f32.mrb[27].mxu1  ;;  %v723_v29 = vmul.f32 %v2346_v28, %v2346_v28  ;;  %v724_v27 = vmul.f32 %v2358_v5, %v2358_v5 }
 0x129   :  { %3851 = vst [vmem:[#allocation19_spill] sm:$0xff] %v2362_v10  ;;  %3852 = vst [vmem:[#allocation20_spill] sm:$0xff] %v2364_v11  ;;  %v784_v24 = vadd.f32 %v783_v55, %v721_v54  ;;  %v651_v25 = vadd.f32 %v650_v53, %v2362_v10  ;;  %v722_v57 = vmul.f32 %v2362_v10, %v2362_v10 }
 0x12b   :  { %v652_v31 = vadd.f32 %v2346_v28, %v651_v25  ;;  %v785_v26 = vadd.f32 %v784_v24, %v722_v57 }
 0x12d   :  { %v786_v33 = vadd.f32 %v785_v26, %v723_v29  ;;  %v2374_v62 = vpop.f32.mrb[28].mxu0  ;;  %v653_v39 = vadd.f32 %v2358_v5, %v652_v31  ;;  %v2377_v54 = vpop.f32.mrb[28].mxu1 }
 0x12e   :  { %3853 = vst [vmem:[#allocation21_spill] sm:$0xff] %v2377_v54  ;;  %v2379_v53 = vpop.f32.mrb[29].mxu0  ;;  %v2381_v55 = vpop.f32.mrb[29].mxu1 }
 0x12f   :  { %3854 = vst [vmem:[#allocation22_spill] sm:$0xff] %v2379_v53  ;;  %3855 = vst [vmem:[#allocation23_spill] sm:$0xff] %v2381_v55  ;;  %v654_v10 = vadd.f32 %v653_v39, %v2379_v53  ;;  %v725_v25 = vmul.f32 %v2379_v53, %v2379_v53  ;;  %v787_v57 = vadd.f32 %v786_v33, %v724_v27  ;;  %v2386_v24 = vpop.f32.mrb[30].mxu0  ;;  %v2388_v28 = vpop.f32.mrb[30].mxu1 }
 0x130   :  { %v2390_v29 = vpop.f32.mrb[31].mxu0  ;;  %v2392_v26 = vpop.f32.mrb[31].mxu1  ;;  %v727_v39 = vmul.f32 %v2374_v62, %v2374_v62  ;;  %v728_v27 = vmul.f32 %v2386_v24, %v2386_v24 }
 0x131   :  { %3856 = vst [vmem:[#allocation24_spill] sm:$0xff] %v2390_v29  ;;  %3857 = vst [vmem:[#allocation25_spill] sm:$0xff] %v2392_v26  ;;  %v788_v31 = vadd.f32 %v787_v57, %v725_v25  ;;  %v655_v5 = vadd.f32 %v654_v10, %v2390_v29  ;;  %v726_v13 = vmul.f32 %v2390_v29, %v2390_v29 }
 0x132   :  { %v729_v25 = vmul.f32 %v2185_v43, %v2185_v43 }
 0x133   :  { %v656_v53 = vadd.f32 %v2374_v62, %v655_v5  ;;  %v789_v33 = vadd.f32 %v788_v31, %v726_v13  ;;  %v731_v13 = vmul.f32 %v2181_v41, %v2181_v41 }
 0x135   :  { %v790_v4 = vadd.f32 %v789_v33, %v727_v39  ;;  %v657_v18 = vadd.f32 %v2386_v24, %v656_v53  ;;  %v732_v53 = vmul.f32 %v2189_v45, %v2189_v45 }
 0x137   :  { %v658_v10 = vadd.f32 %v657_v18, %v2185_v43  ;;  %v791_v57 = vadd.f32 %v790_v4, %v728_v27  ;;  %v733_v4 = vmul.f32 %v2213_v60, %v2213_v60 }
 0x139   :  { %v792_v7 = vadd.f32 %v791_v57, %v729_v25  ;;  %v659_v29 = vadd.f32 %v658_v10, %v2193_v47  ;;  %v734_v57 = vmul.f32 %v2224_v3, %v2224_v3 }
 0x13b   :  { %v660_v5 = vadd.f32 %v2181_v41, %v659_v29  ;;  %v793_v31 = vadd.f32 %v792_v7, %v730_v48  ;;  %v735_v48 = vmul.f32 %v2209_v58, %v2209_v58 }
 0x13d   :  { %v794_v39 = vadd.f32 %v793_v31, %v731_v13  ;;  %v661_v33 = vadd.f32 %v2189_v45, %v660_v5  ;;  %v736_v13 = vmul.f32 %v2220_v1, %v2220_v1 }
 0x13f   :  { %v662_v18 = vadd.f32 %v661_v33, %v2213_v60  ;;  %v795_v27 = vadd.f32 %v794_v39, %v732_v53  ;;  %v737_v53 = vmul.f32 %v2241_v16, %v2241_v16 }
 0x141   :  { %v796_v25 = vadd.f32 %v795_v27, %v733_v4  ;;  %v663_v10 = vadd.f32 %v662_v18, %v2224_v3  ;;  %v738_v27 = vmul.f32 %v2252_v23, %v2252_v23 }
 0x143   :  { %v664_v7 = vadd.f32 %v2209_v58, %v663_v10  ;;  %v797_v29 = vadd.f32 %v796_v25, %v734_v57  ;;  %v739_v25 = vmul.f32 %v2237_v14, %v2237_v14 }
 0x145   :  { %v798_v5 = vadd.f32 %v797_v29, %v735_v48  ;;  %v665_v31 = vadd.f32 %v2220_v1, %v664_v7  ;;  %v740_v48 = vmul.f32 %v2248_v21, %v2248_v21 }
 0x147   :  { %v666_v39 = vadd.f32 %v665_v31, %v2241_v16  ;;  %v799_v33 = vadd.f32 %v798_v5, %v736_v13  ;;  %v741_v13 = vmul.f32 %v2269_v36, %v2269_v36 }
 0x149   :  { %v800_v4 = vadd.f32 %v799_v33, %v737_v53  ;;  %v667_v18 = vadd.f32 %v666_v39, %v2252_v23  ;;  %v742_v33 = vmul.f32 %v2280_v51, %v2280_v51 }
 0x14b   :  { %v668_v10 = vadd.f32 %v2237_v14, %v667_v18  ;;  %v801_v57 = vadd.f32 %v800_v4, %v738_v27  ;;  %v743_v4 = vmul.f32 %v2265_v34, %v2265_v34 }
 0x14d   :  { %v802_v7 = vadd.f32 %v801_v57, %v739_v25  ;;  %v669_v29 = vadd.f32 %v2248_v21, %v668_v10  ;;  %v744_v25 = vmul.f32 %v2276_v49, %v2276_v49 }
 0x14f   :  { %v670_v5 = vadd.f32 %v669_v29, %v2269_v36  ;;  %v803_v31 = vadd.f32 %v802_v7, %v740_v48  ;;  %v745_v48 = vmul.f32 %v2297_v8, %v2297_v8 }
 0x151   :  { %v804_v53 = vadd.f32 %v803_v31, %v741_v13  ;;  %v671_v39 = vadd.f32 %v670_v5, %v2280_v51  ;;  %v746_v31 = vmul.f32 %v2308_v19, %v2308_v19 }
 0x153   :  { %v672_v18 = vadd.f32 %v2265_v34, %v671_v39  ;;  %v805_v27 = vadd.f32 %v804_v53, %v742_v33  ;;  %v747_v53 = vmul.f32 %v2293_v6, %v2293_v6 }
 0x155   :  { %v806_v10 = vadd.f32 %v805_v27, %v743_v4  ;;  %v673_v57 = vadd.f32 %v2276_v49, %v672_v18  ;;  %v748_v4 = vmul.f32 %v2304_v17, %v2304_v17 }
 0x157   :  { %v674_v7 = vadd.f32 %v673_v57, %v2297_v8  ;;  %v807_v29 = vadd.f32 %v806_v10, %v744_v25  ;;  %v749_v25 = vmul.f32 %v2325_v52, %v2325_v52 }
 0x159   :  { %v808_v13 = vadd.f32 %v807_v29, %v745_v48  ;;  %v675_v5 = vadd.f32 %v674_v7, %v2308_v19  ;;  %v750_v29 = vmul.f32 %v2336_v63, %v2336_v63 }
 0x15b   :  { %v676_v39 = vadd.f32 %v2293_v6, %v675_v5  ;;  %v809_v33 = vadd.f32 %v808_v13, %v746_v31  ;;  %v751_v13 = vmul.f32 %v2321_v38, %v2321_v38 }
 0x15d   :  { %v810_v18 = vadd.f32 %v809_v33, %v747_v53  ;;  %v677_v27 = vadd.f32 %v2304_v17, %v676_v39  ;;  %v752_v53 = vmul.f32 %v2332_v61, %v2332_v61 }
 0x15f   :  { %v678_v10 = vadd.f32 %v677_v27, %v2325_v52  ;;  %v811_v57 = vadd.f32 %v810_v18, %v748_v4  ;;  %v753_v4 = vmul.f32 %v2353_v37, %v2353_v37 }
 0x161   :  { %v812_v48 = vadd.f32 %v811_v57, %v749_v25  ;;  %v679_v7 = vadd.f32 %v678_v10, %v2336_v63  ;;  %v754_v57 = vmul.f32 %v2364_v11, %v2364_v11 }
 0x163   :  { %v680_v5 = vadd.f32 %v2321_v38, %v679_v7  ;;  %v813_v31 = vadd.f32 %v812_v48, %v750_v29  ;;  %v755_v48 = vmul.f32 %v2349_v30, %v2349_v30 }
 0x165   :  { %v814_v39 = vadd.f32 %v813_v31, %v751_v13  ;;  %v681_v33 = vadd.f32 %v2332_v61, %v680_v5  ;;  %v756_v13 = vmul.f32 %v2360_v9, %v2360_v9 }
 0x167   :  { %v682_v18 = vadd.f32 %v681_v33, %v2353_v37  ;;  %v815_v27 = vadd.f32 %v814_v39, %v752_v53  ;;  %v757_v53 = vmul.f32 %v2381_v55, %v2381_v55 }
 0x169   :  { %v816_v25 = vadd.f32 %v815_v27, %v753_v4  ;;  %v683_v10 = vadd.f32 %v682_v18, %v2364_v11  ;;  %v758_v27 = vmul.f32 %v2392_v26, %v2392_v26 }
 0x16b   :  { %v684_v7 = vadd.f32 %v2349_v30, %v683_v10  ;;  %v817_v29 = vadd.f32 %v816_v25, %v754_v57  ;;  %v759_v25 = vmul.f32 %v2377_v54, %v2377_v54 }
 0x16d   :  { %v818_v5 = vadd.f32 %v817_v29, %v755_v48  ;;  %v685_v31 = vadd.f32 %v2360_v9, %v684_v7  ;;  %v760_v48 = vmul.f32 %v2388_v28, %v2388_v28 }
 0x16f   :  { %v686_v39 = vadd.f32 %v685_v31, %v2381_v55  ;;  %v819_v33 = vadd.f32 %v818_v5, %v756_v13 }
 0x171   :  { %v820_v4 = vadd.f32 %v819_v33, %v757_v53  ;;  %v687_v18 = vadd.f32 %v686_v39, %v2392_v26 }
 0x173   :  { %v688_v10 = vadd.f32 %v2377_v54, %v687_v18  ;;  %v821_v57 = vadd.f32 %v820_v4, %v758_v27 }
 0x175   :  { %v689_v7 = vadd.f32 %v2388_v28, %v688_v10  ;;  %v822_v29 = vadd.f32 %v821_v57, %v759_v25  ;;  %v842_v25 = vlaneseq }
 0x177   :  { %v690_v31 = vrot.slane %v689_v7, 4  ;;  %v823_v13 = vadd.f32 %v822_v29, %v760_v48  ;;  %v2499_v57 = vshrl.u32 %v842_v25, 7  ;;  %v834_v48 = vld [vmem:[%s3776_s2] sm:$0x1]  ;;  %v3865_v25 = vld [vmem:[#allocation7_spill] sm:$0xff] }
 0x179   :  { %v691_v5 = vadd.f32 %v690_v31, %v689_v7  ;;  %v824_v53 = vrot.slane %v823_v13, 4  ;;  %v3803_v7 = vsub.s32 0, %v2499_v57 }
 0x17b   :  { %v692_v39 = vrot.slane %v691_v5, 2  ;;  %v825_v33 = vadd.f32 %v824_v53, %v823_v13  ;;  %v3858_v13 = vld [vmem:[#allocation2_spill] sm:$0xff] }
 0x17c   :  { %v3860_v53 = vld [vmem:[#allocation6_spill] sm:$0xff] }
 0x17d   :  { %v693_v55 = vadd.f32 %v692_v39, %v691_v5  ;;  %v826_v26 = vrot.slane %v825_v33, 2  ;;  %v3859_v5 = vld [vmem:[#allocation4_spill] sm:$0xff]  ;;  %v3861_v39 = vld [vmem:[#allocation3_spill] sm:$0xff] }
 0x17f   :  { %v694_v9 = vrot.slane %v693_v55, 1  ;;  %v827_v30 = vadd.f32 %v826_v26, %v825_v33  ;;  %v3862_v33 = vld [vmem:[#allocation5_spill] sm:$0xff] }
 0x181   :  { %v695_v11 = vadd.f32 %v694_v9, %v693_v55  ;;  %v828_v37 = vrot.slane %v827_v30, 1 }
 0x183   :  { %v696_v18 = vmul.f32 0.001953125, %v695_v11  ;;  %v829_v4 = vadd.f32 %v828_v37, %v827_v30  ;;  %v2508_v30 = vld [vmem:[%s3777_s3] sm:$0x1] }
 0x185   :  { %v830_v27 = vmul.f32 0.001953125, %v829_v4  ;;  %v831_v54 = vmul.f32 %v696_v18, %v696_v18 }
 0x187   :  { %v832_v61 = vsub.f32 %v830_v27, %v831_v54  ;;  %v3864_v27 = vld [vmem:[#allocation12_spill] sm:$0xff] }
 0x189   :  { %v833_v38 = vmax.f32 %v832_v61, 0.0  ;;  %v3871_v61 = vld [vmem:[#allocation22_spill] sm:$0xff] }
 0x18b   :  { %v835_v10 = vadd.f32 1e-05, %v833_v38 }
 0x18d   :  { %2032 = vrsqrt.f32 %v835_v10 }
 0x197   :  { %v2033_v26 = vpop.eup %2032 }
 0x198   :  { %v837_v9 = vmul.f32 %v2033_v26, %v834_v48  ;;  %v3866_v26 = vld [vmem:[#allocation10_spill] sm:$0xff] }
 0x19a   :  { %v2510_v37 = vmul.f32 %v837_v9, %v696_v18  ;;  %v2514_v38 = vrot.slane %v837_v9, %v3803_v7  ;;  %v3863_v18 = vld [vmem:[#allocation9_spill] sm:$0xff]  ;;  %v3872_v7 = vld [vmem:[#allocation24_spill] sm:$0xff] }
 0x19c   :  { %v2520_v11 = vmul.f32 %v2514_v38, %v2183_v42  ;;  %v2524_v54 = vmul.f32 %v2514_v38, %v2191_v46  ;;  %v2528_v55 = vmul.f32 %v2179_v40, %v2514_v38  ;;  %v2532_v29 = vmul.f32 %v2187_v44, %v2514_v38 }
 0x19d   :  { %v2536_v31 = vmul.f32 %v2514_v38, %v2211_v59  ;;  %v2540_v42 = vmul.f32 %v2514_v38, %v2222_v2  ;;  %v2544_v46 = vmul.f32 %v2206_v56, %v2514_v38  ;;  %v2548_v40 = vmul.f32 %v2218_v0, %v2514_v38 }
 0x19e   :  { %v2552_v44 = vmul.f32 %v2514_v38, %v2239_v15  ;;  %v2556_v59 = vmul.f32 %v2514_v38, %v2250_v22  ;;  %v2560_v2 = vmul.f32 %v2234_v12, %v2514_v38  ;;  %v2564_v56 = vmul.f32 %v2246_v20, %v2514_v38 }
 0x19f   :  { %v2568_v0 = vmul.f32 %v2514_v38, %v2267_v35  ;;  %v2572_v15 = vmul.f32 %v2514_v38, %v2278_v50  ;;  %v2576_v22 = vmul.f32 %v2262_v32, %v2514_v38  ;;  %v2580_v12 = vmul.f32 %v3858_v13, %v2514_v38  ;;  %v3867_v13 = vld [vmem:[#allocation15_spill] sm:$0xff] }
 0x1a0   :  { %v2584_v20 = vmul.f32 %v2514_v38, %v3859_v5  ;;  %v2588_v35 = vmul.f32 %v2514_v38, %v3860_v53  ;;  %v2592_v50 = vmul.f32 %v3861_v39, %v2514_v38  ;;  %v2596_v32 = vmul.f32 %v3862_v33, %v2514_v38  ;;  %v3868_v53 = vld [vmem:[#allocation19_spill] sm:$0xff]  ;;  %v3869_v33 = vld [vmem:[#allocation13_spill] sm:$0xff] }
 0x1a1   :  { %v2600_v4 = vmul.f32 %v2514_v38, %v3863_v18  ;;  %v2604_v10 = vmul.f32 %v2514_v38, %v3864_v27  ;;  %v2608_v48 = vmul.f32 %v3865_v25, %v2514_v38  ;;  %v2612_v9 = vmul.f32 %v3866_v26, %v2514_v38  ;;  %v3870_v27 = vld [vmem:[#allocation17_spill] sm:$0xff] }
 0x1a2   :  { %v2616_v5 = vmul.f32 %v2514_v38, %v3867_v13  ;;  %v2620_v39 = vmul.f32 %v2514_v38, %v3868_v53  ;;  %v2624_v18 = vmul.f32 %v3869_v33, %v2514_v38  ;;  %v2628_v25 = vmul.f32 %v3870_v27, %v2514_v38 }
 0x1a3   :  { %v2632_v26 = vmul.f32 %v2514_v38, %v3871_v61  ;;  %v2636_v13 = vmul.f32 %v2514_v38, %v3872_v7  ;;  %v2640_v53 = vmul.f32 %v2374_v62, %v2514_v38  ;;  %v2644_v33 = vmul.f32 %v2386_v24, %v2514_v38 }
 0x1a4   :  { %v2648_v27 = vmul.f32 %v2514_v38, %v2185_v43  ;;  %v2652_v61 = vmul.f32 %v2514_v38, %v2193_v47  ;;  %v2656_v7 = vmul.f32 %v2181_v41, %v2514_v38  ;;  %v2660_v62 = vmul.f32 %v2189_v45, %v2514_v38 }
 0x1a5   :  { %v2664_v24 = vmul.f32 %v2514_v38, %v2213_v60  ;;  %v2668_v43 = vmul.f32 %v2514_v38, %v2224_v3  ;;  %v2672_v47 = vmul.f32 %v2209_v58, %v2514_v38  ;;  %v2676_v41 = vmul.f32 %v2220_v1, %v2514_v38 }
 0x1a6   :  { %v2680_v45 = vmul.f32 %v2514_v38, %v2241_v16  ;;  %v2684_v60 = vmul.f32 %v2514_v38, %v2252_v23  ;;  %v2688_v3 = vmul.f32 %v2237_v14, %v2514_v38  ;;  %v2692_v58 = vmul.f32 %v2248_v21, %v2514_v38 }
 0x1a7   :  { %v2696_v1 = vmul.f32 %v2514_v38, %v2269_v36  ;;  %v2700_v16 = vmul.f32 %v2514_v38, %v2280_v51  ;;  %v2704_v23 = vmul.f32 %v2265_v34, %v2514_v38  ;;  %v2708_v14 = vmul.f32 %v2276_v49, %v2514_v38 }
 0x1a8   :  { %v2712_v21 = vmul.f32 %v2514_v38, %v2297_v8  ;;  %v2716_v36 = vmul.f32 %v2514_v38, %v2308_v19  ;;  %v2720_v51 = vmul.f32 %v2293_v6, %v2514_v38  ;;  %v2724_v34 = vmul.f32 %v2304_v17, %v2514_v38 }
 0x1a9   :  { %v2728_v49 = vmul.f32 %v2514_v38, %v2325_v52  ;;  %v2732_v8 = vmul.f32 %v2514_v38, %v2336_v63 }
 0x1aa   :  { %3873 = vst [vmem:[#allocation2_spill] sm:$0xff] %v2712_v21  ;;  %3874 = vst [vmem:[#allocation4_spill] sm:$0xff] %v2716_v36  ;;  %v3879_v21 = vld [vmem:[#allocation8_spill] sm:$0xff]  ;;  %v3881_v36 = vld [vmem:[#allocation11_spill] sm:$0xff] }
 0x1ab   :  { %3875 = vst [vmem:[#allocation6_spill] sm:$0xff] %v2720_v51  ;;  %3876 = vst [vmem:[#allocation3_spill] sm:$0xff] %v2724_v34  ;;  %v2736_v19 = vmul.f32 %v3879_v21, %v2514_v38  ;;  %v2740_v6 = vmul.f32 %v3881_v36, %v2514_v38  ;;  %v3883_v51 = vld [vmem:[#allocation16_spill] sm:$0xff] }
 0x1ac   :  { %3877 = vst [vmem:[#allocation5_spill] sm:$0xff] %v2728_v49  ;;  %3878 = vst [vmem:[#allocation9_spill] sm:$0xff] %v2732_v8  ;;  %v2744_v17 = vmul.f32 %v2514_v38, %v3883_v51  ;;  %v3885_v34 = vld [vmem:[#allocation20_spill] sm:$0xff]  ;;  %v3886_v49 = vld [vmem:[#allocation14_spill] sm:$0xff] }
 0x1ad   :  { %3880 = vst [vmem:[#allocation12_spill] sm:$0xff] %v2736_v19  ;;  %3882 = vst [vmem:[#allocation7_spill] sm:$0xff] %v2740_v6  ;;  %v2748_v52 = vmul.f32 %v2514_v38, %v3885_v34  ;;  %v2752_v63 = vmul.f32 %v3886_v49, %v2514_v38  ;;  %v3888_v8 = vld [vmem:[#allocation18_spill] sm:$0xff]  ;;  %v3890_v19 = vld [vmem:[#allocation23_spill] sm:$0xff]  ;;  %v2772_v49 = vmul.f32 %v2388_v28, %v2514_v38 }
 0x1ae   :  { %3884 = vst [vmem:[#allocation10_spill] sm:$0xff] %v2744_v17  ;;  %v2756_v21 = vmul.f32 %v3888_v8, %v2514_v38  ;;  %v2760_v36 = vmul.f32 %v2514_v38, %v3890_v19  ;;  %v3891_v6 = vld [vmem:[#allocation25_spill] sm:$0xff]  ;;  %v3894_v8 = vsub.f32 %v2508_v30, %v2510_v37 }
 0x1af   :  { %3887 = vst [vmem:[#allocation15_spill] sm:$0xff] %v2752_v63  ;;  %v2764_v51 = vmul.f32 %v2514_v38, %v3891_v6  ;;  %v3892_v17 = vld [vmem:[#allocation21_spill] sm:$0xff]  ;;  %v3893_v63 = vsub.s32 0, %v2499_v57 }
 0x1b0   :  { %3889 = vst [vmem:[#allocation19_spill] sm:$0xff] %v2756_v21  ;;  %v2768_v34 = vmul.f32 %v3892_v17, %v2514_v38 }
 0x1b1   :  { %v2779_v21 = vrot.slane %v3894_v8, %v3893_v63 }
 0x1b2   :  { %v3902_v63 = vld [vmem:[#allocation3_spill] sm:$0xff] }
 0x1b3   :  { %v2783_v19 = vadd.f32 %v2779_v21, %v2520_v11  ;;  %v2787_v6 = vadd.f32 %v2779_v21, %v2524_v54  ;;  %v2791_v17 = vadd.f32 %v2779_v21, %v2528_v55  ;;  %v2795_v28 = vadd.f32 %v2779_v21, %v2532_v29  ;;  %v3904_v8 = vld [vmem:[#allocation5_spill] sm:$0xff] }
 0x1b4   :  { %v2799_v57 = vadd.f32 %v2779_v21, %v2536_v31  ;;  %v2803_v30 = vadd.f32 %v2779_v21, %v2540_v42  ;;  %v2807_v37 = vadd.f32 %v2779_v21, %v2544_v46  ;;  %v2811_v38 = vadd.f32 %v2779_v21, %v2548_v40 }
 0x1b5   :  { %v2815_v11 = vadd.f32 %v2779_v21, %v2552_v44  ;;  %v2819_v54 = vadd.f32 %v2779_v21, %v2556_v59  ;;  %v2823_v55 = vadd.f32 %v2779_v21, %v2560_v2  ;;  %v2827_v29 = vadd.f32 %v2779_v21, %v2564_v56 }
 0x1b6   :  { %v2831_v31 = vadd.f32 %v2779_v21, %v2568_v0  ;;  %v2835_v42 = vadd.f32 %v2779_v21, %v2572_v15  ;;  %v2839_v46 = vadd.f32 %v2779_v21, %v2576_v22  ;;  %v2843_v40 = vadd.f32 %v2779_v21, %v2580_v12 }
 0x1b7   :  { %v2847_v44 = vadd.f32 %v2779_v21, %v2584_v20  ;;  %v2851_v59 = vadd.f32 %v2779_v21, %v2588_v35  ;;  %v2855_v2 = vadd.f32 %v2779_v21, %v2592_v50  ;;  %v2859_v56 = vadd.f32 %v2779_v21, %v2596_v32 }
 0x1b8   :  { %v2863_v0 = vadd.f32 %v2779_v21, %v2600_v4  ;;  %v2867_v15 = vadd.f32 %v2779_v21, %v2604_v10  ;;  %v2871_v22 = vadd.f32 %v2779_v21, %v2608_v48  ;;  %v2875_v12 = vadd.f32 %v2779_v21, %v2612_v9 }
 0x1b9   :  { %v2879_v20 = vadd.f32 %v2779_v21, %v2616_v5  ;;  %v2883_v35 = vadd.f32 %v2779_v21, %v2620_v39  ;;  %v2887_v50 = vadd.f32 %v2779_v21, %v2624_v18  ;;  %v2891_v32 = vadd.f32 %v2779_v21, %v2628_v25 }
 0x1ba   :  { %v2895_v4 = vadd.f32 %v2779_v21, %v2632_v26  ;;  %v2899_v10 = vadd.f32 %v2779_v21, %v2636_v13  ;;  %v2903_v48 = vadd.f32 %v2779_v21, %v2640_v53  ;;  %v2907_v9 = vadd.f32 %v2779_v21, %v2644_v33 }
 0x1bb   :  { %v2911_v5 = vadd.f32 %v2779_v21, %v2648_v27  ;;  %v2915_v39 = vadd.f32 %v2779_v21, %v2652_v61  ;;  %v2919_v18 = vadd.f32 %v2779_v21, %v2656_v7  ;;  %v2923_v25 = vadd.f32 %v2779_v21, %v2660_v62 }
 0x1bc   :  { %v2927_v26 = vadd.f32 %v2779_v21, %v2664_v24  ;;  %v2931_v13 = vadd.f32 %v2779_v21, %v2668_v43  ;;  %v2935_v53 = vadd.f32 %v2779_v21, %v2672_v47  ;;  %v2939_v33 = vadd.f32 %v2779_v21, %v2676_v41 }
 0x1bd   :  { %v2943_v27 = vadd.f32 %v2779_v21, %v2680_v45  ;;  %v2947_v61 = vadd.f32 %v2779_v21, %v2684_v60  ;;  %v2951_v7 = vadd.f32 %v2779_v21, %v2688_v3  ;;  %v2955_v62 = vadd.f32 %v2779_v21, %v2692_v58  ;;  %v3896_v45 = vld [vmem:[#allocation2_spill] sm:$0xff]  ;;  %v3898_v3 = vld [vmem:[#allocation4_spill] sm:$0xff] }
 0x1be   :  { %v2959_v24 = vadd.f32 %v2779_v21, %v2696_v1  ;;  %v2963_v43 = vadd.f32 %v2779_v21, %v2700_v16  ;;  %v2967_v47 = vadd.f32 %v2779_v21, %v2704_v23  ;;  %v2971_v41 = vadd.f32 %v2779_v21, %v2708_v14  ;;  %v3900_v1 = vld [vmem:[#allocation6_spill] sm:$0xff] }
 0x1bf   :  { %v2975_v60 = vadd.f32 %v2779_v21, %v3896_v45  ;;  %v2979_v58 = vadd.f32 %v2779_v21, %v3898_v3  ;;  %v2983_v16 = vadd.f32 %v2779_v21, %v3900_v1  ;;  %v2987_v23 = vadd.f32 %v2779_v21, %v3902_v63 }
 0x1c0   :  { %3895 = vst [vmem:[#allocation13_spill] sm:$0xff] %v2971_v41  ;;  %v2991_v14 = vadd.f32 %v2779_v21, %v3904_v8  ;;  %v3906_v41 = vld [vmem:[#allocation9_spill] sm:$0xff]  ;;  %v3011_v8 = vadd.f32 %v2779_v21, %v2748_v52  ;;  %v3031_v52 = vadd.f32 %v2779_v21, %v2768_v34  ;;  %vm981_vm0 = vcmp.ge.f32.partialorder %v2783_v19, 0.0 }
 0x1c1   :  { %3897 = vst [vmem:[#allocation17_spill] sm:$0xff] %v2975_v60  ;;  %3899 = vst [vmem:[#allocation22_spill] sm:$0xff] %v2979_v58  ;;  %v2995_v45 = vadd.f32 %v2779_v21, %v3906_v41  ;;  %v3908_v60 = vld [vmem:[#allocation12_spill] sm:$0xff]  ;;  %v3910_v58 = vld [vmem:[#allocation7_spill] sm:$0xff]  ;;  %vm982_vm1 = vcmp.ge.f32.partialorder %v2787_v6, 0.0  ;;  %vm983_vm2 = vcmp.ge.f32.partialorder %v2791_v17, 0.0 }
 0x1c2   :  { %3901 = vst [vmem:[#allocation24_spill] sm:$0xff] %v2983_v16  ;;  %3903 = vst [vmem:[#allocation8_spill] sm:$0xff] %v2987_v23  ;;  %v2999_v3 = vadd.f32 %v2779_v21, %v3908_v60  ;;  %v3003_v1 = vadd.f32 %v2779_v21, %v3910_v58  ;;  %v3912_v16 = vld [vmem:[#allocation10_spill] sm:$0xff]  ;;  %v3023_v58 = vadd.f32 %v2779_v21, %v2760_v36  ;;  %vm984_vm3 = vcmp.ge.f32.partialorder %v2795_v28, 0.0 }
 0x1c3   :  { %3905 = vst [vmem:[#allocation11_spill] sm:$0xff] %v2991_v14  ;;  %3907 = vst [vmem:[#allocation16_spill] sm:$0xff] %v2995_v45  ;;  %v3007_v63 = vadd.f32 %v2779_v21, %v3912_v16  ;;  %v3915_v14 = vld [vmem:[#allocation15_spill] sm:$0xff]  ;;  %v3027_v16 = vadd.f32 %v2779_v21, %v2764_v51  ;;  %vm985_vm4 = vcmp.ge.f32.partialorder %v2799_v57, 0.0  ;;  %vm986_vm5 = vcmp.ge.f32.partialorder %v2803_v30, 0.0 }
 0x1c4   :  { %3909 = vst [vmem:[#allocation20_spill] sm:$0xff] %v2999_v3  ;;  %3911 = vst [vmem:[#allocation14_spill] sm:$0xff] %v3003_v1  ;;  %v3015_v41 = vadd.f32 %v2779_v21, %v3915_v14  ;;  %v3917_v45 = vld [vmem:[#allocation19_spill] sm:$0xff]  ;;  %v3035_v14 = vadd.f32 %v2779_v21, %v2772_v49  ;;  %vm987_vm6 = vcmp.ge.f32.partialorder %v2807_v37, 0.0  ;;  %vm988_vm7 = vcmp.ge.f32.partialorder %v2811_v38, 0.0 }
 0x1c5   :  { %3913 = vst [vmem:[#allocation18_spill] sm:$0xff] %v3007_v63  ;;  %3914 = vst [vmem:[#allocation23_spill] sm:$0xff] %v3011_v8  ;;  %v3019_v60 = vadd.f32 %v2779_v21, %v3917_v45  ;;  %vm989_vm8 = vcmp.ge.f32.partialorder %v2815_v11, 0.0  ;;  %vm990_vm9 = vcmp.ge.f32.partialorder %v2819_v54, 0.0  ;;  %v1045_v21 = vmul.f32 0.2, %v2783_v19 }
 0x1c6   :  { %3916 = vst [vmem:[#allocation25_spill] sm:$0xff] %v3015_v41  ;;  %3919 = vst [vmem:[#allocation2_spill] sm:$0xff] %v3023_v58  ;;  %v1046_v36 = vmul.f32 0.2, %v2787_v6  ;;  %v1047_v51 = vmul.f32 0.2, %v2791_v17 }
 0x1c7   :  { %3918 = vst [vmem:[#allocation21_spill] sm:$0xff] %v3019_v60  ;;  %3920 = vst [vmem:[#allocation4_spill] sm:$0xff] %v3027_v16  ;;  %vm991_vm10 = vcmp.ge.f32.partialorder %v2823_v55, 0.0  ;;  %v1048_v34 = vmul.f32 0.2, %v2795_v28  ;;  %vm992_vm11 = vcmp.ge.f32.partialorder %v2827_v29, 0.0  ;;  %v3061_v58 = vsel %vm981_vm0, %v2783_v19, %v1045_v21 }
 0x1c8   :  { %3921 = vst [vmem:[#allocation6_spill] sm:$0xff] %v3031_v52  ;;  %3922 = vst [vmem:[#allocation3_spill] sm:$0xff] %v3035_v14  ;;  %v1049_v49 = vmul.f32 0.2, %v2799_v57  ;;  %v1050_v45 = vmul.f32 0.2, %v2803_v30  ;;  %v3072_v63 = vsel %vm982_vm1, %v2787_v6, %v1046_v36 }
 0x1c9   :  { %v1051_v14 = vmul.f32 0.2, %v2807_v37  ;;  %v1052_v52 = vmul.f32 0.2, %v2811_v38  ;;  %v1053_v16 = vmul.f32 0.2, %v2815_v11  ;;  %v3102_v3 = vsel %vm984_vm3, %v2795_v28, %v1048_v34 }
 0x1ca   :  { %3923 = vst [vmem:[#allocation5_spill] sm:$0xff] %v3061_v58  ;;  %vm993_vm12 = vcmp.ge.f32.partialorder %v2831_v31, 0.0  ;;  %v1054_v60 = vmul.f32 0.2, %v2819_v54  ;;  %v1055_v41 = vmul.f32 0.2, %v2823_v55  ;;  %v3087_v58 = vsel %vm983_vm2, %v2791_v17, %v1047_v51 }
 0x1cb   :  { %v3067_v8 = vmul.f32 0.2, %v2827_v29  ;;  %3924 = vst [vmem:[#allocation9_spill] sm:$0xff] %v3072_v63  ;;  %vm994_vm13 = vcmp.ge.f32.partialorder %v2835_v42, 0.0  ;;  %v3076_v1 = vmul.f32 0.2, %v2831_v31 }
 0x1cc   :  { %v3079_v19 = vmul.f32 0.2, %v2835_v42  ;;  %v3082_v21 = vmul.f32 0.2, %v2839_v46  ;;  %3925 = vst [vmem:[#allocation12_spill] sm:$0xff] %v3087_v58  ;;  %vm995_vm14 = vcmp.ge.f32.partialorder %v2839_v46, 0.0 }
 0x1cd   :  { %v3091_v6 = vmul.f32 0.2, %v2843_v40  ;;  %v3094_v36 = vmul.f32 0.2, %v2847_v44  ;;  %v3097_v63 = vmul.f32 0.2, %v2851_v59 }
 0x1ce   :  { %3927 = vst [vmem:[#allocation10_spill] sm:$0xff] %v3102_v3  ;;  %vm996_vm15 = vcmp.ge.f32.partialorder %v2843_v40, 0.0  ;;  %v3106_v17 = vmul.f32 0.2, %v2855_v2  ;;  %v3109_v51 = vmul.f32 0.2, %v2859_v56 }
 0x1cf   :  { %3926 = vst [vmem:[#allocation7_spill] sm:$0xff] %v3097_v63  ;;  %v3112_v58 = vmul.f32 0.2, %v2863_v0  ;;  %v3117_v63 = vsel %vm985_vm4, %v2799_v57, %v1049_v49  ;;  %vm997_vm0 = vcmp.ge.f32.partialorder %v2847_v44, 0.0  ;;  %v3121_v28 = vmul.f32 0.2, %v2867_v15 }
 0x1d0   :  { %3929 = vst [vmem:[#allocation19_spill] sm:$0xff] %v3117_v63  ;;  %v3124_v34 = vmul.f32 0.2, %v2871_v22  ;;  %v3127_v3 = vmul.f32 0.2, %v2875_v12  ;;  %vm998_vm1 = vcmp.ge.f32.partialorder %v2851_v59, 0.0 }
 0x1d1   :  { %3928 = vst [vmem:[#allocation15_spill] sm:$0xff] %v3112_v58  ;;  %v3132_v58 = vsel %vm986_vm5, %v2803_v30, %v1050_v45  ;;  %v3136_v57 = vmul.f32 0.2, %v2879_v20  ;;  %v3139_v49 = vmul.f32 0.2, %v2883_v35  ;;  %vm999_vm2 = vcmp.ge.f32.partialorder %v2855_v2, 0.0 }
 0x1d2   :  { %3930 = vst [vmem:[#allocation26_spill] sm:$0xff] %v3127_v3  ;;  %3931 = vst [vmem:[#allocation27_spill] sm:$0xff] %v3132_v58  ;;  %v3142_v63 = vmul.f32 0.2, %v2887_v50  ;;  %v3147_v3 = vsel %vm987_vm6, %v2807_v37, %v1051_v14  ;;  %v3151_v30 = vmul.f32 0.2, %v2891_v32 }
 0x1d3   :  { %3933 = vst [vmem:[#allocation29_spill] sm:$0xff] %v3147_v3  ;;  %v3154_v45 = vmul.f32 0.2, %v2895_v4  ;;  %v3157_v58 = vmul.f32 0.2, %v2899_v10  ;;  %vm1000_vm3 = vcmp.ge.f32.partialorder %v2859_v56, 0.0 }
 0x1d4   :  { %3932 = vst [vmem:[#allocation28_spill] sm:$0xff] %v3142_v63  ;;  %v3162_v63 = vsel %vm988_vm7, %v2811_v38, %v1052_v52  ;;  %v3168_v37 = vmul.f32 0.2, %v2903_v48  ;;  %v3171_v14 = vmul.f32 0.2, %v2907_v9  ;;  %v3179_v38 = vsel %vm989_vm8, %v2815_v11, %v1053_v16 }
 0x1d5   :  { %3934 = vst [vmem:[#allocation30_spill] sm:$0xff] %v3162_v63  ;;  %v3174_v3 = vmul.f32 0.2, %v2911_v5  ;;  %3936 = vst [vmem:[#allocation32_spill] sm:$0xff] %v3179_v38  ;;  %vm1003_vm6 = vcmp.ge.f32.partialorder %v2871_v22, 0.0  ;;  %v3197_v11 = vsel %vm990_vm9, %v2819_v54, %v1054_v60  ;;  %vm1007_vm8 = vcmp.ge.f32.partialorder %v2887_v50, 0.0 }
 0x1d6   :  { %v3186_v52 = vmul.f32 0.2, %v2915_v39  ;;  %v3189_v63 = vmul.f32 0.2, %v2919_v18  ;;  %3938 = vst [vmem:[#allocation34_spill] sm:$0xff] %v3197_v11  ;;  %v3215_v54 = vsel %vm991_vm10, %v2823_v55, %v1055_v41  ;;  %vm1011_vm9 = vcmp.ge.f32.partialorder %v2903_v48, 0.0 }
 0x1d7   :  { %3935 = vst [vmem:[#allocation31_spill] sm:$0xff] %v3174_v3  ;;  %v3192_v3 = vmul.f32 0.2, %v2923_v25  ;;  %v3204_v16 = vmul.f32 0.2, %v2927_v26  ;;  %3940 = vst [vmem:[#allocation36_spill] sm:$0xff] %v3215_v54  ;;  %v3234_v55 = vsel %vm992_vm11, %v2827_v29, %v3067_v8  ;;  %v3253_v29 = vsel %vm993_vm12, %v2831_v31, %v3076_v1 }
 0x1d8   :  { %v3207_v38 = vmul.f32 0.2, %v2931_v13  ;;  %v3222_v60 = vmul.f32 0.2, %v2939_v33  ;;  %v3225_v11 = vmul.f32 0.2, %v2943_v27  ;;  %v3272_v31 = vsel %vm994_vm13, %v2835_v42, %v3079_v19 }
 0x1d9   :  { %3937 = vst [vmem:[#allocation33_spill] sm:$0xff] %v3192_v3  ;;  %v3210_v3 = vmul.f32 0.2, %v2935_v53  ;;  %3942 = vst [vmem:[#allocation38_spill] sm:$0xff] %v3234_v55  ;;  %vm1015_vm10 = vcmp.ge.f32.partialorder %v2919_v18, 0.0  ;;  %vm1019_vm11 = vcmp.ge.f32.partialorder %v2935_v53, 0.0  ;;  %v3291_v42 = vsel %vm995_vm14, %v2839_v46, %v3082_v21 }
 0x1da   :  { %v3241_v41 = vmul.f32 0.2, %v2951_v7  ;;  %v3244_v54 = vmul.f32 0.2, %v2955_v62  ;;  %3946 = vst [vmem:[#allocation42_spill] sm:$0xff] %v3253_v29  ;;  %3951 = vst [vmem:[#allocation45_spill] sm:$0xff] %v3272_v31  ;;  %v3310_v46 = vsel %vm996_vm15, %v2843_v40, %v3091_v6  ;;  %v3323_v40 = vsel %vm997_vm0, %v2847_v44, %v3094_v36 }
 0x1db   :  { %3939 = vst [vmem:[#allocation35_spill] sm:$0xff] %v3210_v3  ;;  %v3228_v3 = vmul.f32 0.2, %v2947_v61  ;;  %v3260_v8 = vmul.f32 0.2, %v2963_v43  ;;  %vm1023_vm12 = vcmp.ge.f32.partialorder %v2951_v7, 0.0 }
 0x1dc   :  { %3943 = vst [vmem:[#allocation39_spill] sm:$0xff] %v3241_v41  ;;  %3944 = vst [vmem:[#allocation40_spill] sm:$0xff] %v3244_v54  ;;  %v3263_v55 = vmul.f32 0.2, %v2967_v47  ;;  %v3952_v1 = vld [vmem:[#allocation17_spill] sm:$0xff]  ;;  %vm1027_vm13 = vcmp.ge.f32.partialorder %v2967_v47, 0.0 }
 0x1dd   :  { %3941 = vst [vmem:[#allocation37_spill] sm:$0xff] %v3228_v3  ;;  %v3247_v3 = vmul.f32 0.2, %v2959_v24  ;;  %3947 = vst [vmem:[#allocation43_spill] sm:$0xff] %v3260_v8  ;;  %v3279_v29 = vmul.f32 0.2, %v3952_v1 }
 0x1de   :  { %3948 = vst [vmem:[#allocation44_spill] sm:$0xff] %v3263_v55  ;;  %v3954_v55 = vld [vmem:[#allocation22_spill] sm:$0xff]  ;;  %3958 = vst [vmem:[#allocation49_spill] sm:$0xff] %v3291_v42  ;;  %v3298_v19 = vmul.f32 0.2, %v2987_v23  ;;  %v3960_v31 = vld [vmem:[#allocation11_spill] sm:$0xff] }
 0x1df   :  { %3945 = vst [vmem:[#allocation41_spill] sm:$0xff] %v3247_v3  ;;  %v3949_v3 = vld [vmem:[#allocation13_spill] sm:$0xff]  ;;  %3953 = vst [vmem:[#allocation46_spill] sm:$0xff] %v3279_v29  ;;  %v3282_v8 = vmul.f32 0.2, %v3954_v55  ;;  %v3965_v21 = vld [vmem:[#allocation20_spill] sm:$0xff] }
 0x1e0   :  { %v3266_v54 = vmul.f32 0.2, %v3949_v3  ;;  %3959 = vst [vmem:[#allocation50_spill] sm:$0xff] %v3298_v19  ;;  %3964 = vst [vmem:[#allocation53_spill] sm:$0xff] %v3310_v46  ;;  %v1099_v42 = vmul.f32 0.2, %v3965_v21 }
 0x1e1   :  { %3955 = vst [vmem:[#allocation47_spill] sm:$0xff] %v3282_v8  ;;  %v3301_v8 = vmul.f32 0.2, %v3960_v31  ;;  %v3967_v55 = vld [vmem:[#allocation18_spill] sm:$0xff]  ;;  %3968 = vst [vmem:[#allocation54_spill] sm:$0xff] %v3323_v40  ;;  %vm1035_vm15 = vcmp.ge.f32.partialorder %v3965_v21, 0.0 }
 0x1e2   :  { %3950 = vst [vmem:[#allocation13_spill] sm:$0xff] %v3266_v54  ;;  %v3956_v54 = vld [vmem:[#allocation24_spill] sm:$0xff]  ;;  %v3969_v6 = vld [vmem:[#allocation23_spill] sm:$0xff]  ;;  %v3971_v23 = vld [vmem:[#allocation21_spill] sm:$0xff]  ;;  %vm3979_vm7 = vcmp.ge.f32.partialorder %v2863_v0, 0.0 }
 0x1e3   :  { %v3285_v41 = vmul.f32 0.2, %v3956_v54  ;;  %3961 = vst [vmem:[#allocation51_spill] sm:$0xff] %v3301_v8  ;;  %vm1031_vm14 = vcmp.ge.f32.partialorder %v3956_v54, 0.0  ;;  %v3966_v8 = vld [vmem:[#allocation14_spill] sm:$0xff]  ;;  %v3972_v1 = vld [vmem:[#allocation7_spill] sm:$0xff] }
 0x1e4   :  { %v1100_v19 = vmul.f32 0.2, %v3966_v8  ;;  %v1102_v46 = vmul.f32 0.2, %v3969_v6  ;;  %v1104_v54 = vmul.f32 0.2, %v3971_v23  ;;  %v3336_v44 = vsel %vm998_vm1, %v2851_v59, %v3972_v1 }
 0x1e5   :  { %3957 = vst [vmem:[#allocation48_spill] sm:$0xff] %v3285_v41  ;;  %v3962_v41 = vld [vmem:[#allocation16_spill] sm:$0xff]  ;;  %v3974_v36 = vld [vmem:[#allocation2_spill] sm:$0xff]  ;;  %v3349_v59 = vsel %vm999_vm2, %v2855_v2, %v3106_v17  ;;  %v3977_v1 = vld [vmem:[#allocation3_spill] sm:$0xff]  ;;  %vm3980_vm2 = vcmp.ge.f32.partialorder %v2867_v15, 0.0  ;;  %v3376_v17 = vsel %vm1003_vm6, %v2871_v22, %v3124_v34  ;;  %vm3986_vm6 = vcmp.ge.f32.partialorder %v2891_v32, 0.0 }
 0x1e6   :  { %v3304_v29 = vmul.f32 0.2, %v3962_v41  ;;  %v3970_v41 = vld [vmem:[#allocation25_spill] sm:$0xff]  ;;  %vm1041_vm4 = vcmp.ge.f32.partialorder %v3974_v36, 0.0  ;;  %v3975_v40 = vld [vmem:[#allocation4_spill] sm:$0xff]  ;;  %v3976_v8 = vld [vmem:[#allocation6_spill] sm:$0xff]  ;;  %v3370_v2 = vsel %vm3980_vm2, %v2867_v15, %v3121_v28 }
 0x1e7   :  { %v1103_v31 = vmul.f32 0.2, %v3970_v41  ;;  %3973 = vst [vmem:[#allocation25_spill] sm:$0xff] %v3336_v44  ;;  %vm1039_vm0 = vcmp.ge.f32.partialorder %v3970_v41, 0.0  ;;  %v1105_v6 = vmul.f32 0.2, %v3974_v36  ;;  %v3358_v36 = vsel %vm1000_vm3, %v2859_v56, %v3109_v51 }
 0x1e8   :  { %3963 = vst [vmem:[#allocation52_spill] sm:$0xff] %v3304_v29  ;;  %v1101_v29 = vmul.f32 0.2, %v3967_v55  ;;  %v1106_v55 = vmul.f32 0.2, %v3975_v40  ;;  %vm1043_vm1 = vcmp.ge.f32.partialorder %v3976_v8, 0.0 }
 0x1e9   :  { %v1107_v21 = vmul.f32 0.2, %v3976_v8  ;;  %vm1044_vm5 = vcmp.ge.f32.partialorder %v3977_v1, 0.0  ;;  %v1108_v44 = vmul.f32 0.2, %v3977_v1  ;;  %v3978_v40 = vld [vmem:[#allocation15_spill] sm:$0xff] }
 0x1ea   :  { %v3364_v23 = vsel %vm3979_vm7, %v2863_v0, %v3978_v40  ;;  %v3981_v56 = vld [vmem:[#allocation26_spill] sm:$0xff]  ;;  %vm3982_vm3 = vcmp.ge.f32.partialorder %v2875_v12, 0.0  ;;  %vm3983_vm7 = vcmp.ge.f32.partialorder %v2879_v20, 0.0  ;;  %vm3984_vm2 = vcmp.ge.f32.partialorder %v2883_v35, 0.0  ;;  %v3985_v22 = vld [vmem:[#allocation28_spill] sm:$0xff] }
 0x1eb   :  { %v3382_v51 = vsel %vm3982_vm3, %v2875_v12, %v3981_v56  ;;  %v3388_v0 = vsel %vm3983_vm7, %v2879_v20, %v3136_v57  ;;  %v3394_v15 = vsel %vm3984_vm2, %v2883_v35, %v3139_v49  ;;  %v3400_v28 = vsel %vm1007_vm8, %v2887_v50, %v3985_v22  ;;  %v4019_v40 = vld [vmem:[#allocation24_spill] sm:$0xff] }
 0x1ec   :  { %v3406_v12 = vsel %vm3986_vm6, %v2891_v32, %v3151_v30  ;;  %vm3987_vm3 = vcmp.ge.f32.partialorder %v2895_v4, 0.0  ;;  %vm3988_vm7 = vcmp.ge.f32.partialorder %v2899_v10, 0.0  ;;  %v3424_v50 = vsel %vm1011_vm9, %v2903_v48, %v3168_v37  ;;  %v4021_v22 = vld [vmem:[#allocation8_spill] sm:$0xff] }
 0x1ed   :  { %v3412_v20 = vsel %vm3987_vm3, %v2895_v4, %v3154_v45  ;;  %v3418_v35 = vsel %vm3988_vm7, %v2899_v10, %v3157_v58  ;;  %vm3989_vm8 = vcmp.ge.f32.partialorder %v2907_v9, 0.0  ;;  %v3990_v4 = vld [vmem:[#allocation31_spill] sm:$0xff]  ;;  %vm3991_vm2 = vcmp.ge.f32.partialorder %v2911_v5, 0.0 }
 0x1ee   :  { %v3430_v32 = vsel %vm3989_vm8, %v2907_v9, %v3171_v14  ;;  %v3436_v34 = vsel %vm3991_vm2, %v2911_v5, %v3990_v4  ;;  %vm3992_vm6 = vcmp.ge.f32.partialorder %v2915_v39, 0.0  ;;  %v3448_v48 = vsel %vm1015_vm10, %v2919_v18, %v3189_v63  ;;  %v3993_v9 = vld [vmem:[#allocation33_spill] sm:$0xff]  ;;  %v3997_v18 = vld [vmem:[#allocation35_spill] sm:$0xff] }
 0x1ef   :  { %v3442_v10 = vsel %vm3992_vm6, %v2915_v39, %v3186_v52  ;;  %vm3994_vm9 = vcmp.ge.f32.partialorder %v2923_v25, 0.0  ;;  %vm3995_vm3 = vcmp.ge.f32.partialorder %v2927_v26, 0.0  ;;  %vm3996_vm7 = vcmp.ge.f32.partialorder %v2931_v13, 0.0  ;;  %v4013_v52 = vld [vmem:[#allocation17_spill] sm:$0xff] }
 0x1f0   :  { %v3454_v58 = vsel %vm3994_vm9, %v2923_v25, %v3993_v9  ;;  %v3460_v5 = vsel %vm3995_vm3, %v2927_v26, %v3204_v16  ;;  %v3466_v39 = vsel %vm3996_vm7, %v2931_v13, %v3207_v38  ;;  %v3472_v63 = vsel %vm1019_vm11, %v2935_v53, %v3997_v18  ;;  %v4000_v13 = vld [vmem:[#allocation37_spill] sm:$0xff]  ;;  %v4002_v53 = vld [vmem:[#allocation39_spill] sm:$0xff]  ;;  %v4016_v16 = vld [vmem:[#allocation22_spill] sm:$0xff] }
 0x1f1   :  { %vm3998_vm10 = vcmp.ge.f32.partialorder %v2939_v33, 0.0  ;;  %vm3999_vm8 = vcmp.ge.f32.partialorder %v2943_v27, 0.0  ;;  %vm4001_vm2 = vcmp.ge.f32.partialorder %v2947_v61, 0.0  ;;  %v3496_v49 = vsel %vm1023_vm12, %v2951_v7, %v4002_v53  ;;  %v4009_v7 = vld [vmem:[#allocation44_spill] sm:$0xff]  ;;  %v4023_v9 = vld [vmem:[#allocation51_spill] sm:$0xff] }
 0x1f2   :  { %v3478_v25 = vsel %vm3998_vm10, %v2939_v33, %v3222_v60  ;;  %v3484_v26 = vsel %vm3999_vm8, %v2943_v27, %v3225_v11  ;;  %v3490_v57 = vsel %vm4001_vm2, %v2947_v61, %v4000_v13  ;;  %v4003_v33 = vld [vmem:[#allocation40_spill] sm:$0xff]  ;;  %vm4004_vm11 = vcmp.ge.f32.partialorder %v2955_v62, 0.0  ;;  %v4005_v27 = vld [vmem:[#allocation41_spill] sm:$0xff]  ;;  %v4007_v61 = vld [vmem:[#allocation43_spill] sm:$0xff] }
 0x1f3   :  { %v3502_v30 = vsel %vm4004_vm11, %v2955_v62, %v4003_v33  ;;  %vm4006_vm6 = vcmp.ge.f32.partialorder %v2959_v24, 0.0  ;;  %vm4008_vm9 = vcmp.ge.f32.partialorder %v2963_v43, 0.0  ;;  %v3520_v14 = vsel %vm1027_vm13, %v2967_v47, %v4009_v7  ;;  %v4010_v62 = vld [vmem:[#allocation13_spill] sm:$0xff]  ;;  %v4018_v47 = vld [vmem:[#allocation48_spill] sm:$0xff]  ;;  %v4024_v18 = vld [vmem:[#allocation11_spill] sm:$0xff] }
 0x1f4   :  { %v3508_v45 = vsel %vm4006_vm6, %v2959_v24, %v4005_v27  ;;  %v3514_v37 = vsel %vm4008_vm9, %v2963_v43, %v4007_v61  ;;  %vm4011_vm12 = vcmp.ge.f32.partialorder %v3949_v3, 0.0  ;;  %v4012_v24 = vld [vmem:[#allocation46_spill] sm:$0xff]  ;;  %vm4014_vm3 = vcmp.ge.f32.partialorder %v4013_v52, 0.0  ;;  %v4015_v43 = vld [vmem:[#allocation47_spill] sm:$0xff]  ;;  %v4026_v53 = vld [vmem:[#allocation52_spill] sm:$0xff] }
 0x1f5   :  { %v3526_v38 = vsel %vm4011_vm12, %v3949_v3, %v4010_v62  ;;  %v3532_v11 = vsel %vm4014_vm3, %v4013_v52, %v4012_v24  ;;  %vm4017_vm7 = vcmp.ge.f32.partialorder %v4016_v16, 0.0  ;;  %v3544_v56 = vsel %vm1031_vm14, %v4019_v40, %v4018_v47  ;;  %v4020_v3 = vld [vmem:[#allocation50_spill] sm:$0xff]  ;;  %v4027_v33 = vld [vmem:[#allocation16_spill] sm:$0xff]  ;;  %v4036_v40 = vld [vmem:[#allocation21_spill] sm:$0xff] }
 0x1f6   :  { %v3538_v60 = vsel %vm4017_vm7, %v4016_v16, %v4015_v43  ;;  %vm4022_vm13 = vcmp.ge.f32.partialorder %v4021_v22, 0.0  ;;  %vm4025_vm10 = vcmp.ge.f32.partialorder %v4024_v18, 0.0  ;;  %vm4028_vm8 = vcmp.ge.f32.partialorder %v4027_v33, 0.0  ;;  %v4029_v61 = vld [vmem:[#allocation20_spill] sm:$0xff]  ;;  %v4030_v62 = vld [vmem:[#allocation14_spill] sm:$0xff]  ;;  %v4034_v16 = vld [vmem:[#allocation23_spill] sm:$0xff] }
 0x1f7   :  { %v3550_v4 = vsel %vm4022_vm13, %v4021_v22, %v4020_v3  ;;  %v3556_v13 = vsel %vm4025_vm10, %v4024_v18, %v4023_v9  ;;  %v3562_v27 = vsel %vm4028_vm8, %v4027_v33, %v4026_v53  ;;  %v3567_v7 = vsel %vm1035_vm15, %v4029_v61, %v1099_v42  ;;  %v4032_v52 = vld [vmem:[#allocation18_spill] sm:$0xff]  ;;  %v4039_v22 = vld [vmem:[#allocation4_spill] sm:$0xff]  ;;  %v4044_v9 = vld [vmem:[#allocation9_spill] sm:$0xff] }
 0x1f8   :  { %vm4031_vm14 = vcmp.ge.f32.partialorder %v4030_v62, 0.0  ;;  %vm4033_vm2 = vcmp.ge.f32.partialorder %v4032_v52, 0.0  ;;  %vm4035_vm11 = vcmp.ge.f32.partialorder %v4034_v16, 0.0  ;;  %v3587_v42 = vsel %vm1039_vm0, %v3970_v41, %v1103_v31  ;;  %v4038_v3 = vld [vmem:[#allocation2_spill] sm:$0xff]  ;;  %v4043_v31 = vld [vmem:[#allocation5_spill] sm:$0xff]  ;;  %v4047_v61 = vld [vmem:[#allocation19_spill] sm:$0xff] }
 0x1f9   :  { %v3572_v24 = vsel %vm4031_vm14, %v4030_v62, %v1100_v19  ;;  %v3577_v43 = vsel %vm4033_vm2, %v4032_v52, %v1101_v29  ;;  %v3582_v47 = vsel %vm4035_vm11, %v4034_v16, %v1102_v46  ;;  %vm4037_vm15 = vcmp.ge.f32.partialorder %v4036_v40, 0.0  ;;  %v4046_v53 = vld [vmem:[#allocation10_spill] sm:$0xff]  ;;  %v4048_v62 = vld [vmem:[#allocation27_spill] sm:$0xff]  ;;  %v4049_v52 = vld [vmem:[#allocation29_spill] sm:$0xff] }
 0x1fa   :  { %v3592_v19 = vsel %vm4037_vm15, %v4036_v40, %v1104_v54  ;;  %v3597_v29 = vsel %vm1041_vm4, %v4038_v3, %v1105_v6  ;;  %vm4040_vm6 = vcmp.ge.f32.partialorder %v4039_v22, 0.0  ;;  %v3607_v41 = vsel %vm1043_vm1, %v3976_v8, %v1107_v21  ;;  %v4045_v6 = vld [vmem:[#allocation12_spill] sm:$0xff]  ;;  %v4050_v16 = vld [vmem:[#allocation30_spill] sm:$0xff] }
 0x1fb   :  { %v3602_v46 = vsel %vm4040_vm6, %v4039_v22, %v1106_v55  ;;  %4042 = vst [vmem:[#allocation6_spill] sm:$0xff] %v3607_v41  ;;  %v3612_v54 = vsel %vm1044_vm5, %v3977_v1, %v1108_v44  ;;  %v1668_v18 = vpack.c.bf16 %v4044_v9, %v4043_v31  ;;  %v1673_v33 = vpack.c.bf16 %v4046_v53, %v4045_v6  ;;  %v4051_v3 = vld [vmem:[#allocation32_spill] sm:$0xff]  ;;  %v4052_v8 = vld [vmem:[#allocation34_spill] sm:$0xff]  ;;  %v4056_v1 = vld [vmem:[#allocation45_spill] sm:$0xff] }
 0x1fc   :  { %4041 = vst [vmem:[#allocation7_spill] sm:$0xff] %v3602_v46  ;;  %v1678_v55 = vpack.c.bf16 %v4048_v62, %v4047_v61  ;;  %v1683_v40 = vpack.c.bf16 %v4050_v16, %v4049_v52  ;;  %v1688_v21 = vpack.c.bf16 %v4052_v8, %v4051_v3  ;;  %v4053_v22 = vld [vmem:[#allocation36_spill] sm:$0xff]  ;;  %v4054_v41 = vld [vmem:[#allocation38_spill] sm:$0xff]  ;;  %v4057_v9 = vld [vmem:[#allocation49_spill] sm:$0xff] }
 0x1fd   :  { %v1693_v46 = vpack.c.bf16 %v4054_v41, %v4053_v22  ;;  %1669 = vst [vmem:[%s3778_s4] sm:$0xff] %v1668_v18   ;;  %1825 = vst [vmem:[%s3778_s4 + $0x8] sm:$0xff] %v1673_v33   ;;  %v4055_v44 = vld [vmem:[#allocation42_spill] sm:$0xff]  ;;  %v4058_v6 = vld [vmem:[#allocation53_spill] sm:$0xff]  ;;  %v1713_v41 = vpack.c.bf16 %v3358_v36, %v3349_v59  ;;  %v1718_v18 = vpack.c.bf16 %v3370_v2, %v3364_v23 }
 0x1fe   :  { %v1698_v31 = vpack.c.bf16 %v4056_v1, %v4055_v44  ;;  %v1703_v53 = vpack.c.bf16 %v4058_v6, %v4057_v9  ;;  %v4059_v61 = vld [vmem:[#allocation54_spill] sm:$0xff]  ;;  %v4060_v62 = vld [vmem:[#allocation25_spill] sm:$0xff]  ;;  %1826 = vst [vmem:[%s3778_s4 + $0x10] sm:$0xff] %v1678_v55   ;;  %1827 = vst [vmem:[%s3778_s4 + $0x18] sm:$0xff] %v1683_v40   ;;  %v1723_v36 = vpack.c.bf16 %v3382_v51, %v3376_v17 }
 0x1ff   :  { %v1708_v52 = vpack.c.bf16 %v4060_v62, %v4059_v61  ;;  %1828 = vst [vmem:[%s3778_s4 + $0x20] sm:$0xff] %v1688_v21   ;;  %1829 = vst [vmem:[%s3778_s4 + $0x28] sm:$0xff] %v1693_v46   ;;  %v1728_v59 = vpack.c.bf16 %v3394_v15, %v3388_v0  ;;  %v1733_v33 = vpack.c.bf16 %v3406_v12, %v3400_v28 }
 0x200   :  { %1830 = vst [vmem:[%s3778_s4 + $0x30] sm:$0xff] %v1698_v31   ;;  %1831 = vst [vmem:[%s3778_s4 + $0x38] sm:$0xff] %v1703_v53   ;;  %v1738_v23 = vpack.c.bf16 %v3418_v35, %v3412_v20  ;;  %v1743_v2 = vpack.c.bf16 %v3430_v32, %v3424_v50  ;;  %v1748_v17 = vpack.c.bf16 %v3442_v10, %v3436_v34 }
 0x201   :  { %1832 = vst [vmem:[%s3778_s4 + $0x40] sm:$0xff] %v1708_v52   ;;  %1833 = vst [vmem:[%s3778_s4 + $0x48] sm:$0xff] %v1713_v41   ;;  %v1753_v51 = vpack.c.bf16 %v3454_v58, %v3448_v48  ;;  %v1758_v0 = vpack.c.bf16 %v3466_v39, %v3460_v5  ;;  %v1763_v15 = vpack.c.bf16 %v3478_v25, %v3472_v63 }
 0x202   :  { %1834 = vst [vmem:[%s3778_s4 + $0x50] sm:$0xff] %v1718_v18   ;;  %1835 = vst [vmem:[%s3778_s4 + $0x58] sm:$0xff] %v1723_v36   ;;  %v1768_v28 = vpack.c.bf16 %v3490_v57, %v3484_v26  ;;  %v1773_v12 = vpack.c.bf16 %v3502_v30, %v3496_v49  ;;  %v1778_v20 = vpack.c.bf16 %v3514_v37, %v3508_v45  ;;  %v4062_v63 = vld [vmem:[#allocation6_spill] sm:$0xff] }
 0x203   :  { %1836 = vst [vmem:[%s3778_s4 + $0x60] sm:$0xff] %v1728_v59   ;;  %1837 = vst [vmem:[%s3778_s4 + $0x68] sm:$0xff] %v1733_v33   ;;  %v1783_v35 = vpack.c.bf16 %v3526_v38, %v3520_v14  ;;  %v1788_v50 = vpack.c.bf16 %v3538_v60, %v3532_v11  ;;  %v1793_v32 = vpack.c.bf16 %v3550_v4, %v3544_v56  ;;  %v4061_v5 = vld [vmem:[#allocation7_spill] sm:$0xff] }
 0x204   :  { %1838 = vst [vmem:[%s3778_s4 + $0x70] sm:$0xff] %v1738_v23   ;;  %1839 = vst [vmem:[%s3778_s4 + $0x78] sm:$0xff] %v1743_v2   ;;  %v1798_v34 = vpack.c.bf16 %v3562_v27, %v3556_v13  ;;  %v1803_v10 = vpack.c.bf16 %v3572_v24, %v3567_v7  ;;  %v1808_v48 = vpack.c.bf16 %v3582_v47, %v3577_v43 }
 0x205   :  { %1840 = vst [vmem:[%s3778_s4 + $0x80] sm:$0xff] %v1748_v17   ;;  %1841 = vst [vmem:[%s3778_s4 + $0x88] sm:$0xff] %v1753_v51   ;;  %v1813_v58 = vpack.c.bf16 %v3592_v19, %v3587_v42  ;;  %v1818_v39 = vpack.c.bf16 %v4061_v5, %v3597_v29  ;;  %v1823_v25 = vpack.c.bf16 %v3612_v54, %v4062_v63 }
 0x206   :  { %1842 = vst [vmem:[%s3778_s4 + $0x90] sm:$0xff] %v1758_v0   ;;  %1843 = vst [vmem:[%s3778_s4 + $0x98] sm:$0xff] %v1763_v15  }
 0x207   :  { %1844 = vst [vmem:[%s3778_s4 + $0xa0] sm:$0xff] %v1768_v28   ;;  %1845 = vst [vmem:[%s3778_s4 + $0xa8] sm:$0xff] %v1773_v12  }
 0x208   :  { %1846 = vst [vmem:[%s3778_s4 + $0xb0] sm:$0xff] %v1778_v20   ;;  %1847 = vst [vmem:[%s3778_s4 + $0xb8] sm:$0xff] %v1783_v35  }
 0x209   :  { %1848 = vst [vmem:[%s3778_s4 + $0xc0] sm:$0xff] %v1788_v50   ;;  %1849 = vst [vmem:[%s3778_s4 + $0xc8] sm:$0xff] %v1793_v32  }
 0x20a   :  { %1850 = vst [vmem:[%s3778_s4 + $0xd0] sm:$0xff] %v1798_v34   ;;  %1851 = vst [vmem:[%s3778_s4 + $0xd8] sm:$0xff] %v1803_v10  }
 0x20b   :  { %1852 = vst [vmem:[%s3778_s4 + $0xe0] sm:$0xff] %v1808_v48   ;;  %1853 = vst [vmem:[%s3778_s4 + $0xe8] sm:$0xff] %v1813_v58  }
 0x20c   :  { %1854 = vst [vmem:[%s3778_s4 + $0xf0] sm:$0xff] %v1818_v39   ;;  %1855 = vst [vmem:[%s3778_s4 + $0xf8] sm:$0xff] %v1823_v25  }

// kernel: _lambda_.7
= control target key start
LH: loop header
LB: loop body
LE: loop exit
PB: predicated region body
PF: predicated region fallthrough
CT: control target
= control target key end

     0   :  { %s1081_s1 = inlined_call_operand.vmem [shape: bf16[256,128], index: 1, kind: input, shape index: {}]   ;;  %s1082_s0 = inlined_call_operand.vmem [shape: bf16[128,256], index: 0, kind: input, shape index: {}]   ;;  %s1083_s2 = inlined_call_operand.vmem [shape: f32[1,128], index: 2, kind: input, shape index: {}]   ;;  %s1084_s3 = inlined_call_operand.vmem [shape: f32[1,128], index: 3, kind: input, shape index: {}]   ;;  %s1085_s4 = inlined_call_operand.vmem [shape: bf16[128,128], index: 4, kind: output, shape index: {}]  }
   0x1   :  { %v776_v0 = vld [vmem:[%s1081_s1 + $0x40] sm:$0xff]   ;;  %v778_v2 = vld [vmem:[%s1081_s1 + $0x48] sm:$0xff]   ;;  %v780_v4 = vld [vmem:[%s1081_s1 + $0x50] sm:$0xff]  }
   0x2   :  { %v777_v1 = vld [vmem:[%s1081_s1] sm:$0xff]   ;;  %696 = vmatprep.subr.bf16.mxu0 %v776_v0  ;;  %760 = vmatprep.subr.bf16.mxu1 %v776_v0  ;;  %v779_v3 = vld [vmem:[%s1081_s1 + $0x8] sm:$0xff]   ;;  %v781_v5 = vld [vmem:[%s1081_s1 + $0x10] sm:$0xff]  }
   0x3   :  { %697 = vmatpush3.bf16.msra.mxu0 %v777_v1  ;;  %768 = vmatpush3.bf16.msra.mxu1 %v777_v1  ;;  %v782_v6 = vld [vmem:[%s1081_s1 + $0x58] sm:$0xff]   ;;  %v784_v8 = vld [vmem:[%s1081_s1 + $0x60] sm:$0xff]   ;;  %v786_v10 = vld [vmem:[%s1081_s1 + $0x68] sm:$0xff]  }
   0x4   :  { %698 = vmatprep.subr.bf16.mxu0 %v778_v2  ;;  %761 = vmatprep.subr.bf16.mxu1 %v778_v2  ;;  %v783_v7 = vld [vmem:[%s1081_s1 + $0x18] sm:$0xff]   ;;  %v785_v9 = vld [vmem:[%s1081_s1 + $0x20] sm:$0xff]   ;;  %v787_v12 = vld [vmem:[%s1081_s1 + $0x28] sm:$0xff]  }
   0x5   :  { %v794_v11 = vld [vmem:[%s1082_s0 + $0x4] ss:$8 sps:$4 sm:$0xff]   ;;  %v788_v14 = vld [vmem:[%s1081_s1 + $0x70] sm:$0xff]   ;;  %v790_v16 = vld [vmem:[%s1081_s1 + $0x78] sm:$0xff]  }
   0x6   :  { %v800_v13 = vld [vmem:[%s1082_s0 + $0x44] ss:$8 sps:$4 sm:$0xff]   ;;  %274 = vmatprep.mubr.bf16.mxu0 %v794_v11  ;;  %v789_v15 = vld [vmem:[%s1081_s1 + $0x30] sm:$0xff]   ;;  %v791_v17 = vld [vmem:[%s1081_s1 + $0x38] sm:$0xff]  }
   0x7   :  { %699 = vmatpush3.bf16.msra.mxu0 %v779_v3  ;;  %769 = vmatpush3.bf16.msra.mxu1 %v779_v3  ;;  %v792_v18 = vld [vmem:[%s1082_s0] ss:$8 sps:$4 sm:$0xff]   ;;  %v795_v20 = vld [vmem:[%s1082_s0 + $0x14] ss:$8 sps:$4 sm:$0xff]   ;;  %v797_v22 = vld [vmem:[%s1082_s0 + $0x10] ss:$8 sps:$4 sm:$0xff]  }
   0x8   :  { %700 = vmatprep.subr.bf16.mxu0 %v780_v4  ;;  %762 = vmatprep.subr.bf16.mxu1 %v780_v4  ;;  %v798_v19 = vld [vmem:[%s1082_s0 + $0x40] ss:$8 sps:$4 sm:$0xff]   ;;  %v804_v21 = vld [vmem:[%s1082_s0 + $0x54] ss:$8 sps:$4 sm:$0xff]   ;;  %v806_v23 = vld [vmem:[%s1082_s0 + $0x50] ss:$8 sps:$4 sm:$0xff]  }
   0x9   :  { %306 = vmatprep.mubr.bf16.mxu1 %v800_v13  ;;  %v801_v24 = vld [vmem:[%s1082_s0 + $0x24] ss:$8 sps:$4 sm:$0xff]   ;;  %v803_v26 = vld [vmem:[%s1082_s0 + $0x20] ss:$8 sps:$4 sm:$0xff]   ;;  %v807_v28 = vld [vmem:[%s1082_s0 + $0x34] ss:$8 sps:$4 sm:$0xff]  }
   0xa   :  { %v810_v25 = vld [vmem:[%s1082_s0 + $0x64] ss:$8 sps:$4 sm:$0xff]   ;;  %v812_v27 = vld [vmem:[%s1082_s0 + $0x60] ss:$8 sps:$4 sm:$0xff]   ;;  %v813_v29 = vld [vmem:[%s1082_s0 + $0x74] ss:$8 sps:$4 sm:$0xff]  }
   0xb   :  { %701 = vmatpush3.bf16.msra.mxu0 %v781_v5  ;;  %770 = vmatpush3.bf16.msra.mxu1 %v781_v5  ;;  %v809_v30 = vld [vmem:[%s1082_s0 + $0x30] ss:$8 sps:$4 sm:$0xff]  }
   0xc   :  { %702 = vmatprep.subr.bf16.mxu0 %v782_v6  ;;  %763 = vmatprep.subr.bf16.mxu1 %v782_v6  ;;  %v815_v31 = vld [vmem:[%s1082_s0 + $0x70] ss:$8 sps:$4 sm:$0xff]  }
   0xf   :  { %703 = vmatpush3.bf16.msra.mxu0 %v783_v7  ;;  %771 = vmatpush3.bf16.msra.mxu1 %v783_v7 }
  0x10   :  { %704 = vmatprep.subr.bf16.mxu0 %v784_v8  ;;  %764 = vmatprep.subr.bf16.mxu1 %v784_v8 }
  0x13   :  { %705 = vmatpush3.bf16.msra.mxu0 %v785_v9  ;;  %772 = vmatpush3.bf16.msra.mxu1 %v785_v9 }
  0x14   :  { %706 = vmatprep.subr.bf16.mxu0 %v786_v10  ;;  %765 = vmatprep.subr.bf16.mxu1 %v786_v10 }
  0x17   :  { %707 = vmatpush3.bf16.msra.mxu0 %v787_v12  ;;  %773 = vmatpush3.bf16.msra.mxu1 %v787_v12 }
  0x18   :  { %708 = vmatprep.subr.bf16.mxu0 %v788_v14  ;;  %766 = vmatprep.subr.bf16.mxu1 %v788_v14 }
  0x1b   :  { %709 = vmatpush3.bf16.msra.mxu0 %v789_v15  ;;  %774 = vmatpush3.bf16.msra.mxu1 %v789_v15 }
  0x1c   :  { %710 = vmatprep.subr.bf16.mxu0 %v790_v16  ;;  %767 = vmatprep.subr.bf16.mxu1 %v790_v16 }
  0x1f   :  { %711 = vmatpush3.bf16.msra.mxu0 %v791_v17  ;;  %775 = vmatpush3.bf16.msra.mxu1 %v791_v17 }
  0x22   :  { %275 = vmatmul.mubr.bf16.vlgmr.msra.gmra.mrb[0].mxu0 %v792_v18  ;;  %307 = vmatmul.mubr.bf16.vlgmr.msra.gmra.mrb[0].mxu1 %v798_v19 }
  0x23   :  { %282 = vmatprep.mubr.bf16.mxu0 %v795_v20  ;;  %314 = vmatprep.mubr.bf16.mxu1 %v804_v21 }
  0x2a   :  { %283 = vmatmul.mubr.bf16.gmra.mrb[4].mxu0 %v797_v22  ;;  %315 = vmatmul.mubr.bf16.gmra.mrb[4].mxu1 %v806_v23 }
  0x2b   :  { %290 = vmatprep.mubr.bf16.mxu0 %v801_v24  ;;  %322 = vmatprep.mubr.bf16.mxu1 %v810_v25 }
  0x32   :  { %291 = vmatmul.mubr.bf16.gmra.mrb[8].mxu0 %v803_v26  ;;  %323 = vmatmul.mubr.bf16.gmra.mrb[8].mxu1 %v812_v27 }
  0x33   :  { %298 = vmatprep.mubr.bf16.mxu0 %v807_v28  ;;  %330 = vmatprep.mubr.bf16.mxu1 %v813_v29 }
  0x3a   :  { %299 = vmatmul.mubr.bf16.gmra.mrb[12].mxu0 %v809_v30  ;;  %331 = vmatmul.mubr.bf16.gmra.mrb[12].mxu1 %v815_v31 }
  0xf5   :  { %v712_v32 = vpop.f32.mrb[0].mxu0  ;;  %v736_v33 = vpop.f32.mrb[0].mxu1 }
  0xf6   :  { %v713_v34 = vpop.f32.mrb[1].mxu0  ;;  %v737_v35 = vpop.f32.mrb[1].mxu1 }
  0xf7   :  { %v939_v36 = vadd.f32 %v713_v34, %v712_v32  ;;  %v715_v37 = vpop.f32.mrb[2].mxu0  ;;  %v941_v38 = vadd.f32 %v737_v35, %v736_v33  ;;  %v739_v39 = vpop.f32.mrb[2].mxu1 }
  0xf8   :  { %v716_v40 = vpop.f32.mrb[3].mxu0  ;;  %v740_v41 = vpop.f32.mrb[3].mxu1 }
  0xf9   :  { %v943_v42 = vadd.f32 %v716_v40, %v715_v37  ;;  %v945_v43 = vadd.f32 %v740_v41, %v739_v39  ;;  %v361_v55 = vmul.f32 %v939_v36, %v939_v36  ;;  %v369_v39 = vmul.f32 %v941_v38, %v941_v38 }
  0xfb   :  { %v362_v48 = vmul.f32 %v943_v42, %v943_v42  ;;  %v339_v56 = vadd.f32 %v943_v42, %v939_v36 }
  0xfd   :  { %v718_v44 = vpop.f32.mrb[4].mxu0  ;;  %v742_v45 = vpop.f32.mrb[4].mxu1  ;;  %v377_v60 = vadd.f32 %v362_v48, %v361_v55 }
  0xfe   :  { %v719_v46 = vpop.f32.mrb[5].mxu0  ;;  %v743_v47 = vpop.f32.mrb[5].mxu1 }
  0xff   :  { %v949_v49 = vadd.f32 %v719_v46, %v718_v44  ;;  %v721_v50 = vpop.f32.mrb[6].mxu0  ;;  %v951_v51 = vadd.f32 %v743_v47, %v742_v45  ;;  %v745_v52 = vpop.f32.mrb[6].mxu1  ;;  %v370_v44 = vmul.f32 %v945_v43, %v945_v43 }
 0x100   :  { %v722_v53 = vpop.f32.mrb[7].mxu0  ;;  %v746_v54 = vpop.f32.mrb[7].mxu1 }
 0x101   :  { %v363_v57 = vmul.f32 %v949_v49, %v949_v49  ;;  %v959_v58 = vadd.f32 %v722_v53, %v721_v50  ;;  %v961_v59 = vadd.f32 %v746_v54, %v745_v52  ;;  %v340_v61 = vadd.f32 %v949_v49, %v339_v56 }
 0x102   :  { %v371_v47 = vmul.f32 %v951_v51, %v951_v51 }
 0x103   :  { %v378_v62 = vadd.f32 %v377_v60, %v363_v57  ;;  %v364_v63 = vmul.f32 %v959_v58, %v959_v58  ;;  %v341_v4 = vadd.f32 %v959_v58, %v340_v61  ;;  %v372_v52 = vmul.f32 %v961_v59, %v961_v59 }
 0x105   :  { %v724_v0 = vpop.f32.mrb[8].mxu0  ;;  %v748_v1 = vpop.f32.mrb[8].mxu1  ;;  %v379_v11 = vadd.f32 %v378_v62, %v364_v63 }
 0x106   :  { %v725_v2 = vpop.f32.mrb[9].mxu0  ;;  %v749_v3 = vpop.f32.mrb[9].mxu1 }
 0x107   :  { %v967_v5 = vadd.f32 %v725_v2, %v724_v0  ;;  %v727_v6 = vpop.f32.mrb[10].mxu0  ;;  %v969_v7 = vadd.f32 %v749_v3, %v748_v1  ;;  %v751_v8 = vpop.f32.mrb[10].mxu1 }
 0x108   :  { %v728_v9 = vpop.f32.mrb[11].mxu0  ;;  %v752_v10 = vpop.f32.mrb[11].mxu1 }
 0x109   :  { %v342_v12 = vadd.f32 %v967_v5, %v341_v4  ;;  %v365_v13 = vmul.f32 %v967_v5, %v967_v5  ;;  %v974_v14 = vadd.f32 %v728_v9, %v727_v6  ;;  %v976_v15 = vadd.f32 %v752_v10, %v751_v8 }
 0x10a   :  { %v373_v56 = vmul.f32 %v969_v7, %v969_v7 }
 0x10b   :  { %v380_v16 = vadd.f32 %v379_v11, %v365_v13  ;;  %v343_v17 = vadd.f32 %v974_v14, %v342_v12  ;;  %v366_v18 = vmul.f32 %v974_v14, %v974_v14  ;;  %v374_v62 = vmul.f32 %v976_v15, %v976_v15 }
 0x10d   :  { %v381_v19 = vadd.f32 %v380_v16, %v366_v18  ;;  %v730_v20 = vpop.f32.mrb[12].mxu0  ;;  %v754_v21 = vpop.f32.mrb[12].mxu1 }
 0x10e   :  { %v731_v22 = vpop.f32.mrb[13].mxu0  ;;  %v755_v23 = vpop.f32.mrb[13].mxu1 }
 0x10f   :  { %v981_v24 = vadd.f32 %v731_v22, %v730_v20  ;;  %v733_v25 = vpop.f32.mrb[14].mxu0  ;;  %v983_v26 = vadd.f32 %v755_v23, %v754_v21  ;;  %v757_v27 = vpop.f32.mrb[14].mxu1 }
 0x110   :  { %v734_v28 = vpop.f32.mrb[15].mxu0  ;;  %v758_v29 = vpop.f32.mrb[15].mxu1 }
 0x111   :  { %v344_v30 = vadd.f32 %v981_v24, %v343_v17  ;;  %v367_v31 = vmul.f32 %v981_v24, %v981_v24  ;;  %v988_v32 = vadd.f32 %v734_v28, %v733_v25  ;;  %v990_v33 = vadd.f32 %v758_v29, %v757_v27 }
 0x112   :  { %v375_v63 = vmul.f32 %v983_v26, %v983_v26 }
 0x113   :  { %v382_v34 = vadd.f32 %v381_v19, %v367_v31  ;;  %v345_v35 = vadd.f32 %v988_v32, %v344_v30  ;;  %v368_v37 = vmul.f32 %v988_v32, %v988_v32  ;;  %v376_v4 = vmul.f32 %v990_v33, %v990_v33 }
 0x114   :  { %v410_v30 = vlaneseq }
 0x115   :  { %v346_v40 = vadd.f32 %v941_v38, %v345_v35  ;;  %v383_v41 = vadd.f32 %v382_v34, %v368_v37  ;;  %v402_v34 = vld [vmem:[%s1083_s2] sm:$0x1] }
 0x116   :  { %v411_v31 = vshrl.u32 %v410_v30, 7 }
 0x117   :  { %v347_v45 = vadd.f32 %v945_v43, %v346_v40  ;;  %v384_v46 = vadd.f32 %v383_v41, %v369_v39  ;;  %v406_v40 = vld [vmem:[%s1084_s3] sm:$0x1] }
 0x118   :  { %v412_v35 = vsub.s32 0, %v411_v31 }
 0x119   :  { %v385_v48 = vadd.f32 %v384_v46, %v370_v44  ;;  %v348_v50 = vadd.f32 %v951_v51, %v347_v45 }
 0x11b   :  { %v349_v53 = vadd.f32 %v961_v59, %v348_v50  ;;  %v386_v54 = vadd.f32 %v385_v48, %v371_v47 }
 0x11d   :  { %v350_v55 = vadd.f32 %v969_v7, %v349_v53  ;;  %v387_v57 = vadd.f32 %v386_v54, %v372_v52 }
 0x11f   :  { %v388_v60 = vadd.f32 %v387_v57, %v373_v56  ;;  %v351_v61 = vadd.f32 %v976_v15, %v350_v55 }
 0x121   :  { %v389_v0 = vadd.f32 %v388_v60, %v374_v62  ;;  %v352_v1 = vadd.f32 %v983_v26, %v351_v61 }
 0x123   :  { %v390_v2 = vadd.f32 %v389_v0, %v375_v63  ;;  %v353_v3 = vadd.f32 %v990_v33, %v352_v1 }
 0x125   :  { %v354_v6 = vrot.slane %v353_v3, 4  ;;  %v391_v8 = vadd.f32 %v390_v2, %v376_v4 }
 0x127   :  { %v355_v9 = vadd.f32 %v354_v6, %v353_v3  ;;  %v392_v10 = vrot.slane %v391_v8, 4 }
 0x129   :  { %v356_v11 = vrot.slane %v355_v9, 2  ;;  %v393_v12 = vadd.f32 %v392_v10, %v391_v8 }
 0x12b   :  { %v357_v13 = vadd.f32 %v356_v11, %v355_v9  ;;  %v394_v16 = vrot.slane %v393_v12, 2 }
 0x12d   :  { %v358_v17 = vrot.slane %v357_v13, 1  ;;  %v395_v18 = vadd.f32 %v394_v16, %v393_v12 }
 0x12f   :  { %v359_v19 = vadd.f32 %v358_v17, %v357_v13  ;;  %v396_v20 = vrot.slane %v395_v18, 1 }
 0x131   :  { %v360_v21 = vmul.f32 0.0078125, %v359_v19  ;;  %v397_v22 = vadd.f32 %v396_v20, %v395_v18 }
 0x133   :  { %v398_v23 = vmul.f32 0.0078125, %v397_v22  ;;  %v399_v25 = vmul.f32 %v360_v21, %v360_v21 }
 0x135   :  { %v400_v27 = vsub.f32 %v398_v23, %v399_v25 }
 0x137   :  { %v401_v28 = vmax.f32 %v400_v27, 0.0 }
 0x139   :  { %v403_v29 = vadd.f32 1e-05, %v401_v28 }
 0x13b   :  { %816 = vrsqrt.f32 %v403_v29 }
 0x145   :  { %v817_v37 = vpop.eup %816 }
 0x146   :  { %v405_v39 = vmul.f32 %v817_v37, %v402_v34 }
 0x148   :  { %v407_v41 = vmul.f32 %v405_v39, %v360_v21  ;;  %v413_v44 = vrot.slane %v405_v39, %v412_v35 }
 0x14a   :  { %v408_v45 = vsub.f32 %v406_v40, %v407_v41  ;;  %v415_v46 = vmul.f32 %v939_v36, %v413_v44  ;;  %v416_v47 = vmul.f32 %v943_v42, %v413_v44  ;;  %v419_v48 = vmul.f32 %v967_v5, %v413_v44 }
 0x14b   :  { %v420_v50 = vmul.f32 %v974_v14, %v413_v44  ;;  %v421_v52 = vmul.f32 %v981_v24, %v413_v44  ;;  %v422_v53 = vmul.f32 %v988_v32, %v413_v44  ;;  %v423_v54 = vmul.f32 %v941_v38, %v413_v44 }
 0x14c   :  { %v424_v55 = vmul.f32 %v945_v43, %v413_v44  ;;  %v425_v56 = vmul.f32 %v951_v51, %v413_v44  ;;  %v426_v57 = vmul.f32 %v961_v59, %v413_v44  ;;  %v427_v36 = vmul.f32 %v969_v7, %v413_v44 }
 0x14d   :  { %v428_v42 = vmul.f32 %v976_v15, %v413_v44  ;;  %v429_v5 = vmul.f32 %v983_v26, %v413_v44  ;;  %v417_v14 = vmul.f32 %v949_v49, %v413_v44  ;;  %v418_v24 = vmul.f32 %v959_v58, %v413_v44 }
 0x14e   :  { %v430_v32 = vmul.f32 %v990_v33, %v413_v44  ;;  %v435_v60 = vrot.slane %v408_v45, %v412_v35 }
 0x150   :  { %v437_v38 = vadd.f32 %v435_v60, %v415_v46  ;;  %v438_v61 = vadd.f32 %v435_v60, %v416_v47  ;;  %v439_v43 = vadd.f32 %v435_v60, %v417_v14  ;;  %v440_v62 = vadd.f32 %v435_v60, %v418_v24 }
 0x151   :  { %v441_v51 = vadd.f32 %v435_v60, %v419_v48  ;;  %v442_v63 = vadd.f32 %v435_v60, %v420_v50  ;;  %v443_v59 = vadd.f32 %v435_v60, %v421_v52  ;;  %v444_v0 = vadd.f32 %v435_v60, %v422_v53 }
 0x152   :  { %v445_v7 = vadd.f32 %v435_v60, %v423_v54  ;;  %v446_v1 = vadd.f32 %v435_v60, %v424_v55  ;;  %v447_v15 = vadd.f32 %v435_v60, %v425_v56  ;;  %v448_v2 = vadd.f32 %v435_v60, %v426_v57 }
 0x153   :  { %v449_v26 = vadd.f32 %v435_v60, %v427_v36  ;;  %v450_v3 = vadd.f32 %v435_v60, %v428_v42  ;;  %v451_v49 = vadd.f32 %v435_v60, %v429_v5  ;;  %v452_v4 = vadd.f32 %v435_v60, %v430_v32 }
 0x154   :  { %vm453_vm0 = vcmp.ge.f32.partialorder %v437_v38, 0.0  ;;  %vm454_vm1 = vcmp.ge.f32.partialorder %v438_v61, 0.0  ;;  %vm455_vm2 = vcmp.ge.f32.partialorder %v439_v43, 0.0  ;;  %vm456_vm3 = vcmp.ge.f32.partialorder %v440_v62, 0.0 }
 0x155   :  { %vm457_vm4 = vcmp.ge.f32.partialorder %v441_v51, 0.0  ;;  %vm458_vm5 = vcmp.ge.f32.partialorder %v442_v63, 0.0  ;;  %vm459_vm6 = vcmp.ge.f32.partialorder %v443_v59, 0.0  ;;  %vm460_vm7 = vcmp.ge.f32.partialorder %v444_v0, 0.0 }
 0x156   :  { %vm461_vm8 = vcmp.ge.f32.partialorder %v445_v7, 0.0  ;;  %vm462_vm9 = vcmp.ge.f32.partialorder %v446_v1, 0.0  ;;  %vm463_vm10 = vcmp.ge.f32.partialorder %v447_v15, 0.0  ;;  %vm464_vm11 = vcmp.ge.f32.partialorder %v448_v2, 0.0 }
 0x157   :  { %vm465_vm12 = vcmp.ge.f32.partialorder %v449_v26, 0.0  ;;  %vm466_vm13 = vcmp.ge.f32.partialorder %v450_v3, 0.0  ;;  %vm467_vm14 = vcmp.ge.f32.partialorder %v451_v49, 0.0  ;;  %vm468_vm15 = vcmp.ge.f32.partialorder %v452_v4, 0.0 }
 0x158   :  { %v469_v58 = vmul.f32 0.2, %v437_v38  ;;  %v470_v33 = vmul.f32 0.2, %v438_v61  ;;  %v471_v6 = vmul.f32 0.2, %v439_v43 }
 0x159   :  { %v472_v8 = vmul.f32 0.2, %v440_v62  ;;  %v473_v9 = vmul.f32 0.2, %v441_v51  ;;  %v474_v10 = vmul.f32 0.2, %v442_v63 }
 0x15a   :  { %v475_v11 = vmul.f32 0.2, %v443_v59  ;;  %v476_v12 = vmul.f32 0.2, %v444_v0  ;;  %v477_v13 = vmul.f32 0.2, %v445_v7  ;;  %v485_v16 = vsel %vm453_vm0, %v437_v38, %v469_v58 }
 0x15b   :  { %v478_v17 = vmul.f32 0.2, %v446_v1  ;;  %v479_v18 = vmul.f32 0.2, %v447_v15  ;;  %v480_v19 = vmul.f32 0.2, %v448_v2  ;;  %v486_v20 = vsel %vm454_vm1, %v438_v61, %v470_v33 }
 0x15c   :  { %v481_v21 = vmul.f32 0.2, %v449_v26  ;;  %v482_v22 = vmul.f32 0.2, %v450_v3  ;;  %v483_v23 = vmul.f32 0.2, %v451_v49  ;;  %v487_v25 = vsel %vm455_vm2, %v439_v43, %v471_v6 }
 0x15d   :  { %v484_v27 = vmul.f32 0.2, %v452_v4  ;;  %v488_v28 = vsel %vm456_vm3, %v440_v62, %v472_v8  ;;  %v489_v29 = vsel %vm457_vm4, %v441_v51, %v473_v9  ;;  %v490_v30 = vsel %vm458_vm5, %v442_v63, %v474_v10 }
 0x15e   :  { %v491_v31 = vsel %vm459_vm6, %v443_v59, %v475_v11  ;;  %v492_v34 = vsel %vm460_vm7, %v444_v0, %v476_v12  ;;  %v493_v35 = vsel %vm461_vm8, %v445_v7, %v477_v13  ;;  %v494_v37 = vsel %vm462_vm9, %v446_v1, %v478_v17 }
 0x15f   :  { %v495_v39 = vsel %vm463_vm10, %v447_v15, %v479_v18  ;;  %v496_v40 = vsel %vm464_vm11, %v448_v2, %v480_v19  ;;  %v497_v41 = vsel %vm465_vm12, %v449_v26, %v481_v21  ;;  %v498_v44 = vsel %vm466_vm13, %v450_v3, %v482_v22 }
 0x160   :  { %v499_v45 = vsel %vm467_vm14, %v451_v49, %v483_v23  ;;  %v500_v46 = vsel %vm468_vm15, %v452_v4, %v484_v27  ;;  %v652_v47 = vpack.c.bf16 %v486_v20, %v485_v16  ;;  %v657_v48 = vpack.c.bf16 %v488_v28, %v487_v25 }
 0x161   :  { %v662_v50 = vpack.c.bf16 %v490_v30, %v489_v29  ;;  %v667_v52 = vpack.c.bf16 %v492_v34, %v491_v31  ;;  %v672_v53 = vpack.c.bf16 %v494_v37, %v493_v35  ;;  %v677_v54 = vpack.c.bf16 %v496_v40, %v495_v39 }
 0x162   :  { %653 = vst [vmem:[%s1085_s4] sm:$0xff] %v652_v47   ;;  %689 = vst [vmem:[%s1085_s4 + $0x8] sm:$0xff] %v657_v48   ;;  %v682_v55 = vpack.c.bf16 %v498_v44, %v497_v41  ;;  %v687_v56 = vpack.c.bf16 %v500_v46, %v499_v45 }
 0x163   :  { %690 = vst [vmem:[%s1085_s4 + $0x10] sm:$0xff] %v662_v50   ;;  %691 = vst [vmem:[%s1085_s4 + $0x18] sm:$0xff] %v667_v52  }
 0x164   :  { %692 = vst [vmem:[%s1085_s4 + $0x20] sm:$0xff] %v672_v53   ;;  %693 = vst [vmem:[%s1085_s4 + $0x28] sm:$0xff] %v677_v54  }
 0x165   :  { %694 = vst [vmem:[%s1085_s4 + $0x30] sm:$0xff] %v682_v55   ;;  %695 = vst [vmem:[%s1085_s4 + $0x38] sm:$0xff] %v687_v56  }

// kernel: _lambda_.8
= control target key start
LH: loop header
LB: loop body
LE: loop exit
PB: predicated region body
PF: predicated region fallthrough
CT: control target
= control target key end

     0   :  { %s828_s1 = inlined_call_operand.vmem [shape: bf16[512,128], index: 1, kind: input, shape index: {}]   ;;  %s829_s0 = inlined_call_operand.vmem [shape: bf16[32,512], index: 0, kind: input, shape index: {}]   ;;  %s830_s2 = inlined_call_operand.vmem [shape: f32[1,128], index: 2, kind: input, shape index: {}]   ;;  %s831_s3 = inlined_call_operand.vmem [shape: f32[1,128], index: 3, kind: input, shape index: {}]   ;;  %s832_s4 = inlined_call_operand.vmem [shape: bf16[32,128], index: 4, kind: output, shape index: {}]  }
   0x1   :  { %v625_v0 = vld [vmem:[%s828_s1 + $0x40] sm:$0xff]   ;;  %v629_v4 = vld [vmem:[%s828_s1 + $0x48] sm:$0xff]   ;;  %v633_v8 = vld [vmem:[%s828_s1 + $0x50] sm:$0xff]  }
   0x2   :  { %v626_v1 = vld [vmem:[%s828_s1 + $0xc0] sm:$0xff]   ;;  %569 = vmatprep.subr.bf16.mxu0 %v625_v0  ;;  %v630_v5 = vld [vmem:[%s828_s1 + $0xc8] sm:$0xff]   ;;  %v634_v9 = vld [vmem:[%s828_s1 + $0xd0] sm:$0xff]  }
   0x3   :  { %v627_v2 = vld [vmem:[%s828_s1] sm:$0xff]   ;;  %597 = vmatprep.subr.bf16.mxu1 %v626_v1  ;;  %v631_v6 = vld [vmem:[%s828_s1 + $0x8] sm:$0xff]   ;;  %v635_v10 = vld [vmem:[%s828_s1 + $0x10] sm:$0xff]  }
   0x4   :  { %v628_v3 = vld [vmem:[%s828_s1 + $0x80] sm:$0xff]   ;;  %570 = vmatpush3.bf16.msra.mxu0 %v627_v2  ;;  %v632_v7 = vld [vmem:[%s828_s1 + $0x88] sm:$0xff]   ;;  %v636_v11 = vld [vmem:[%s828_s1 + $0x90] sm:$0xff]  }
   0x5   :  { %598 = vmatpush3.bf16.msra.mxu1 %v628_v3  ;;  %571 = vmatprep.subr.bf16.mxu0 %v629_v4  ;;  %v637_v12 = vld [vmem:[%s828_s1 + $0x58] sm:$0xff]   ;;  %v641_v16 = vld [vmem:[%s828_s1 + $0x60] sm:$0xff]   ;;  %v645_v20 = vld [vmem:[%s828_s1 + $0x68] sm:$0xff]  }
   0x6   :  { %599 = vmatprep.subr.bf16.mxu1 %v630_v5  ;;  %v638_v13 = vld [vmem:[%s828_s1 + $0xd8] sm:$0xff]   ;;  %v642_v17 = vld [vmem:[%s828_s1 + $0xe0] sm:$0xff]   ;;  %v646_v21 = vld [vmem:[%s828_s1 + $0xe8] sm:$0xff]  }
   0x7   :  { %v639_v14 = vld [vmem:[%s828_s1 + $0x18] sm:$0xff]   ;;  %v643_v18 = vld [vmem:[%s828_s1 + $0x20] sm:$0xff]   ;;  %v647_v22 = vld [vmem:[%s828_s1 + $0x28] sm:$0xff]  }
   0x8   :  { %572 = vmatpush3.bf16.msra.mxu0 %v631_v6  ;;  %v640_v15 = vld [vmem:[%s828_s1 + $0x98] sm:$0xff]   ;;  %v644_v19 = vld [vmem:[%s828_s1 + $0xa0] sm:$0xff]   ;;  %v648_v23 = vld [vmem:[%s828_s1 + $0xa8] sm:$0xff]  }
   0x9   :  { %600 = vmatpush3.bf16.msra.mxu1 %v632_v7  ;;  %573 = vmatprep.subr.bf16.mxu0 %v633_v8  ;;  %v649_v24 = vld [vmem:[%s828_s1 + $0x70] sm:$0xff]   ;;  %v653_v28 = vld [vmem:[%s828_s1 + $0x78] sm:$0xff]  }
   0xa   :  { %601 = vmatprep.subr.bf16.mxu1 %v634_v9  ;;  %v650_v25 = vld [vmem:[%s828_s1 + $0xf0] sm:$0xff]   ;;  %v654_v29 = vld [vmem:[%s828_s1 + $0xf8] sm:$0xff]  }
   0xb   :  { %v651_v26 = vld [vmem:[%s828_s1 + $0x30] sm:$0xff]   ;;  %v655_v30 = vld [vmem:[%s828_s1 + $0x38] sm:$0xff]  }
   0xc   :  { %574 = vmatpush3.bf16.msra.mxu0 %v635_v10  ;;  %v652_v27 = vld [vmem:[%s828_s1 + $0xb0] sm:$0xff]   ;;  %v656_v31 = vld [vmem:[%s828_s1 + $0xb8] sm:$0xff]  }
   0xd   :  { %602 = vmatpush3.bf16.msra.mxu1 %v636_v11  ;;  %575 = vmatprep.subr.bf16.mxu0 %v637_v12  ;;  %v657_v32 = vld [vmem:[%s829_s0] ss:$16 sps:$4 sm:$0xff]   ;;  %v659_v33 = vld [vmem:[%s829_s0 + $0x4] ss:$16 sps:$4 sm:$0xff]   ;;  %v660_v34 = vld [vmem:[%s829_s0 + $0x8] ss:$16 sps:$4 sm:$0xff]  }
   0xe   :  { %603 = vmatprep.subr.bf16.mxu1 %v638_v13  ;;  %v662_v35 = vld [vmem:[%s829_s0 + $0xc] ss:$16 sps:$4 sm:$0xff]   ;;  %354 = vmatprep.mubr.bf16.mxu0 %v659_v33  ;;  %v663_v36 = vld [vmem:[%s829_s0 + $0x24] ss:$16 sps:$4 sm:$0xff]   ;;  %v667_v38 = vld [vmem:[%s829_s0 + $0x20] ss:$16 sps:$4 sm:$0xff]  }
   0xf   :  { %403 = vmatprep.mubr.bf16.mxu1 %v662_v35  ;;  %v665_v37 = vld [vmem:[%s829_s0 + $0x2c] ss:$16 sps:$4 sm:$0xff]   ;;  %v668_v39 = vld [vmem:[%s829_s0 + $0x28] ss:$16 sps:$4 sm:$0xff]  }
  0x10   :  { %576 = vmatpush3.bf16.msra.mxu0 %v639_v14 }
  0x11   :  { %604 = vmatpush3.bf16.msra.mxu1 %v640_v15  ;;  %577 = vmatprep.subr.bf16.mxu0 %v641_v16 }
  0x12   :  { %605 = vmatprep.subr.bf16.mxu1 %v642_v17 }
  0x14   :  { %578 = vmatpush3.bf16.msra.mxu0 %v643_v18 }
  0x15   :  { %606 = vmatpush3.bf16.msra.mxu1 %v644_v19  ;;  %579 = vmatprep.subr.bf16.mxu0 %v645_v20 }
  0x16   :  { %607 = vmatprep.subr.bf16.mxu1 %v646_v21 }
  0x18   :  { %580 = vmatpush3.bf16.msra.mxu0 %v647_v22 }
  0x19   :  { %608 = vmatpush3.bf16.msra.mxu1 %v648_v23  ;;  %581 = vmatprep.subr.bf16.mxu0 %v649_v24 }
  0x1a   :  { %609 = vmatprep.subr.bf16.mxu1 %v650_v25 }
  0x1c   :  { %582 = vmatpush3.bf16.msra.mxu0 %v651_v26 }
  0x1d   :  { %610 = vmatpush3.bf16.msra.mxu1 %v652_v27  ;;  %583 = vmatprep.subr.bf16.mxu0 %v653_v28 }
  0x1e   :  { %611 = vmatprep.subr.bf16.mxu1 %v654_v29 }
  0x20   :  { %584 = vmatpush3.bf16.msra.mxu0 %v655_v30 }
  0x21   :  { %612 = vmatpush3.bf16.msra.mxu1 %v656_v31 }
  0x23   :  { %355 = vmatmul.mubr.bf16.vlgmr.msra.gmra.mrb[0].mxu0 %v657_v32  ;;  %v455_v32 = vlaneseq }
  0x24   :  { %404 = vmatmul.mubr.bf16.vlgmr.msra.gmra.mrb[0].mxu1 %v660_v34  ;;  %362 = vmatprep.mubr.bf16.mxu0 %v663_v36  ;;  %v447_v34 = vld [vmem:[%s830_s2] sm:$0x1] }
  0x25   :  { %411 = vmatprep.mubr.bf16.mxu1 %v665_v37  ;;  %v456_v33 = vshrl.u32 %v455_v32, 7 }
  0x27   :  { %v457_v35 = vsub.s32 0, %v456_v33 }
  0x2b   :  { %363 = vmatmul.mubr.bf16.gmra.mrb[4].mxu0 %v667_v38  ;;  %v451_v38 = vld [vmem:[%s831_s3] sm:$0x1] }
  0x2c   :  { %412 = vmatmul.mubr.bf16.gmra.mrb[4].mxu1 %v668_v39 }
  0xf6   :  { %v585_v40 = vpop.f32.mrb[0].mxu0 }
  0xf7   :  { %v613_v41 = vpop.f32.mrb[0].mxu1  ;;  %v586_v42 = vpop.f32.mrb[1].mxu0 }
  0xf8   :  { %v587_v43 = vadd.f32 %v586_v42, %v585_v40  ;;  %v614_v44 = vpop.f32.mrb[1].mxu1  ;;  %v588_v45 = vpop.f32.mrb[2].mxu0 }
  0xf9   :  { %v615_v46 = vadd.f32 %v614_v44, %v613_v41  ;;  %v616_v47 = vpop.f32.mrb[2].mxu1  ;;  %v589_v48 = vpop.f32.mrb[3].mxu0 }
  0xfa   :  { %v590_v49 = vadd.f32 %v589_v48, %v588_v45  ;;  %v617_v50 = vpop.f32.mrb[3].mxu1 }
  0xfb   :  { %v406_v51 = vadd.f32 %v615_v46, %v587_v43  ;;  %v618_v52 = vadd.f32 %v617_v50, %v616_v47 }
  0xfd   :  { %v409_v53 = vadd.f32 %v618_v52, %v590_v49  ;;  %v430_v55 = vmul.f32 %v406_v51, %v406_v51 }
  0xfe   :  { %v591_v54 = vpop.f32.mrb[4].mxu0 }
  0xff   :  { %v420_v56 = vadd.f32 %v409_v53, %v406_v51  ;;  %v431_v57 = vmul.f32 %v409_v53, %v409_v53  ;;  %v619_v58 = vpop.f32.mrb[4].mxu1  ;;  %v592_v59 = vpop.f32.mrb[5].mxu0 }
 0x100   :  { %v593_v60 = vadd.f32 %v592_v59, %v591_v54  ;;  %v620_v61 = vpop.f32.mrb[5].mxu1  ;;  %v594_v62 = vpop.f32.mrb[6].mxu0 }
 0x101   :  { %v434_v63 = vadd.f32 %v431_v57, %v430_v55  ;;  %v621_v0 = vadd.f32 %v620_v61, %v619_v58  ;;  %v622_v1 = vpop.f32.mrb[6].mxu1  ;;  %v595_v2 = vpop.f32.mrb[7].mxu0 }
 0x102   :  { %v596_v3 = vadd.f32 %v595_v2, %v594_v62  ;;  %v623_v4 = vpop.f32.mrb[7].mxu1 }
 0x103   :  { %v414_v5 = vadd.f32 %v621_v0, %v593_v60  ;;  %v624_v6 = vadd.f32 %v623_v4, %v622_v1 }
 0x105   :  { %v421_v7 = vadd.f32 %v420_v56, %v414_v5  ;;  %v432_v8 = vmul.f32 %v414_v5, %v414_v5  ;;  %v417_v9 = vadd.f32 %v624_v6, %v596_v3 }
 0x107   :  { %v435_v10 = vadd.f32 %v434_v63, %v432_v8  ;;  %v422_v11 = vadd.f32 %v421_v7, %v417_v9  ;;  %v433_v12 = vmul.f32 %v417_v9, %v417_v9 }
 0x109   :  { %v423_v13 = vrot.slane %v422_v11, 4  ;;  %v436_v14 = vadd.f32 %v435_v10, %v433_v12 }
 0x10b   :  { %v424_v15 = vadd.f32 %v423_v13, %v422_v11  ;;  %v437_v16 = vrot.slane %v436_v14, 4 }
 0x10d   :  { %v425_v17 = vrot.slane %v424_v15, 2  ;;  %v438_v18 = vadd.f32 %v437_v16, %v436_v14 }
 0x10f   :  { %v426_v19 = vadd.f32 %v425_v17, %v424_v15  ;;  %v439_v20 = vrot.slane %v438_v18, 2 }
 0x111   :  { %v427_v21 = vrot.slane %v426_v19, 1  ;;  %v440_v22 = vadd.f32 %v439_v20, %v438_v18 }
 0x113   :  { %v428_v23 = vadd.f32 %v427_v21, %v426_v19  ;;  %v441_v24 = vrot.slane %v440_v22, 1 }
 0x115   :  { %v429_v25 = vmul.f32 0.03125, %v428_v23  ;;  %v442_v26 = vadd.f32 %v441_v24, %v440_v22 }
 0x117   :  { %v443_v27 = vmul.f32 0.03125, %v442_v26  ;;  %v444_v28 = vmul.f32 %v429_v25, %v429_v25 }
 0x119   :  { %v445_v29 = vsub.f32 %v443_v27, %v444_v28 }
 0x11b   :  { %v446_v30 = vmax.f32 %v445_v29, 0.0 }
 0x11d   :  { %v448_v31 = vadd.f32 1e-05, %v446_v30 }
 0x11f   :  { %669 = vrsqrt.f32 %v448_v31 }
 0x129   :  { %v670_v36 = vpop.eup %669 }
 0x12a   :  { %v450_v37 = vmul.f32 %v670_v36, %v447_v34 }
 0x12c   :  { %v452_v39 = vmul.f32 %v450_v37, %v429_v25  ;;  %v458_v40 = vrot.slane %v450_v37, %v457_v35 }
 0x12e   :  { %v453_v41 = vsub.f32 %v451_v38, %v452_v39  ;;  %v460_v42 = vmul.f32 %v458_v40, %v406_v51  ;;  %v461_v43 = vmul.f32 %v458_v40, %v409_v53  ;;  %v462_v44 = vmul.f32 %v458_v40, %v414_v5 }
 0x12f   :  { %v463_v45 = vmul.f32 %v458_v40, %v417_v9 }
 0x130   :  { %v468_v46 = vrot.slane %v453_v41, %v457_v35 }
 0x132   :  { %v470_v47 = vadd.f32 %v468_v46, %v460_v42  ;;  %v471_v48 = vadd.f32 %v468_v46, %v461_v43  ;;  %v472_v49 = vadd.f32 %v468_v46, %v462_v44  ;;  %v473_v50 = vadd.f32 %v468_v46, %v463_v45 }
 0x134   :  { %vm474_vm0 = vcmp.ge.f32.partialorder %v470_v47, 0.0  ;;  %vm475_vm1 = vcmp.ge.f32.partialorder %v471_v48, 0.0  ;;  %vm476_vm2 = vcmp.ge.f32.partialorder %v472_v49, 0.0  ;;  %vm477_vm3 = vcmp.ge.f32.partialorder %v473_v50, 0.0 }
 0x135   :  { %v478_v52 = vmul.f32 0.2, %v470_v47  ;;  %v479_v54 = vmul.f32 0.2, %v471_v48  ;;  %v480_v55 = vmul.f32 0.2, %v472_v49 }
 0x136   :  { %v481_v56 = vmul.f32 0.2, %v473_v50 }
 0x137   :  { %v482_v57 = vsel %vm474_vm0, %v470_v47, %v478_v52  ;;  %v483_v58 = vsel %vm475_vm1, %v471_v48, %v479_v54  ;;  %v484_v59 = vsel %vm476_vm2, %v472_v49, %v480_v55 }
 0x138   :  { %v485_v51 = vsel %vm477_vm3, %v473_v50, %v481_v56  ;;  %v561_v53 = vpack.c.bf16 %v483_v58, %v482_v57 }
 0x139   :  { %v566_v60 = vpack.c.bf16 %v485_v51, %v484_v59 }
 0x13a   :  { %562 = vst [vmem:[%s832_s4] sm:$0xff] %v561_v53  }
 0x13b   :  { %568 = vst [vmem:[%s832_s4 + $0x8] sm:$0xff] %v566_v60  }

// kernel: _lambda_.9
= control target key start
LH: loop header
LB: loop body
LE: loop exit
PB: predicated region body
PF: predicated region fallthrough
CT: control target
= control target key end

     0   :  { %v991_v22 = vmov 1966171168   ;;  %v156_v24 = vlaneseq  ;;  %s1226_s1 = inlined_call_operand.vmem [shape: bf16[1024,128], index: 1, kind: input, shape index: {}]   ;;  %s1227_s0 = inlined_call_operand.vmem [shape: bf16[2,1024], index: 0, kind: input, shape index: {}]   ;;  %s1228_s2 = inlined_call_operand.vmem [shape: f32[1,128], index: 2, kind: input, shape index: {}]   ;;  %s1229_s3 = inlined_call_operand.vmem [shape: f32[2,128], index: 3, kind: output, shape index: {}]  }
   0x1   :  { %v922_v0 = vld [vmem:[%s1226_s1 + $0x40] sm:$0xff]   ;;  %v926_v4 = vld [vmem:[%s1226_s1 + $0x48] sm:$0xff]   ;;  %v930_v8 = vld [vmem:[%s1226_s1 + $0x50] sm:$0xff]   ;;  %v154_v23 = vunpack.c.l.s4 %v991_v22 }
   0x2   :  { %v923_v1 = vld [vmem:[%s1226_s1 + $0xc0] sm:$0xff]   ;;  %833 = vmatprep.subr.bf16.mxu0 %v922_v0  ;;  %v927_v5 = vld [vmem:[%s1226_s1 + $0xc8] sm:$0xff]   ;;  %v931_v9 = vld [vmem:[%s1226_s1 + $0xd0] sm:$0xff]   ;;  %v157_v30 = vshrl.u32 %v156_v24, 7 }
   0x3   :  { %v924_v2 = vld [vmem:[%s1226_s1] sm:$0xff]   ;;  %855 = vmatprep.subr.bf16.mxu1 %v923_v1  ;;  %v928_v6 = vld [vmem:[%s1226_s1 + $0x8] sm:$0xff]   ;;  %v932_v10 = vld [vmem:[%s1226_s1 + $0x10] sm:$0xff]   ;;  %v155_v29 = vunpack.c.0.s8 %v154_v23 }
   0x4   :  { %v925_v3 = vld [vmem:[%s1226_s1 + $0x80] sm:$0xff]   ;;  %834 = vmatpush3.bf16.msra.mxu0 %v924_v2  ;;  %v929_v7 = vld [vmem:[%s1226_s1 + $0x88] sm:$0xff]   ;;  %v933_v11 = vld [vmem:[%s1226_s1 + $0x90] sm:$0xff]  }
   0x5   :  { %856 = vmatpush3.bf16.msra.mxu1 %v925_v3  ;;  %835 = vmatprep.subr.bf16.mxu0 %v926_v4  ;;  %v934_v12 = vld [vmem:[%s1226_s1 + $0x58] sm:$0xff]   ;;  %v938_v16 = vld [vmem:[%s1226_s1 + $0x60] sm:$0xff]   ;;  %v942_v20 = vld [vmem:[%s1226_s1 + $0x68] sm:$0xff]   ;;  %v1102_v35 = vsub.s32 %v155_v29, %v157_v30 }
   0x6   :  { %857 = vmatprep.subr.bf16.mxu1 %v927_v5  ;;  %v935_v13 = vld [vmem:[%s1226_s1 + $0xd8] sm:$0xff]   ;;  %v939_v17 = vld [vmem:[%s1226_s1 + $0xe0] sm:$0xff]   ;;  %v943_v21 = vld [vmem:[%s1226_s1 + $0xe8] sm:$0xff]  }
   0x7   :  { %v936_v14 = vld [vmem:[%s1226_s1 + $0x18] sm:$0xff]   ;;  %v940_v18 = vld [vmem:[%s1226_s1 + $0x20] sm:$0xff]   ;;  %v944_v25 = vld [vmem:[%s1226_s1 + $0x28] sm:$0xff]  }
   0x8   :  { %836 = vmatpush3.bf16.msra.mxu0 %v928_v6  ;;  %v937_v15 = vld [vmem:[%s1226_s1 + $0x98] sm:$0xff]   ;;  %v941_v19 = vld [vmem:[%s1226_s1 + $0xa0] sm:$0xff]   ;;  %v945_v26 = vld [vmem:[%s1226_s1 + $0xa8] sm:$0xff]  }
   0x9   :  { %858 = vmatpush3.bf16.msra.mxu1 %v929_v7  ;;  %837 = vmatprep.subr.bf16.mxu0 %v930_v8  ;;  %v946_v27 = vld [vmem:[%s1226_s1 + $0x70] sm:$0xff]   ;;  %v950_v33 = vld [vmem:[%s1226_s1 + $0x78] sm:$0xff]   ;;  %v15_v38 = vld [vmem:[%s1227_s0] sm:$0xff] }
   0xa   :  { %859 = vmatprep.subr.bf16.mxu1 %v931_v9  ;;  %v947_v28 = vld [vmem:[%s1226_s1 + $0xf0] sm:$0xff]   ;;  %v951_v34 = vld [vmem:[%s1226_s1 + $0xf8] sm:$0xff]   ;;  %v152_v39 = vcombine.high %v15_v38, %v15_v38  ;;  %v159_v40 = vrot.slane %v15_v38, %v1102_v35  ;;  %v955_v41 = vld [vmem:[%s1226_s1 + $0x140] sm:$0xff]  }
   0xb   :  { %v948_v31 = vld [vmem:[%s1226_s1 + $0x30] sm:$0xff]   ;;  %v952_v36 = vld [vmem:[%s1226_s1 + $0x38] sm:$0xff]   ;;  %v956_v42 = vld [vmem:[%s1226_s1 + $0x1c0] sm:$0xff]  }
   0xc   :  { %838 = vmatpush3.bf16.msra.mxu0 %v932_v10  ;;  %v949_v32 = vld [vmem:[%s1226_s1 + $0xb0] sm:$0xff]   ;;  %v953_v37 = vld [vmem:[%s1226_s1 + $0xb8] sm:$0xff]   ;;  %v167_v43 = vcombine.high %v159_v40, %v159_v40  ;;  %v175_v44 = vrot.slane %v159_v40, %v1102_v35  ;;  %v1122_v45 = vrot.slane %v152_v39, %v1102_v35  ;;  %v957_v47 = vld [vmem:[%s1226_s1 + $0x100] sm:$0xff]  }
   0xd   :  { %860 = vmatpush3.bf16.msra.mxu1 %v933_v11  ;;  %839 = vmatprep.subr.bf16.mxu0 %v934_v12  ;;  %v959_v50 = vld [vmem:[%s1226_s1 + $0x148] sm:$0xff]   ;;  %v958_v52 = vld [vmem:[%s1226_s1 + $0x180] sm:$0xff]   ;;  %v963_v57 = vld [vmem:[%s1226_s1 + $0x150] sm:$0xff]  }
   0xe   :  { %861 = vmatprep.subr.bf16.mxu1 %v935_v13  ;;  %v189_v46 = vrot.slane %v167_v43, %v1102_v35  ;;  %v168_v48 = vcombine.high %v1122_v45, %v1122_v45  ;;  %v197_v49 = vcombine.high %v175_v44, %v175_v44  ;;  %v960_v54 = vld [vmem:[%s1226_s1 + $0x1c8] sm:$0xff]   ;;  %v964_v59 = vld [vmem:[%s1226_s1 + $0x1d0] sm:$0xff]   ;;  %v967_v61 = vld [vmem:[%s1226_s1 + $0x158] sm:$0xff]  }
   0xf   :  { %v961_v55 = vld [vmem:[%s1226_s1 + $0x108] sm:$0xff]   ;;  %v965_v60 = vld [vmem:[%s1226_s1 + $0x110] sm:$0xff]   ;;  %v968_v63 = vld [vmem:[%s1226_s1 + $0x1d8] sm:$0xff]  }
  0x10   :  { %840 = vmatpush3.bf16.msra.mxu0 %v936_v14  ;;  %625 = vmatprep.mubr.bf16.mxu0 %v189_v46  ;;  %v199_v51 = vcombine.high %v189_v46, %v189_v46  ;;  %v196_v53 = vrot.slane %v168_v48, %v1102_v35  ;;  %v962_v58 = vld [vmem:[%s1226_s1 + $0x188] sm:$0xff]   ;;  %v966_v62 = vld [vmem:[%s1226_s1 + $0x190] sm:$0xff]   ;;  %v969_v0 = vld [vmem:[%s1226_s1 + $0x118] sm:$0xff]  }
  0x11   :  { %862 = vmatpush3.bf16.msra.mxu1 %v937_v15  ;;  %841 = vmatprep.subr.bf16.mxu0 %v938_v16  ;;  %v971_v1 = vld [vmem:[%s1226_s1 + $0x160] sm:$0xff]   ;;  %v970_v2 = vld [vmem:[%s1226_s1 + $0x198] sm:$0xff]   ;;  %v975_v5 = vld [vmem:[%s1226_s1 + $0x168] sm:$0xff]  }
  0x12   :  { %863 = vmatprep.subr.bf16.mxu1 %v939_v17  ;;  %665 = vmatprep.mubr.bf16.mxu1 %v199_v51  ;;  %v200_v56 = vcombine.high %v196_v53, %v196_v53  ;;  %v972_v3 = vld [vmem:[%s1226_s1 + $0x1e0] sm:$0xff]   ;;  %v976_v7 = vld [vmem:[%s1226_s1 + $0x1e8] sm:$0xff]   ;;  %v979_v9 = vld [vmem:[%s1226_s1 + $0x170] sm:$0xff]   ;;  %v182_v17 = vrot.slane %v1122_v45, %v1102_v35 }
  0x13   :  { %v973_v4 = vld [vmem:[%s1226_s1 + $0x120] sm:$0xff]   ;;  %v977_v8 = vld [vmem:[%s1226_s1 + $0x128] sm:$0xff]   ;;  %v980_v11 = vld [vmem:[%s1226_s1 + $0x1f0] sm:$0xff]  }
  0x14   :  { %842 = vmatpush3.bf16.msra.mxu0 %v940_v18  ;;  %v974_v6 = vld [vmem:[%s1226_s1 + $0x1a0] sm:$0xff]   ;;  %v978_v10 = vld [vmem:[%s1226_s1 + $0x1a8] sm:$0xff]   ;;  %v981_v12 = vld [vmem:[%s1226_s1 + $0x130] sm:$0xff]  }
  0x15   :  { %864 = vmatpush3.bf16.msra.mxu1 %v941_v19  ;;  %843 = vmatprep.subr.bf16.mxu0 %v942_v20  ;;  %v983_v13 = vld [vmem:[%s1226_s1 + $0x178] sm:$0xff]   ;;  %v982_v14 = vld [vmem:[%s1226_s1 + $0x1b0] sm:$0xff]   ;;  %v198_v19 = vcombine.high %v182_v17, %v182_v17 }
  0x16   :  { %865 = vmatprep.subr.bf16.mxu1 %v943_v21  ;;  %v984_v15 = vld [vmem:[%s1226_s1 + $0x1f8] sm:$0xff]   ;;  %v768_v21 = vld [vmem:[%s1228_s2] ss:$0 sm:$0xff] }
  0x17   :  { %v985_v16 = vld [vmem:[%s1226_s1 + $0x138] sm:$0xff]  }
  0x18   :  { %844 = vmatpush3.bf16.msra.mxu0 %v944_v25  ;;  %v986_v18 = vld [vmem:[%s1226_s1 + $0x1b8] sm:$0xff]  }
  0x19   :  { %866 = vmatpush3.bf16.msra.mxu1 %v945_v26  ;;  %845 = vmatprep.subr.bf16.mxu0 %v946_v27 }
  0x1a   :  { %867 = vmatprep.subr.bf16.mxu1 %v947_v28 }
  0x1c   :  { %846 = vmatpush3.bf16.msra.mxu0 %v948_v31 }
  0x1d   :  { %868 = vmatpush3.bf16.msra.mxu1 %v949_v32  ;;  %847 = vmatprep.subr.bf16.mxu0 %v950_v33 }
  0x1e   :  { %869 = vmatprep.subr.bf16.mxu1 %v951_v34 }
  0x20   :  { %848 = vmatpush3.bf16.msra.mxu0 %v952_v36 }
  0x21   :  { %870 = vmatpush3.bf16.msra.mxu1 %v953_v37  ;;  %877 = vmatprep.subr.bf16.mxu0 %v955_v41 }
  0x22   :  { %899 = vmatprep.subr.bf16.mxu1 %v956_v42 }
  0x23   :  { %626 = vmatmul.mubr.bf16.vlgmr.msra.gmra.mrb[0].mxu0 %v175_v44 }
  0x24   :  { %878 = vmatpush3.bf16.msra.mxu0 %v957_v47  ;;  %666 = vmatmul.mubr.bf16.vlgmr.msra.gmra.mrb[0].mxu1 %v197_v49 }
  0x25   :  { %879 = vmatprep.subr.bf16.mxu0 %v959_v50  ;;  %900 = vmatpush3.bf16.msra.mxu1 %v958_v52 }
  0x26   :  { %705 = vmatprep.mubr.bf16.mxu0 %v196_v53  ;;  %901 = vmatprep.subr.bf16.mxu1 %v960_v54 }
  0x27   :  { %745 = vmatprep.mubr.bf16.mxu1 %v200_v56 }
  0x28   :  { %880 = vmatpush3.bf16.msra.mxu0 %v961_v55 }
  0x29   :  { %881 = vmatprep.subr.bf16.mxu0 %v963_v57  ;;  %902 = vmatpush3.bf16.msra.mxu1 %v962_v58 }
  0x2a   :  { %903 = vmatprep.subr.bf16.mxu1 %v964_v59 }
  0x2c   :  { %882 = vmatpush3.bf16.msra.mxu0 %v965_v60 }
  0x2d   :  { %883 = vmatprep.subr.bf16.mxu0 %v967_v61  ;;  %904 = vmatpush3.bf16.msra.mxu1 %v966_v62 }
  0x2e   :  { %905 = vmatprep.subr.bf16.mxu1 %v968_v63 }
  0x30   :  { %884 = vmatpush3.bf16.msra.mxu0 %v969_v0 }
  0x31   :  { %885 = vmatprep.subr.bf16.mxu0 %v971_v1  ;;  %906 = vmatpush3.bf16.msra.mxu1 %v970_v2 }
  0x32   :  { %907 = vmatprep.subr.bf16.mxu1 %v972_v3 }
  0x34   :  { %886 = vmatpush3.bf16.msra.mxu0 %v973_v4 }
  0x35   :  { %887 = vmatprep.subr.bf16.mxu0 %v975_v5  ;;  %908 = vmatpush3.bf16.msra.mxu1 %v974_v6 }
  0x36   :  { %909 = vmatprep.subr.bf16.mxu1 %v976_v7 }
  0x38   :  { %888 = vmatpush3.bf16.msra.mxu0 %v977_v8 }
  0x39   :  { %889 = vmatprep.subr.bf16.mxu0 %v979_v9  ;;  %910 = vmatpush3.bf16.msra.mxu1 %v978_v10 }
  0x3a   :  { %911 = vmatprep.subr.bf16.mxu1 %v980_v11 }
  0x3c   :  { %890 = vmatpush3.bf16.msra.mxu0 %v981_v12 }
  0x3d   :  { %891 = vmatprep.subr.bf16.mxu0 %v983_v13  ;;  %912 = vmatpush3.bf16.msra.mxu1 %v982_v14 }
  0x3e   :  { %913 = vmatprep.subr.bf16.mxu1 %v984_v15 }
  0x40   :  { %892 = vmatpush3.bf16.msra.mxu0 %v985_v16 }
  0x41   :  { %914 = vmatpush3.bf16.msra.mxu1 %v986_v18 }
  0x43   :  { %706 = vmatmul.mubr.bf16.vlgmr.msra.gmra.mrb[4].mxu0 %v182_v17 }
  0x44   :  { %746 = vmatmul.mubr.bf16.vlgmr.msra.gmra.mrb[4].mxu1 %v198_v19 }
  0xf6   :  { %v849_v20 = vpop.f32.mrb[0].mxu0 }
  0xf7   :  { %v850_v22 = vpop.f32.mrb[1].mxu0  ;;  %v871_v23 = vpop.f32.mrb[0].mxu1 }
  0xf8   :  { %v851_v24 = vadd.f32 %v850_v22, %v849_v20  ;;  %v852_v25 = vpop.f32.mrb[2].mxu0  ;;  %v872_v26 = vpop.f32.mrb[1].mxu1 }
  0xf9   :  { %v853_v27 = vpop.f32.mrb[3].mxu0  ;;  %v873_v29 = vadd.f32 %v872_v26, %v871_v23  ;;  %v874_v30 = vpop.f32.mrb[2].mxu1 }
  0xfa   :  { %v628_v28 = vadd.f32 %v851_v24, %v768_v21  ;;  %v875_v31 = vpop.f32.mrb[3].mxu1 }
  0xfc   :  { %v668_v32 = vadd.f32 %v873_v29, %v628_v28 }
 0x116   :  { %v893_v33 = vpop.f32.mrb[4].mxu0 }
 0x117   :  { %v894_v34 = vpop.f32.mrb[5].mxu0  ;;  %v915_v35 = vpop.f32.mrb[4].mxu1 }
 0x118   :  { %v895_v36 = vadd.f32 %v894_v34, %v893_v33  ;;  %v896_v37 = vpop.f32.mrb[6].mxu0  ;;  %v916_v38 = vpop.f32.mrb[5].mxu1 }
 0x119   :  { %v897_v39 = vpop.f32.mrb[7].mxu0  ;;  %v917_v41 = vadd.f32 %v916_v38, %v915_v35  ;;  %v918_v42 = vpop.f32.mrb[6].mxu1 }
 0x11a   :  { %v708_v40 = vadd.f32 %v895_v36, %v668_v32  ;;  %v919_v43 = vpop.f32.mrb[7].mxu1 }
 0x11c   :  { %v748_v44 = vadd.f32 %v917_v41, %v708_v40 }
 0x11e   :  { %v753_v45 = vand.u32 2147483647, %v748_v44  ;;  %vm760_vm0 = vcmp.ge.f32.partialorder %v748_v44, 0.0 }
 0x120   :  { %v754_v46 = vsub.f32 0.0, %v753_v45 }
 0x122   :  { %v755_v47 = vmul.f32 1.442695, %v754_v46 }
 0x124   :  { %987 = vpow2.f32 %v755_v47 }
 0x12e   :  { %v988_v48 = vpop.eup %987 }
 0x12f   :  { %v757_v49 = vadd.f32 1.0, %v988_v48 }
 0x131   :  { %989 = vrcp.f32 %v757_v49 }
 0x13b   :  { %v990_v50 = vpop.eup %989 }
 0x13c   :  { %v761_v51 = vmul.f32 %v990_v50, %v988_v48 }
 0x13e   :  { %v762_v52 = vsel %vm760_vm0, %v990_v50, %v761_v51 }
 0x13f   :  { %763 = vst [vmem:[%s1229_s3] sm:$0x3] %v762_v52 }

</bundles_post_ra>
